<compile_context>
chip_gen: v7x
topology: tpu7x:2x2x1
jax: 0.10.0
libtpu: 0.0.40
codegen_flags: <defaults>
</compile_context>

<pallas_src>
import jax
import jax.numpy as jnp
from jax import lax
from jax.experimental import pallas as pl
from jax.experimental.pallas import tpu as pltpu


def _round_up(x, m):
    return ((x + m - 1) // m) * m


# ---------------------------------------------------------------------------
# Fused kernel builder
# ---------------------------------------------------------------------------
def _make_fused_kernel(num_layers, batch_p, chunk_t, hidden_p):
    L, Bp, TT, Hp = num_layers, batch_p, chunk_t, hidden_p

    def sigmoid(v):
        # Exact tanh-based sigmoid: keeps the divide off the VALU slot.
        return 0.5 * jnp.tanh(0.5 * v) + 0.5

    def kernel(*refs):
        # ---- unpack refs (inputs..., outputs..., scratch...) ----
        x_ref, s_ref = refs[0], refs[1]
        w_ih = [refs[2 + 3 * l] for l in range(L)]   # (D_l, 4Hp)
        w_hh = [refs[3 + 3 * l] for l in range(L)]   # (Hp, 4Hp)
        bias = [refs[4 + 3 * l] for l in range(L)]   # (1, 4Hp)  (b_ih + b_hh)
        base = 2 + 3 * L
        w_fc_h, w_fc_s, fc_b = refs[base], refs[base + 1], refs[base + 2]
        out_ref = refs[base + 3]
        gates_sc, seq_sc, h_sc, c_sc = refs[base + 4:base + 8]

        step = pl.program_id(0)

        # Zero the per-layer recurrent state once (persists across grid steps).
        @pl.when(step == 0)
        def _init():
            h_sc[...] = jnp.zeros_like(h_sc)
            c_sc[...] = jnp.zeros_like(c_sc)

        def recurrence(l, write_seq):
            # Hoist the (Hp, 4Hp) weight load out of the serial loop.
            # TODO(synk): push it once into the MXU (matmul_push_rhs) instead
            # of re-issuing the same RHS every timestep.
            w_hh_l = w_hh[l][...]

            def body(t, carry):
                # Bp is a multiple of 8 -> sublane-aligned dynamic slices.
                row = pl.multiple_of(t * Bp, Bp)
                h = h_sc[l]                            # (Bp, Hp)
                c = c_sc[l]                            # (Bp, Hp)
                # Precomputed input gates + recurrent projection.
                g = gates_sc[pl.ds(row, Bp)] + jnp.dot(
                    h, w_hh_l, preferred_element_type=jnp.float32)
                # Gate order (i, f, o, g); Hp is a multiple of 128 so every
                # slice below is lane-aligned.
                sig = sigmoid(g[:, :3 * Hp])
                i_g = sig[:, 0:Hp]
                f_g = sig[:, Hp:2 * Hp]
                o_g = sig[:, 2 * Hp:3 * Hp]
                g_g = jnp.tanh(g[:, 3 * Hp:4 * Hp])
                c_new = f_g * c + i_g * g_g
                h_new = o_g * jnp.tanh(c_new)
                h_sc[l] = h_new
                c_sc[l] = c_new
                if write_seq:                          # skipped for last layer
                    seq_sc[pl.ds(row, Bp)] = h_new
                return carry

            lax.fori_loop(0, TT, body, 0, unroll=(TT <= 32))

        # Layer 0: hoisted input projection for the whole chunk - one big
        # (TT*Bp, D) x (D, 4Hp) MXU matmul, bias added once.
        gates_sc[...] = (
            jnp.dot(x_ref[...], w_ih[0][...], preferred_element_type=jnp.float32)
            + bias[0][...])
        recurrence(0, write_seq=(L > 1))

        # Remaining layers: input comes from the VMEM inter-layer slab.
        for l in range(1, L):
            gates_sc[...] = (
                jnp.dot(seq_sc[...], w_ih[l][...],
                        preferred_element_type=jnp.float32)
                + bias[l][...])
            recurrence(l, write_seq=(l < L - 1))

        # Fused fc on the final hidden state of the top layer:
        # fc(concat([h_last, s])) == h_last @ W_h + s @ W_s + b
        @pl.when(step == pl.num_programs(0) - 1)
        def _fc():
            h_last = h_sc[L - 1]                       # == output[:, -1, :]
            out_ref[...] = (
                jnp.dot(h_last, w_fc_h[...], preferred_element_type=jnp.float32)
                + jnp.dot(s_ref[...], w_fc_s[...],
                          preferred_element_type=jnp.float32)
                + fc_b[...])

    return kernel


# ---------------------------------------------------------------------------
# Wrapper
# ---------------------------------------------------------------------------
def lstm_network_forward(x, s, kp, *, seq_chunk=None,
                         vmem_budget_bytes=40 * 1024 * 1024):
    """x: (B, T, in_features) batch-first, s: (B, S_dim). -> (B, out_features)."""
    x = x.astype(jnp.float32)
    s = s.astype(jnp.float32)
    B, T, D = x.shape
    L = len(kp["lstm"])
    Hp = kp["lstm"][0][1].shape[0]          # w_hh is (Hp, 4Hp)
    S_dim = s.shape[1]
    O = kp["fc_w_h"].shape[1]
    Bp = max(8, _round_up(B, 8))            # sublane-aligned batch

    # Single host layout pass: batch-first -> time-major, batch padded to Bp.
    # TODO(synk): fold this pass into the kernel's layer-0 read.
    x_tm = jnp.zeros((T, Bp, D), jnp.float32).at[:, :B, :].set(
        jnp.swapaxes(x, 0, 1))
    x_flat = x_tm.reshape(T * Bp, D)
    s_p = jnp.zeros((Bp, S_dim), jnp.float32).at[:B, :].set(s)

    weight_arrays = [a for trip in kp["lstm"] for a in trip] + [
        kp["fc_w_h"], kp["fc_w_s"], kp["fc_b"]]
    weight_bytes = 4 * sum(int(a.size) for a in weight_arrays)

    def vmem_estimate(tt):
        x_blk = tt * Bp * D * 4
        s_blk = Bp * S_dim * 4
        out_blk = Bp * O * 4
        gates = tt * Bp * 4 * Hp * 4
        seq = tt * Bp * Hp * 4
        state = 2 * L * Bp * Hp * 4
        # pipeline double-buffers inputs/outputs (incl. grid-invariant weights)
        return 2 * (x_blk + s_blk + weight_bytes + out_blk) + gates + seq + state

    if seq_chunk is None:
        TT = 1
        for tt in range(T, 0, -1):
            if T % tt == 0 and vmem_estimate(tt) <= vmem_budget_bytes:
                TT = tt
                break
    else:
        TT = seq_chunk
    assert T % TT == 0, "seq_chunk must divide the sequence length"
    grid = (T // TT,)

    in_specs = [
        pl.BlockSpec((TT * Bp, D), lambda i: (i, 0)),    # x chunk (time-major)
        pl.BlockSpec((Bp, S_dim), lambda i: (0, 0)),     # summary stats
    ]
    args = [x_flat, s_p]
    for (w_ih_t, w_hh_t, b) in kp["lstm"]:
        in_specs += [
            pl.BlockSpec(w_ih_t.shape, lambda i: (0, 0)),  # resident weights
            pl.BlockSpec(w_hh_t.shape, lambda i: (0, 0)),
            pl.BlockSpec(b.shape, lambda i: (0, 0)),
        ]
        args += [w_ih_t, w_hh_t, b]
    in_specs += [
        pl.BlockSpec(kp["fc_w_h"].shape, lambda i: (0, 0)),
        pl.BlockSpec(kp["fc_w_s"].shape, lambda i: (0, 0)),
        pl.BlockSpec(kp["fc_b"].shape, lambda i: (0, 0)),
    ]
    args += [kp["fc_w_h"], kp["fc_w_s"], kp["fc_b"]]

    # Advisory cost estimate for XLA scheduling.
    flops = 0
    d_prev = D
    for _ in range(L):
        flops += 2 * T * Bp * 4 * Hp * (d_prev + Hp)
        d_prev = Hp
    flops += 2 * Bp * O * (Hp + S_dim)
    transcendentals = 5 * T * Bp * Hp * L
    bytes_accessed = 4 * (int(x_flat.size) + int(s_p.size) + Bp * O) + weight_bytes

    est = vmem_estimate(TT)
    vmem_limit = int(min(max(2 * est, 32 * 1024 * 1024), 96 * 1024 * 1024))

    kernel = _make_fused_kernel(L, Bp, TT, Hp)
    out = pl.pallas_call(
        kernel,
        out_shape=jax.ShapeDtypeStruct((Bp, O), jnp.float32),
        grid_spec=pltpu.PrefetchScalarGridSpec(
            num_scalar_prefetch=0,
            grid=grid,
            in_specs=in_specs,
            out_specs=pl.BlockSpec((Bp, O), lambda i: (0, 0)),
            scratch_shapes=[
                pltpu.VMEM((TT * Bp, 4 * Hp), jnp.float32),  # hoisted input gates
                pltpu.VMEM((TT * Bp, Hp), jnp.float32),      # inter-layer slab
                pltpu.VMEM((L, Bp, Hp), jnp.float32),        # h carry (per layer)
                pltpu.VMEM((L, Bp, Hp), jnp.float32),        # c carry (per layer)
            ],
        ),
        compiler_params=pltpu.CompilerParams(
            dimension_semantics=("arbitrary",),              # serial recurrence
            vmem_limit_bytes=vmem_limit,
        ),
        cost_estimate=pl.CostEstimate(
            flops=int(flops),
            transcendentals=int(transcendentals),
            bytes_accessed=int(bytes_accessed),
        ),
    )(*args)
    return out[:B]


# ---------------------------------------------------------------------------
# PyTorch-layout parameters (deterministic, nn.LSTM-style uniform init)
# ---------------------------------------------------------------------------
def init_torch_params(key, in_features, hidden_size, num_layers, s_dim, out_features):
    tp = {"lstm": []}
    bound = 1.0 / (hidden_size ** 0.5)
    for layer in range(num_layers):
        d_in = in_features if layer == 0 else hidden_size
        key, k1, k2, k3, k4 = jax.random.split(key, 5)
        w_ih = jax.random.uniform(k1, (4 * hidden_size, d_in), jnp.float32, -bound, bound)
        w_hh = jax.random.uniform(k2, (4 * hidden_size, hidden_size), jnp.float32, -bound, bound)
        b_ih = jax.random.uniform(k3, (4 * hidden_size,), jnp.float32, -bound, bound)
        b_hh = jax.random.uniform(k4, (4 * hidden_size,), jnp.float32, -bound, bound)
        tp["lstm"].append((w_ih, w_hh, b_ih, b_hh))
    key, k5, k6 = jax.random.split(key, 3)
    fc_in = hidden_size + s_dim
    fb = 1.0 / (fc_in ** 0.5)
    tp["fc_w"] = jax.random.uniform(k5, (out_features, fc_in), jnp.float32, -fb, fb)
    tp["fc_b"] = jax.random.uniform(k6, (out_features,), jnp.float32, -fb, fb)
    return tp


# ---------------------------------------------------------------------------
# Convert PyTorch-layout params to the kernel layout:
#   * gate order (i,f,g,o) -> (i,f,o,g)  (one sigmoid slab + one tanh slab)
#   * hidden size zero-padded to a multiple of 128 lanes (Hp)
#   * weights transposed to (in, 4Hp), biases folded (b_ih + b_hh)
#   * fc split into the h part and the s part
# ---------------------------------------------------------------------------
def prepare_params(tp, hidden_size, lane=128):
    H = hidden_size
    Hp = _round_up(H, lane)

    def reorder_pad_gate_rows(w):
        # w: (4H, K) PyTorch gate-row layout -> (4Hp, K), gate order (i,f,o,g)
        i, f, g, o = w[0:H], w[H:2 * H], w[2 * H:3 * H], w[3 * H:4 * H]
        blocks = []
        for blk in (i, f, o, g):
            if Hp > H:
                blk = jnp.concatenate(
                    [blk, jnp.zeros((Hp - H,) + blk.shape[1:], blk.dtype)], axis=0)
            blocks.append(blk)
        return jnp.concatenate(blocks, axis=0)

    kp = {"lstm": []}
    for idx, (w_ih, w_hh, b_ih, b_hh) in enumerate(tp["lstm"]):
        w_ih_r = reorder_pad_gate_rows(w_ih)                    # (4Hp, d_in)
        w_hh_r = reorder_pad_gate_rows(w_hh)                    # (4Hp, H)
        b_r = reorder_pad_gate_rows((b_ih + b_hh)[:, None])[:, 0]
        w_hh_r = jnp.pad(w_hh_r, ((0, 0), (0, Hp - H)))         # pad recurrent input
        if idx > 0:
            w_ih_r = jnp.pad(w_ih_r, ((0, 0), (0, Hp - H)))     # pad inter-layer input
        kp["lstm"].append((w_ih_r.T, w_hh_r.T, b_r.reshape(1, -1)))

    fc_w, fc_b = tp["fc_w"], tp["fc_b"]                         # (O, H+S), (O,)
    w_h = jnp.pad(fc_w[:, :H], ((0, 0), (0, Hp - H)))
    kp["fc_w_h"] = w_h.T                                        # (Hp, O)
    kp["fc_w_s"] = fc_w[:, H:].T                                # (S, O)
    kp["fc_b"] = fc_b.reshape(1, -1)                            # (1, O)
    return kp


# ---------------------------------------------------------------------------
# Pure-JAX reference (PyTorch semantics, unpadded PyTorch-layout params)
# ---------------------------------------------------------------------------
def reference_forward(x, s, tp, hidden_size):
    H = hidden_size
    seq = jnp.transpose(x.astype(jnp.float32), (1, 0, 2))       # (T, B, D)
    for (w_ih, w_hh, b_ih, b_hh) in tp["lstm"]:
        T, B, _ = seq.shape
        h = jnp.zeros((B, H), jnp.float32)
        c = jnp.zeros((B, H), jnp.float32)
        outs = []
        for t in range(T):
            g = seq[t] @ w_ih.T + h @ w_hh.T + b_ih + b_hh
            i_g = jax.nn.sigmoid(g[:, :H])
            f_g = jax.nn.sigmoid(g[:, H:2 * H])
            g_g = jnp.tanh(g[:, 2 * H:3 * H])
            o_g = jax.nn.sigmoid(g[:, 3 * H:])
            c = f_g * c + i_g * g_g
            h = o_g * jnp.tanh(c)
            outs.append(h)
        seq = jnp.stack(outs, axis=0)
    feat = jnp.concatenate([seq[-1], s.astype(jnp.float32)], axis=1)
    return feat @ tp["fc_w"].T + tp["fc_b"]


if __name__ == "__main__":
    # x: (batch, seq_len, in_features), s: (batch, stats_dim)
    B, T, IN_F, HID, N_LAYERS, S_DIM, OUT_F = 2, 8, 4, 32, 2, 6, 3

    key = jax.random.PRNGKey(0)
    k_x, k_s, k_p = jax.random.split(key, 3)
    x = jax.random.normal(k_x, (B, T, IN_F), jnp.float32)
    s = jax.random.normal(k_s, (B, S_DIM), jnp.float32)

    torch_params = init_torch_params(k_p, IN_F, HID, N_LAYERS, S_DIM, OUT_F)
    kernel_params = prepare_params(torch_params, HID)

    ref = reference_forward(x, s, torch_params, HID)

    # Single-chunk run (whole sequence in one grid step).
    out_full = jax.block_until_ready(lstm_network_forward(x, s, kernel_params))
    # Chunked run (grid of 2), exercising the cross-chunk h/c carry.
    out_chunk = jax.block_until_ready(
        lstm_network_forward(x, s, kernel_params, seq_chunk=4))

    assert out_full.shape == (B, OUT_F)
    assert jnp.allclose(out_full, ref, rtol=1e-3, atol=1e-4), "mismatch (full)"
    assert jnp.allclose(out_chunk, ref, rtol=1e-3, atol=1e-4), "mismatch (chunked)"

    print("KERNEL_OK")
</pallas_src>

<mosaic_0001>
module attributes {stable_mosaic.version = 11 : i64} {
  func.func @kernel(%arg0: i32, %arg1: memref<64x4xf32, #tpu.memory_space<vmem>>, %arg2: memref<8x6xf32, #tpu.memory_space<vmem>>, %arg3: memref<4x512xf32, #tpu.memory_space<vmem>>, %arg4: memref<128x512xf32, #tpu.memory_space<vmem>>, %arg5: memref<1x512xf32, #tpu.memory_space<vmem>>, %arg6: memref<128x512xf32, #tpu.memory_space<vmem>>, %arg7: memref<128x512xf32, #tpu.memory_space<vmem>>, %arg8: memref<1x512xf32, #tpu.memory_space<vmem>>, %arg9: memref<128x3xf32, #tpu.memory_space<vmem>>, %arg10: memref<6x3xf32, #tpu.memory_space<vmem>>, %arg11: memref<1x3xf32, #tpu.memory_space<vmem>>, %arg12: memref<8x3xf32, #tpu.memory_space<vmem>>, %arg13: memref<64x512xf32, #tpu.memory_space<vmem>>, %arg14: memref<64x128xf32, #tpu.memory_space<vmem>>, %arg15: memref<2x8x128xf32, #tpu.memory_space<vmem>>, %arg16: memref<2x8x128xf32, #tpu.memory_space<vmem>>) attributes {dimension_semantics = [#tpu.dimension_semantics<arbitrary>], iteration_bounds = array<i64: 1>, scalar_prefetch = 0 : i64, scratch_operands = 4 : i64, tpu.core_type = #tpu.core_type<tc>, window_params = [{transform_indices = @transform_0, window_bounds = array<i64: 64, 4>}, {pipeline_mode = #tpu.pipeline_mode<synchronous>, transform_indices = @transform_1, window_bounds = array<i64: 8, 6>}, {pipeline_mode = #tpu.pipeline_mode<synchronous>, transform_indices = @transform_2, window_bounds = array<i64: 4, 512>}, {pipeline_mode = #tpu.pipeline_mode<synchronous>, transform_indices = @transform_3, window_bounds = array<i64: 128, 512>}, {pipeline_mode = #tpu.pipeline_mode<synchronous>, transform_indices = @transform_4, window_bounds = array<i64: 1, 512>}, {pipeline_mode = #tpu.pipeline_mode<synchronous>, transform_indices = @transform_5, window_bounds = array<i64: 128, 512>}, {pipeline_mode = #tpu.pipeline_mode<synchronous>, transform_indices = @transform_6, window_bounds = array<i64: 128, 512>}, {pipeline_mode = #tpu.pipeline_mode<synchronous>, transform_indices = @transform_7, window_bounds = array<i64: 1, 512>}, {pipeline_mode = #tpu.pipeline_mode<synchronous>, transform_indices = @transform_8, window_bounds = array<i64: 128, 3>}, {pipeline_mode = #tpu.pipeline_mode<synchronous>, transform_indices = @transform_9, window_bounds = array<i64: 6, 3>}, {pipeline_mode = #tpu.pipeline_mode<synchronous>, transform_indices = @transform_10, window_bounds = array<i64: 1, 3>}, {pipeline_mode = #tpu.pipeline_mode<synchronous>, transform_indices = @transform_11, window_bounds = array<i64: 8, 3>}]} {
    %c0_i32 = arith.constant 0 : i32
    %0 = arith.cmpi eq, %arg0, %c0_i32 : i32
    %1 = arith.extui %0 : i1 to i32
    %c0_i32_0 = arith.constant 0 : i32
    %2 = arith.cmpi ne, %1, %c0_i32_0 : i32
    scf.if %2 {
      %cst_328 = arith.constant 0.000000e+00 : f32
      %582 = vector.broadcast %cst_328 : f32 to vector<2x8x128xf32>
      %c0_329 = arith.constant 0 : index
      %c0_330 = arith.constant 0 : index
      %c0_331 = arith.constant 0 : index
      %583 = vector.load %arg15[%c0_329, %c0_330, %c0_331] : memref<2x8x128xf32, #tpu.memory_space<vmem>>, vector<2x8x128xf32>
      tpu.vector_store %arg15[%c0_329, %c0_330, %c0_331], %582 {strides = array<i32>} : memref<2x8x128xf32, #tpu.memory_space<vmem>>, vector<2x8x128xf32>,
      %cst_332 = arith.constant 0.000000e+00 : f32
      %584 = vector.broadcast %cst_332 : f32 to vector<2x8x128xf32>
      %c0_333 = arith.constant 0 : index
      %c0_334 = arith.constant 0 : index
      %c0_335 = arith.constant 0 : index
      %585 = vector.load %arg16[%c0_333, %c0_334, %c0_335] : memref<2x8x128xf32, #tpu.memory_space<vmem>>, vector<2x8x128xf32>
      tpu.vector_store %arg16[%c0_333, %c0_334, %c0_335], %584 {strides = array<i32>} : memref<2x8x128xf32, #tpu.memory_space<vmem>>, vector<2x8x128xf32>,
    } else {
    }
    %c0 = arith.constant 0 : index
    %c0_1 = arith.constant 0 : index
    %3 = vector.load %arg1[%c0, %c0_1] : memref<64x4xf32, #tpu.memory_space<vmem>>, vector<64x4xf32>
    %c0_2 = arith.constant 0 : index
    %c0_3 = arith.constant 0 : index
    %4 = vector.load %arg3[%c0_2, %c0_3] : memref<4x512xf32, #tpu.memory_space<vmem>>, vector<4x512xf32>
    %cst = arith.constant dense<0.000000e+00> : vector<64x512xf32>
    %5 = tpu.matmul %3, %4, %cst {dimension_numbers = #tpu.dot_dimension_numbers<[1], [0], [0], [1], [0, 0, 1, 1], [], []>} : vector<64x4xf32>, vector<4x512xf32>, vector<64x512xf32> -> vector<64x512xf32>
    %c0_4 = arith.constant 0 : index
    %c0_5 = arith.constant 0 : index
    %6 = vector.load %arg5[%c0_4, %c0_5] : memref<1x512xf32, #tpu.memory_space<vmem>>, vector<1x512xf32>
    %7 = vector.broadcast %6 : vector<1x512xf32> to vector<64x512xf32>
    %8 = arith.addf %5, %7 : vector<64x512xf32>
    %c0_6 = arith.constant 0 : index
    %c0_7 = arith.constant 0 : index
    %9 = vector.load %arg13[%c0_6, %c0_7] : memref<64x512xf32, #tpu.memory_space<vmem>>, vector<64x512xf32>
    tpu.vector_store %arg13[%c0_6, %c0_7], %8 {strides = array<i32>} : memref<64x512xf32, #tpu.memory_space<vmem>>, vector<64x512xf32>,
    %c0_8 = arith.constant 0 : index
    %c0_9 = arith.constant 0 : index
    %10 = vector.load %arg4[%c0_8, %c0_9] : memref<128x512xf32, #tpu.memory_space<vmem>>, vector<128x512xf32>
    %c0_i32_10 = arith.constant 0 : i32
    %c8_i32 = arith.constant 8 : i32
    %11 = arith.muli %c0_i32_10, %c8_i32 : i32
    %12 = tpu.assume_multiple %11, 8 : i32
    %c0_11 = arith.constant 0 : index
    %c0_12 = arith.constant 0 : index
    %c0_13 = arith.constant 0 : index
    %13 = vector.load %arg15[%c0_11, %c0_12, %c0_13] : memref<2x8x128xf32, #tpu.memory_space<vmem>>, vector<1x8x128xf32>
    %14 = vector.shape_cast %13 : vector<1x8x128xf32> to vector<8x128xf32>
    %c0_14 = arith.constant 0 : index
    %c0_15 = arith.constant 0 : index
    %c0_16 = arith.constant 0 : index
    %15 = vector.load %arg16[%c0_14, %c0_15, %c0_16] : memref<2x8x128xf32, #tpu.memory_space<vmem>>, vector<1x8x128xf32>
    %16 = vector.shape_cast %15 : vector<1x8x128xf32> to vector<8x128xf32>
    %17 = arith.index_cast %12 : i32 to index
    %c0_17 = arith.constant 0 : index
    %18 = vector.load %arg13[%17, %c0_17] : memref<64x512xf32, #tpu.memory_space<vmem>>, vector<8x512xf32>
    %cst_18 = arith.constant dense<0.000000e+00> : vector<8x512xf32>
    %19 = tpu.matmul %14, %10, %cst_18 {dimension_numbers = #tpu.dot_dimension_numbers<[1], [0], [0], [1], [0, 0, 1, 1], [], []>} : vector<8x128xf32>, vector<128x512xf32>, vector<8x512xf32> -> vector<8x512xf32>
    %20 = arith.addf %18, %19 : vector<8x512xf32>
    %21 = vector.extract_strided_slice %20 {offsets = [0, 0], sizes = [8, 384], strides = [1, 1]} : vector<8x512xf32> to vector<8x384xf32>
    %cst_19 = arith.constant 5.000000e-01 : f32
    %22 = vector.broadcast %cst_19 : f32 to vector<8x384xf32>
    %23 = arith.mulf %22, %21 : vector<8x384xf32>
    %24 = math.tanh %23 : vector<8x384xf32>
    %cst_20 = arith.constant 5.000000e-01 : f32
    %25 = vector.broadcast %cst_20 : f32 to vector<8x384xf32>
    %26 = arith.mulf %25, %24 : vector<8x384xf32>
    %cst_21 = arith.constant 5.000000e-01 : f32
    %27 = vector.broadcast %cst_21 : f32 to vector<8x384xf32>
    %28 = arith.addf %26, %27 : vector<8x384xf32>
    %29 = vector.extract_strided_slice %28 {offsets = [0, 0], sizes = [8, 128], strides = [1, 1]} : vector<8x384xf32> to vector<8x128xf32>
    %30 = vector.extract_strided_slice %28 {offsets = [0, 128], sizes = [8, 128], strides = [1, 1]} : vector<8x384xf32> to vector<8x128xf32>
    %31 = vector.extract_strided_slice %28 {offsets = [0, 256], sizes = [8, 128], strides = [1, 1]} : vector<8x384xf32> to vector<8x128xf32>
    %32 = vector.extract_strided_slice %20 {offsets = [0, 384], sizes = [8, 128], strides = [1, 1]} : vector<8x512xf32> to vector<8x128xf32>
    %33 = math.tanh %32 : vector<8x128xf32>
    %34 = arith.mulf %30, %16 : vector<8x128xf32>
    %35 = arith.mulf %29, %33 : vector<8x128xf32>
    %36 = arith.addf %34, %35 : vector<8x128xf32>
    %37 = math.tanh %36 : vector<8x128xf32>
    %38 = arith.mulf %31, %37 : vector<8x128xf32>
    %c0_22 = arith.constant 0 : index
    %c0_23 = arith.constant 0 : index
    %c0_24 = arith.constant 0 : index
    %39 = vector.load %arg15[%c0_22, %c0_23, %c0_24] : memref<2x8x128xf32, #tpu.memory_space<vmem>>, vector<1x8x128xf32>
    %40 = vector.shape_cast %39 : vector<1x8x128xf32> to vector<8x128xf32>
    %41 = vector.shape_cast %38 : vector<8x128xf32> to vector<1x8x128xf32>
    tpu.vector_store %arg15[%c0_22, %c0_23, %c0_24], %41 {strides = array<i32>} : memref<2x8x128xf32, #tpu.memory_space<vmem>>, vector<1x8x128xf32>,
    %c0_25 = arith.constant 0 : index
    %c0_26 = arith.constant 0 : index
    %c0_27 = arith.constant 0 : index
    %42 = vector.load %arg16[%c0_25, %c0_26, %c0_27] : memref<2x8x128xf32, #tpu.memory_space<vmem>>, vector<1x8x128xf32>
    %43 = vector.shape_cast %42 : vector<1x8x128xf32> to vector<8x128xf32>
    %44 = vector.shape_cast %36 : vector<8x128xf32> to vector<1x8x128xf32>
    tpu.vector_store %arg16[%c0_25, %c0_26, %c0_27], %44 {strides = array<i32>} : memref<2x8x128xf32, #tpu.memory_space<vmem>>, vector<1x8x128xf32>,
    %45 = arith.index_cast %12 : i32 to index
    %c0_28 = arith.constant 0 : index
    %46 = vector.load %arg14[%45, %c0_28] : memref<64x128xf32, #tpu.memory_space<vmem>>, vector<8x128xf32>
    tpu.vector_store %arg14[%45, %c0_28], %38 {strides = array<i32>} : memref<64x128xf32, #tpu.memory_space<vmem>>, vector<8x128xf32>,
    %c1_i32 = arith.constant 1 : i32
    %c8_i32_29 = arith.constant 8 : i32
    %47 = arith.muli %c1_i32, %c8_i32_29 : i32
    %48 = tpu.assume_multiple %47, 8 : i32
    %c0_30 = arith.constant 0 : index
    %c0_31 = arith.constant 0 : index
    %c0_32 = arith.constant 0 : index
    %49 = vector.load %arg15[%c0_30, %c0_31, %c0_32] : memref<2x8x128xf32, #tpu.memory_space<vmem>>, vector<1x8x128xf32>
    %50 = vector.shape_cast %49 : vector<1x8x128xf32> to vector<8x128xf32>
    %c0_33 = arith.constant 0 : index
    %c0_34 = arith.constant 0 : index
    %c0_35 = arith.constant 0 : index
    %51 = vector.load %arg16[%c0_33, %c0_34, %c0_35] : memref<2x8x128xf32, #tpu.memory_space<vmem>>, vector<1x8x128xf32>
    %52 = vector.shape_cast %51 : vector<1x8x128xf32> to vector<8x128xf32>
    %53 = arith.index_cast %48 : i32 to index
    %c0_36 = arith.constant 0 : index
    %54 = vector.load %arg13[%53, %c0_36] : memref<64x512xf32, #tpu.memory_space<vmem>>, vector<8x512xf32>
    %cst_37 = arith.constant dense<0.000000e+00> : vector<8x512xf32>
    %55 = tpu.matmul %50, %10, %cst_37 {dimension_numbers = #tpu.dot_dimension_numbers<[1], [0], [0], [1], [0, 0, 1, 1], [], []>} : vector<8x128xf32>, vector<128x512xf32>, vector<8x512xf32> -> vector<8x512xf32>
    %56 = arith.addf %54, %55 : vector<8x512xf32>
    %57 = vector.extract_strided_slice %56 {offsets = [0, 0], sizes = [8, 384], strides = [1, 1]} : vector<8x512xf32> to vector<8x384xf32>
    %cst_38 = arith.constant 5.000000e-01 : f32
    %58 = vector.broadcast %cst_38 : f32 to vector<8x384xf32>
    %59 = arith.mulf %58, %57 : vector<8x384xf32>
    %60 = math.tanh %59 : vector<8x384xf32>
    %cst_39 = arith.constant 5.000000e-01 : f32
    %61 = vector.broadcast %cst_39 : f32 to vector<8x384xf32>
    %62 = arith.mulf %61, %60 : vector<8x384xf32>
    %cst_40 = arith.constant 5.000000e-01 : f32
    %63 = vector.broadcast %cst_40 : f32 to vector<8x384xf32>
    %64 = arith.addf %62, %63 : vector<8x384xf32>
    %65 = vector.extract_strided_slice %64 {offsets = [0, 0], sizes = [8, 128], strides = [1, 1]} : vector<8x384xf32> to vector<8x128xf32>
    %66 = vector.extract_strided_slice %64 {offsets = [0, 128], sizes = [8, 128], strides = [1, 1]} : vector<8x384xf32> to vector<8x128xf32>
    %67 = vector.extract_strided_slice %64 {offsets = [0, 256], sizes = [8, 128], strides = [1, 1]} : vector<8x384xf32> to vector<8x128xf32>
    %68 = vector.extract_strided_slice %56 {offsets = [0, 384], sizes = [8, 128], strides = [1, 1]} : vector<8x512xf32> to vector<8x128xf32>
    %69 = math.tanh %68 : vector<8x128xf32>
    %70 = arith.mulf %66, %52 : vector<8x128xf32>
    %71 = arith.mulf %65, %69 : vector<8x128xf32>
    %72 = arith.addf %70, %71 : vector<8x128xf32>
    %73 = math.tanh %72 : vector<8x128xf32>
    %74 = arith.mulf %67, %73 : vector<8x128xf32>
    %c0_41 = arith.constant 0 : index
    %c0_42 = arith.constant 0 : index
    %c0_43 = arith.constant 0 : index
    %75 = vector.load %arg15[%c0_41, %c0_42, %c0_43] : memref<2x8x128xf32, #tpu.memory_space<vmem>>, vector<1x8x128xf32>
    %76 = vector.shape_cast %75 : vector<1x8x128xf32> to vector<8x128xf32>
    %77 = vector.shape_cast %74 : vector<8x128xf32> to vector<1x8x128xf32>
    tpu.vector_store %arg15[%c0_41, %c0_42, %c0_43], %77 {strides = array<i32>} : memref<2x8x128xf32, #tpu.memory_space<vmem>>, vector<1x8x128xf32>,
    %c0_44 = arith.constant 0 : index
    %c0_45 = arith.constant 0 : index
    %c0_46 = arith.constant 0 : index
    %78 = vector.load %arg16[%c0_44, %c0_45, %c0_46] : memref<2x8x128xf32, #tpu.memory_space<vmem>>, vector<1x8x128xf32>
    %79 = vector.shape_cast %78 : vector<1x8x128xf32> to vector<8x128xf32>
    %80 = vector.shape_cast %72 : vector<8x128xf32> to vector<1x8x128xf32>
    tpu.vector_store %arg16[%c0_44, %c0_45, %c0_46], %80 {strides = array<i32>} : memref<2x8x128xf32, #tpu.memory_space<vmem>>, vector<1x8x128xf32>,
    %81 = arith.index_cast %48 : i32 to index
    %c0_47 = arith.constant 0 : index
    %82 = vector.load %arg14[%81, %c0_47] : memref<64x128xf32, #tpu.memory_space<vmem>>, vector<8x128xf32>
    tpu.vector_store %arg14[%81, %c0_47], %74 {strides = array<i32>} : memref<64x128xf32, #tpu.memory_space<vmem>>, vector<8x128xf32>,
    %c2_i32 = arith.constant 2 : i32
    %c8_i32_48 = arith.constant 8 : i32
    %83 = arith.muli %c2_i32, %c8_i32_48 : i32
    %84 = tpu.assume_multiple %83, 8 : i32
    %c0_49 = arith.constant 0 : index
    %c0_50 = arith.constant 0 : index
    %c0_51 = arith.constant 0 : index
    %85 = vector.load %arg15[%c0_49, %c0_50, %c0_51] : memref<2x8x128xf32, #tpu.memory_space<vmem>>, vector<1x8x128xf32>
    %86 = vector.shape_cast %85 : vector<1x8x128xf32> to vector<8x128xf32>
    %c0_52 = arith.constant 0 : index
    %c0_53 = arith.constant 0 : index
    %c0_54 = arith.constant 0 : index
    %87 = vector.load %arg16[%c0_52, %c0_53, %c0_54] : memref<2x8x128xf32, #tpu.memory_space<vmem>>, vector<1x8x128xf32>
    %88 = vector.shape_cast %87 : vector<1x8x128xf32> to vector<8x128xf32>
    %89 = arith.index_cast %84 : i32 to index
    %c0_55 = arith.constant 0 : index
    %90 = vector.load %arg13[%89, %c0_55] : memref<64x512xf32, #tpu.memory_space<vmem>>, vector<8x512xf32>
    %cst_56 = arith.constant dense<0.000000e+00> : vector<8x512xf32>
    %91 = tpu.matmul %86, %10, %cst_56 {dimension_numbers = #tpu.dot_dimension_numbers<[1], [0], [0], [1], [0, 0, 1, 1], [], []>} : vector<8x128xf32>, vector<128x512xf32>, vector<8x512xf32> -> vector<8x512xf32>
    %92 = arith.addf %90, %91 : vector<8x512xf32>
    %93 = vector.extract_strided_slice %92 {offsets = [0, 0], sizes = [8, 384], strides = [1, 1]} : vector<8x512xf32> to vector<8x384xf32>
    %cst_57 = arith.constant 5.000000e-01 : f32
    %94 = vector.broadcast %cst_57 : f32 to vector<8x384xf32>
    %95 = arith.mulf %94, %93 : vector<8x384xf32>
    %96 = math.tanh %95 : vector<8x384xf32>
    %cst_58 = arith.constant 5.000000e-01 : f32
    %97 = vector.broadcast %cst_58 : f32 to vector<8x384xf32>
    %98 = arith.mulf %97, %96 : vector<8x384xf32>
    %cst_59 = arith.constant 5.000000e-01 : f32
    %99 = vector.broadcast %cst_59 : f32 to vector<8x384xf32>
    %100 = arith.addf %98, %99 : vector<8x384xf32>
    %101 = vector.extract_strided_slice %100 {offsets = [0, 0], sizes = [8, 128], strides = [1, 1]} : vector<8x384xf32> to vector<8x128xf32>
    %102 = vector.extract_strided_slice %100 {offsets = [0, 128], sizes = [8, 128], strides = [1, 1]} : vector<8x384xf32> to vector<8x128xf32>
    %103 = vector.extract_strided_slice %100 {offsets = [0, 256], sizes = [8, 128], strides = [1, 1]} : vector<8x384xf32> to vector<8x128xf32>
    %104 = vector.extract_strided_slice %92 {offsets = [0, 384], sizes = [8, 128], strides = [1, 1]} : vector<8x512xf32> to vector<8x128xf32>
    %105 = math.tanh %104 : vector<8x128xf32>
    %106 = arith.mulf %102, %88 : vector<8x128xf32>
    %107 = arith.mulf %101, %105 : vector<8x128xf32>
    %108 = arith.addf %106, %107 : vector<8x128xf32>
    %109 = math.tanh %108 : vector<8x128xf32>
    %110 = arith.mulf %103, %109 : vector<8x128xf32>
    %c0_60 = arith.constant 0 : index
    %c0_61 = arith.constant 0 : index
    %c0_62 = arith.constant 0 : index
    %111 = vector.load %arg15[%c0_60, %c0_61, %c0_62] : memref<2x8x128xf32, #tpu.memory_space<vmem>>, vector<1x8x128xf32>
    %112 = vector.shape_cast %111 : vector<1x8x128xf32> to vector<8x128xf32>
    %113 = vector.shape_cast %110 : vector<8x128xf32> to vector<1x8x128xf32>
    tpu.vector_store %arg15[%c0_60, %c0_61, %c0_62], %113 {strides = array<i32>} : memref<2x8x128xf32, #tpu.memory_space<vmem>>, vector<1x8x128xf32>,
    %c0_63 = arith.constant 0 : index
    %c0_64 = arith.constant 0 : index
    %c0_65 = arith.constant 0 : index
    %114 = vector.load %arg16[%c0_63, %c0_64, %c0_65] : memref<2x8x128xf32, #tpu.memory_space<vmem>>, vector<1x8x128xf32>
    %115 = vector.shape_cast %114 : vector<1x8x128xf32> to vector<8x128xf32>
    %116 = vector.shape_cast %108 : vector<8x128xf32> to vector<1x8x128xf32>
    tpu.vector_store %arg16[%c0_63, %c0_64, %c0_65], %116 {strides = array<i32>} : memref<2x8x128xf32, #tpu.memory_space<vmem>>, vector<1x8x128xf32>,
    %117 = arith.index_cast %84 : i32 to index
    %c0_66 = arith.constant 0 : index
    %118 = vector.load %arg14[%117, %c0_66] : memref<64x128xf32, #tpu.memory_space<vmem>>, vector<8x128xf32>
    tpu.vector_store %arg14[%117, %c0_66], %110 {strides = array<i32>} : memref<64x128xf32, #tpu.memory_space<vmem>>, vector<8x128xf32>,
    %c3_i32 = arith.constant 3 : i32
    %c8_i32_67 = arith.constant 8 : i32
    %119 = arith.muli %c3_i32, %c8_i32_67 : i32
    %120 = tpu.assume_multiple %119, 8 : i32
    %c0_68 = arith.constant 0 : index
    %c0_69 = arith.constant 0 : index
    %c0_70 = arith.constant 0 : index
    %121 = vector.load %arg15[%c0_68, %c0_69, %c0_70] : memref<2x8x128xf32, #tpu.memory_space<vmem>>, vector<1x8x128xf32>
    %122 = vector.shape_cast %121 : vector<1x8x128xf32> to vector<8x128xf32>
    %c0_71 = arith.constant 0 : index
    %c0_72 = arith.constant 0 : index
    %c0_73 = arith.constant 0 : index
    %123 = vector.load %arg16[%c0_71, %c0_72, %c0_73] : memref<2x8x128xf32, #tpu.memory_space<vmem>>, vector<1x8x128xf32>
    %124 = vector.shape_cast %123 : vector<1x8x128xf32> to vector<8x128xf32>
    %125 = arith.index_cast %120 : i32 to index
    %c0_74 = arith.constant 0 : index
    %126 = vector.load %arg13[%125, %c0_74] : memref<64x512xf32, #tpu.memory_space<vmem>>, vector<8x512xf32>
    %cst_75 = arith.constant dense<0.000000e+00> : vector<8x512xf32>
    %127 = tpu.matmul %122, %10, %cst_75 {dimension_numbers = #tpu.dot_dimension_numbers<[1], [0], [0], [1], [0, 0, 1, 1], [], []>} : vector<8x128xf32>, vector<128x512xf32>, vector<8x512xf32> -> vector<8x512xf32>
    %128 = arith.addf %126, %127 : vector<8x512xf32>
    %129 = vector.extract_strided_slice %128 {offsets = [0, 0], sizes = [8, 384], strides = [1, 1]} : vector<8x512xf32> to vector<8x384xf32>
    %cst_76 = arith.constant 5.000000e-01 : f32
    %130 = vector.broadcast %cst_76 : f32 to vector<8x384xf32>
    %131 = arith.mulf %130, %129 : vector<8x384xf32>
    %132 = math.tanh %131 : vector<8x384xf32>
    %cst_77 = arith.constant 5.000000e-01 : f32
    %133 = vector.broadcast %cst_77 : f32 to vector<8x384xf32>
    %134 = arith.mulf %133, %132 : vector<8x384xf32>
    %cst_78 = arith.constant 5.000000e-01 : f32
    %135 = vector.broadcast %cst_78 : f32 to vector<8x384xf32>
    %136 = arith.addf %134, %135 : vector<8x384xf32>
    %137 = vector.extract_strided_slice %136 {offsets = [0, 0], sizes = [8, 128], strides = [1, 1]} : vector<8x384xf32> to vector<8x128xf32>
    %138 = vector.extract_strided_slice %136 {offsets = [0, 128], sizes = [8, 128], strides = [1, 1]} : vector<8x384xf32> to vector<8x128xf32>
    %139 = vector.extract_strided_slice %136 {offsets = [0, 256], sizes = [8, 128], strides = [1, 1]} : vector<8x384xf32> to vector<8x128xf32>
    %140 = vector.extract_strided_slice %128 {offsets = [0, 384], sizes = [8, 128], strides = [1, 1]} : vector<8x512xf32> to vector<8x128xf32>
    %141 = math.tanh %140 : vector<8x128xf32>
    %142 = arith.mulf %138, %124 : vector<8x128xf32>
    %143 = arith.mulf %137, %141 : vector<8x128xf32>
    %144 = arith.addf %142, %143 : vector<8x128xf32>
    %145 = math.tanh %144 : vector<8x128xf32>
    %146 = arith.mulf %139, %145 : vector<8x128xf32>
    %c0_79 = arith.constant 0 : index
    %c0_80 = arith.constant 0 : index
    %c0_81 = arith.constant 0 : index
    %147 = vector.load %arg15[%c0_79, %c0_80, %c0_81] : memref<2x8x128xf32, #tpu.memory_space<vmem>>, vector<1x8x128xf32>
    %148 = vector.shape_cast %147 : vector<1x8x128xf32> to vector<8x128xf32>
    %149 = vector.shape_cast %146 : vector<8x128xf32> to vector<1x8x128xf32>
    tpu.vector_store %arg15[%c0_79, %c0_80, %c0_81], %149 {strides = array<i32>} : memref<2x8x128xf32, #tpu.memory_space<vmem>>, vector<1x8x128xf32>,
    %c0_82 = arith.constant 0 : index
    %c0_83 = arith.constant 0 : index
    %c0_84 = arith.constant 0 : index
    %150 = vector.load %arg16[%c0_82, %c0_83, %c0_84] : memref<2x8x128xf32, #tpu.memory_space<vmem>>, vector<1x8x128xf32>
    %151 = vector.shape_cast %150 : vector<1x8x128xf32> to vector<8x128xf32>
    %152 = vector.shape_cast %144 : vector<8x128xf32> to vector<1x8x128xf32>
    tpu.vector_store %arg16[%c0_82, %c0_83, %c0_84], %152 {strides = array<i32>} : memref<2x8x128xf32, #tpu.memory_space<vmem>>, vector<1x8x128xf32>,
    %153 = arith.index_cast %120 : i32 to index
    %c0_85 = arith.constant 0 : index
    %154 = vector.load %arg14[%153, %c0_85] : memref<64x128xf32, #tpu.memory_space<vmem>>, vector<8x128xf32>
    tpu.vector_store %arg14[%153, %c0_85], %146 {strides = array<i32>} : memref<64x128xf32, #tpu.memory_space<vmem>>, vector<8x128xf32>,
    %c4_i32 = arith.constant 4 : i32
    %c8_i32_86 = arith.constant 8 : i32
    %155 = arith.muli %c4_i32, %c8_i32_86 : i32
    %156 = tpu.assume_multiple %155, 8 : i32
    %c0_87 = arith.constant 0 : index
    %c0_88 = arith.constant 0 : index
    %c0_89 = arith.constant 0 : index
    %157 = vector.load %arg15[%c0_87, %c0_88, %c0_89] : memref<2x8x128xf32, #tpu.memory_space<vmem>>, vector<1x8x128xf32>
    %158 = vector.shape_cast %157 : vector<1x8x128xf32> to vector<8x128xf32>
    %c0_90 = arith.constant 0 : index
    %c0_91 = arith.constant 0 : index
    %c0_92 = arith.constant 0 : index
    %159 = vector.load %arg16[%c0_90, %c0_91, %c0_92] : memref<2x8x128xf32, #tpu.memory_space<vmem>>, vector<1x8x128xf32>
    %160 = vector.shape_cast %159 : vector<1x8x128xf32> to vector<8x128xf32>
    %161 = arith.index_cast %156 : i32 to index
    %c0_93 = arith.constant 0 : index
    %162 = vector.load %arg13[%161, %c0_93] : memref<64x512xf32, #tpu.memory_space<vmem>>, vector<8x512xf32>
    %cst_94 = arith.constant dense<0.000000e+00> : vector<8x512xf32>
    %163 = tpu.matmul %158, %10, %cst_94 {dimension_numbers = #tpu.dot_dimension_numbers<[1], [0], [0], [1], [0, 0, 1, 1], [], []>} : vector<8x128xf32>, vector<128x512xf32>, vector<8x512xf32> -> vector<8x512xf32>
    %164 = arith.addf %162, %163 : vector<8x512xf32>
    %165 = vector.extract_strided_slice %164 {offsets = [0, 0], sizes = [8, 384], strides = [1, 1]} : vector<8x512xf32> to vector<8x384xf32>
    %cst_95 = arith.constant 5.000000e-01 : f32
    %166 = vector.broadcast %cst_95 : f32 to vector<8x384xf32>
    %167 = arith.mulf %166, %165 : vector<8x384xf32>
    %168 = math.tanh %167 : vector<8x384xf32>
    %cst_96 = arith.constant 5.000000e-01 : f32
    %169 = vector.broadcast %cst_96 : f32 to vector<8x384xf32>
    %170 = arith.mulf %169, %168 : vector<8x384xf32>
    %cst_97 = arith.constant 5.000000e-01 : f32
    %171 = vector.broadcast %cst_97 : f32 to vector<8x384xf32>
    %172 = arith.addf %170, %171 : vector<8x384xf32>
    %173 = vector.extract_strided_slice %172 {offsets = [0, 0], sizes = [8, 128], strides = [1, 1]} : vector<8x384xf32> to vector<8x128xf32>
    %174 = vector.extract_strided_slice %172 {offsets = [0, 128], sizes = [8, 128], strides = [1, 1]} : vector<8x384xf32> to vector<8x128xf32>
    %175 = vector.extract_strided_slice %172 {offsets = [0, 256], sizes = [8, 128], strides = [1, 1]} : vector<8x384xf32> to vector<8x128xf32>
    %176 = vector.extract_strided_slice %164 {offsets = [0, 384], sizes = [8, 128], strides = [1, 1]} : vector<8x512xf32> to vector<8x128xf32>
    %177 = math.tanh %176 : vector<8x128xf32>
    %178 = arith.mulf %174, %160 : vector<8x128xf32>
    %179 = arith.mulf %173, %177 : vector<8x128xf32>
    %180 = arith.addf %178, %179 : vector<8x128xf32>
    %181 = math.tanh %180 : vector<8x128xf32>
    %182 = arith.mulf %175, %181 : vector<8x128xf32>
    %c0_98 = arith.constant 0 : index
    %c0_99 = arith.constant 0 : index
    %c0_100 = arith.constant 0 : index
    %183 = vector.load %arg15[%c0_98, %c0_99, %c0_100] : memref<2x8x128xf32, #tpu.memory_space<vmem>>, vector<1x8x128xf32>
    %184 = vector.shape_cast %183 : vector<1x8x128xf32> to vector<8x128xf32>
    %185 = vector.shape_cast %182 : vector<8x128xf32> to vector<1x8x128xf32>
    tpu.vector_store %arg15[%c0_98, %c0_99, %c0_100], %185 {strides = array<i32>} : memref<2x8x128xf32, #tpu.memory_space<vmem>>, vector<1x8x128xf32>,
    %c0_101 = arith.constant 0 : index
    %c0_102 = arith.constant 0 : index
    %c0_103 = arith.constant 0 : index
    %186 = vector.load %arg16[%c0_101, %c0_102, %c0_103] : memref<2x8x128xf32, #tpu.memory_space<vmem>>, vector<1x8x128xf32>
    %187 = vector.shape_cast %186 : vector<1x8x128xf32> to vector<8x128xf32>
    %188 = vector.shape_cast %180 : vector<8x128xf32> to vector<1x8x128xf32>
    tpu.vector_store %arg16[%c0_101, %c0_102, %c0_103], %188 {strides = array<i32>} : memref<2x8x128xf32, #tpu.memory_space<vmem>>, vector<1x8x128xf32>,
    %189 = arith.index_cast %156 : i32 to index
    %c0_104 = arith.constant 0 : index
    %190 = vector.load %arg14[%189, %c0_104] : memref<64x128xf32, #tpu.memory_space<vmem>>, vector<8x128xf32>
    tpu.vector_store %arg14[%189, %c0_104], %182 {strides = array<i32>} : memref<64x128xf32, #tpu.memory_space<vmem>>, vector<8x128xf32>,
    %c5_i32 = arith.constant 5 : i32
    %c8_i32_105 = arith.constant 8 : i32
    %191 = arith.muli %c5_i32, %c8_i32_105 : i32
    %192 = tpu.assume_multiple %191, 8 : i32
    %c0_106 = arith.constant 0 : index
    %c0_107 = arith.constant 0 : index
    %c0_108 = arith.constant 0 : index
    %193 = vector.load %arg15[%c0_106, %c0_107, %c0_108] : memref<2x8x128xf32, #tpu.memory_space<vmem>>, vector<1x8x128xf32>
    %194 = vector.shape_cast %193 : vector<1x8x128xf32> to vector<8x128xf32>
    %c0_109 = arith.constant 0 : index
    %c0_110 = arith.constant 0 : index
    %c0_111 = arith.constant 0 : index
    %195 = vector.load %arg16[%c0_109, %c0_110, %c0_111] : memref<2x8x128xf32, #tpu.memory_space<vmem>>, vector<1x8x128xf32>
    %196 = vector.shape_cast %195 : vector<1x8x128xf32> to vector<8x128xf32>
    %197 = arith.index_cast %192 : i32 to index
    %c0_112 = arith.constant 0 : index
    %198 = vector.load %arg13[%197, %c0_112] : memref<64x512xf32, #tpu.memory_space<vmem>>, vector<8x512xf32>
    %cst_113 = arith.constant dense<0.000000e+00> : vector<8x512xf32>
    %199 = tpu.matmul %194, %10, %cst_113 {dimension_numbers = #tpu.dot_dimension_numbers<[1], [0], [0], [1], [0, 0, 1, 1], [], []>} : vector<8x128xf32>, vector<128x512xf32>, vector<8x512xf32> -> vector<8x512xf32>
    %200 = arith.addf %198, %199 : vector<8x512xf32>
    %201 = vector.extract_strided_slice %200 {offsets = [0, 0], sizes = [8, 384], strides = [1, 1]} : vector<8x512xf32> to vector<8x384xf32>
    %cst_114 = arith.constant 5.000000e-01 : f32
    %202 = vector.broadcast %cst_114 : f32 to vector<8x384xf32>
    %203 = arith.mulf %202, %201 : vector<8x384xf32>
    %204 = math.tanh %203 : vector<8x384xf32>
    %cst_115 = arith.constant 5.000000e-01 : f32
    %205 = vector.broadcast %cst_115 : f32 to vector<8x384xf32>
    %206 = arith.mulf %205, %204 : vector<8x384xf32>
    %cst_116 = arith.constant 5.000000e-01 : f32
    %207 = vector.broadcast %cst_116 : f32 to vector<8x384xf32>
    %208 = arith.addf %206, %207 : vector<8x384xf32>
    %209 = vector.extract_strided_slice %208 {offsets = [0, 0], sizes = [8, 128], strides = [1, 1]} : vector<8x384xf32> to vector<8x128xf32>
    %210 = vector.extract_strided_slice %208 {offsets = [0, 128], sizes = [8, 128], strides = [1, 1]} : vector<8x384xf32> to vector<8x128xf32>
    %211 = vector.extract_strided_slice %208 {offsets = [0, 256], sizes = [8, 128], strides = [1, 1]} : vector<8x384xf32> to vector<8x128xf32>
    %212 = vector.extract_strided_slice %200 {offsets = [0, 384], sizes = [8, 128], strides = [1, 1]} : vector<8x512xf32> to vector<8x128xf32>
    %213 = math.tanh %212 : vector<8x128xf32>
    %214 = arith.mulf %210, %196 : vector<8x128xf32>
    %215 = arith.mulf %209, %213 : vector<8x128xf32>
    %216 = arith.addf %214, %215 : vector<8x128xf32>
    %217 = math.tanh %216 : vector<8x128xf32>
    %218 = arith.mulf %211, %217 : vector<8x128xf32>
    %c0_117 = arith.constant 0 : index
    %c0_118 = arith.constant 0 : index
    %c0_119 = arith.constant 0 : index
    %219 = vector.load %arg15[%c0_117, %c0_118, %c0_119] : memref<2x8x128xf32, #tpu.memory_space<vmem>>, vector<1x8x128xf32>
    %220 = vector.shape_cast %219 : vector<1x8x128xf32> to vector<8x128xf32>
    %221 = vector.shape_cast %218 : vector<8x128xf32> to vector<1x8x128xf32>
    tpu.vector_store %arg15[%c0_117, %c0_118, %c0_119], %221 {strides = array<i32>} : memref<2x8x128xf32, #tpu.memory_space<vmem>>, vector<1x8x128xf32>,
    %c0_120 = arith.constant 0 : index
    %c0_121 = arith.constant 0 : index
    %c0_122 = arith.constant 0 : index
    %222 = vector.load %arg16[%c0_120, %c0_121, %c0_122] : memref<2x8x128xf32, #tpu.memory_space<vmem>>, vector<1x8x128xf32>
    %223 = vector.shape_cast %222 : vector<1x8x128xf32> to vector<8x128xf32>
    %224 = vector.shape_cast %216 : vector<8x128xf32> to vector<1x8x128xf32>
    tpu.vector_store %arg16[%c0_120, %c0_121, %c0_122], %224 {strides = array<i32>} : memref<2x8x128xf32, #tpu.memory_space<vmem>>, vector<1x8x128xf32>,
    %225 = arith.index_cast %192 : i32 to index
    %c0_123 = arith.constant 0 : index
    %226 = vector.load %arg14[%225, %c0_123] : memref<64x128xf32, #tpu.memory_space<vmem>>, vector<8x128xf32>
    tpu.vector_store %arg14[%225, %c0_123], %218 {strides = array<i32>} : memref<64x128xf32, #tpu.memory_space<vmem>>, vector<8x128xf32>,
    %c6_i32 = arith.constant 6 : i32
    %c8_i32_124 = arith.constant 8 : i32
    %227 = arith.muli %c6_i32, %c8_i32_124 : i32
    %228 = tpu.assume_multiple %227, 8 : i32
    %c0_125 = arith.constant 0 : index
    %c0_126 = arith.constant 0 : index
    %c0_127 = arith.constant 0 : index
    %229 = vector.load %arg15[%c0_125, %c0_126, %c0_127] : memref<2x8x128xf32, #tpu.memory_space<vmem>>, vector<1x8x128xf32>
    %230 = vector.shape_cast %229 : vector<1x8x128xf32> to vector<8x128xf32>
    %c0_128 = arith.constant 0 : index
    %c0_129 = arith.constant 0 : index
    %c0_130 = arith.constant 0 : index
    %231 = vector.load %arg16[%c0_128, %c0_129, %c0_130] : memref<2x8x128xf32, #tpu.memory_space<vmem>>, vector<1x8x128xf32>
    %232 = vector.shape_cast %231 : vector<1x8x128xf32> to vector<8x128xf32>
    %233 = arith.index_cast %228 : i32 to index
    %c0_131 = arith.constant 0 : index
    %234 = vector.load %arg13[%233, %c0_131] : memref<64x512xf32, #tpu.memory_space<vmem>>, vector<8x512xf32>
    %cst_132 = arith.constant dense<0.000000e+00> : vector<8x512xf32>
    %235 = tpu.matmul %230, %10, %cst_132 {dimension_numbers = #tpu.dot_dimension_numbers<[1], [0], [0], [1], [0, 0, 1, 1], [], []>} : vector<8x128xf32>, vector<128x512xf32>, vector<8x512xf32> -> vector<8x512xf32>
    %236 = arith.addf %234, %235 : vector<8x512xf32>
    %237 = vector.extract_strided_slice %236 {offsets = [0, 0], sizes = [8, 384], strides = [1, 1]} : vector<8x512xf32> to vector<8x384xf32>
    %cst_133 = arith.constant 5.000000e-01 : f32
    %238 = vector.broadcast %cst_133 : f32 to vector<8x384xf32>
    %239 = arith.mulf %238, %237 : vector<8x384xf32>
    %240 = math.tanh %239 : vector<8x384xf32>
    %cst_134 = arith.constant 5.000000e-01 : f32
    %241 = vector.broadcast %cst_134 : f32 to vector<8x384xf32>
    %242 = arith.mulf %241, %240 : vector<8x384xf32>
    %cst_135 = arith.constant 5.000000e-01 : f32
    %243 = vector.broadcast %cst_135 : f32 to vector<8x384xf32>
    %244 = arith.addf %242, %243 : vector<8x384xf32>
    %245 = vector.extract_strided_slice %244 {offsets = [0, 0], sizes = [8, 128], strides = [1, 1]} : vector<8x384xf32> to vector<8x128xf32>
    %246 = vector.extract_strided_slice %244 {offsets = [0, 128], sizes = [8, 128], strides = [1, 1]} : vector<8x384xf32> to vector<8x128xf32>
    %247 = vector.extract_strided_slice %244 {offsets = [0, 256], sizes = [8, 128], strides = [1, 1]} : vector<8x384xf32> to vector<8x128xf32>
    %248 = vector.extract_strided_slice %236 {offsets = [0, 384], sizes = [8, 128], strides = [1, 1]} : vector<8x512xf32> to vector<8x128xf32>
    %249 = math.tanh %248 : vector<8x128xf32>
    %250 = arith.mulf %246, %232 : vector<8x128xf32>
    %251 = arith.mulf %245, %249 : vector<8x128xf32>
    %252 = arith.addf %250, %251 : vector<8x128xf32>
    %253 = math.tanh %252 : vector<8x128xf32>
    %254 = arith.mulf %247, %253 : vector<8x128xf32>
    %c0_136 = arith.constant 0 : index
    %c0_137 = arith.constant 0 : index
    %c0_138 = arith.constant 0 : index
    %255 = vector.load %arg15[%c0_136, %c0_137, %c0_138] : memref<2x8x128xf32, #tpu.memory_space<vmem>>, vector<1x8x128xf32>
    %256 = vector.shape_cast %255 : vector<1x8x128xf32> to vector<8x128xf32>
    %257 = vector.shape_cast %254 : vector<8x128xf32> to vector<1x8x128xf32>
    tpu.vector_store %arg15[%c0_136, %c0_137, %c0_138], %257 {strides = array<i32>} : memref<2x8x128xf32, #tpu.memory_space<vmem>>, vector<1x8x128xf32>,
    %c0_139 = arith.constant 0 : index
    %c0_140 = arith.constant 0 : index
    %c0_141 = arith.constant 0 : index
    %258 = vector.load %arg16[%c0_139, %c0_140, %c0_141] : memref<2x8x128xf32, #tpu.memory_space<vmem>>, vector<1x8x128xf32>
    %259 = vector.shape_cast %258 : vector<1x8x128xf32> to vector<8x128xf32>
    %260 = vector.shape_cast %252 : vector<8x128xf32> to vector<1x8x128xf32>
    tpu.vector_store %arg16[%c0_139, %c0_140, %c0_141], %260 {strides = array<i32>} : memref<2x8x128xf32, #tpu.memory_space<vmem>>, vector<1x8x128xf32>,
    %261 = arith.index_cast %228 : i32 to index
    %c0_142 = arith.constant 0 : index
    %262 = vector.load %arg14[%261, %c0_142] : memref<64x128xf32, #tpu.memory_space<vmem>>, vector<8x128xf32>
    tpu.vector_store %arg14[%261, %c0_142], %254 {strides = array<i32>} : memref<64x128xf32, #tpu.memory_space<vmem>>, vector<8x128xf32>,
    %c7_i32 = arith.constant 7 : i32
    %c8_i32_143 = arith.constant 8 : i32
    %263 = arith.muli %c7_i32, %c8_i32_143 : i32
    %264 = tpu.assume_multiple %263, 8 : i32
    %c0_144 = arith.constant 0 : index
    %c0_145 = arith.constant 0 : index
    %c0_146 = arith.constant 0 : index
    %265 = vector.load %arg15[%c0_144, %c0_145, %c0_146] : memref<2x8x128xf32, #tpu.memory_space<vmem>>, vector<1x8x128xf32>
    %266 = vector.shape_cast %265 : vector<1x8x128xf32> to vector<8x128xf32>
    %c0_147 = arith.constant 0 : index
    %c0_148 = arith.constant 0 : index
    %c0_149 = arith.constant 0 : index
    %267 = vector.load %arg16[%c0_147, %c0_148, %c0_149] : memref<2x8x128xf32, #tpu.memory_space<vmem>>, vector<1x8x128xf32>
    %268 = vector.shape_cast %267 : vector<1x8x128xf32> to vector<8x128xf32>
    %269 = arith.index_cast %264 : i32 to index
    %c0_150 = arith.constant 0 : index
    %270 = vector.load %arg13[%269, %c0_150] : memref<64x512xf32, #tpu.memory_space<vmem>>, vector<8x512xf32>
    %cst_151 = arith.constant dense<0.000000e+00> : vector<8x512xf32>
    %271 = tpu.matmul %266, %10, %cst_151 {dimension_numbers = #tpu.dot_dimension_numbers<[1], [0], [0], [1], [0, 0, 1, 1], [], []>} : vector<8x128xf32>, vector<128x512xf32>, vector<8x512xf32> -> vector<8x512xf32>
    %272 = arith.addf %270, %271 : vector<8x512xf32>
    %273 = vector.extract_strided_slice %272 {offsets = [0, 0], sizes = [8, 384], strides = [1, 1]} : vector<8x512xf32> to vector<8x384xf32>
    %cst_152 = arith.constant 5.000000e-01 : f32
    %274 = vector.broadcast %cst_152 : f32 to vector<8x384xf32>
    %275 = arith.mulf %274, %273 : vector<8x384xf32>
    %276 = math.tanh %275 : vector<8x384xf32>
    %cst_153 = arith.constant 5.000000e-01 : f32
    %277 = vector.broadcast %cst_153 : f32 to vector<8x384xf32>
    %278 = arith.mulf %277, %276 : vector<8x384xf32>
    %cst_154 = arith.constant 5.000000e-01 : f32
    %279 = vector.broadcast %cst_154 : f32 to vector<8x384xf32>
    %280 = arith.addf %278, %279 : vector<8x384xf32>
    %281 = vector.extract_strided_slice %280 {offsets = [0, 0], sizes = [8, 128], strides = [1, 1]} : vector<8x384xf32> to vector<8x128xf32>
    %282 = vector.extract_strided_slice %280 {offsets = [0, 128], sizes = [8, 128], strides = [1, 1]} : vector<8x384xf32> to vector<8x128xf32>
    %283 = vector.extract_strided_slice %280 {offsets = [0, 256], sizes = [8, 128], strides = [1, 1]} : vector<8x384xf32> to vector<8x128xf32>
    %284 = vector.extract_strided_slice %272 {offsets = [0, 384], sizes = [8, 128], strides = [1, 1]} : vector<8x512xf32> to vector<8x128xf32>
    %285 = math.tanh %284 : vector<8x128xf32>
    %286 = arith.mulf %282, %268 : vector<8x128xf32>
    %287 = arith.mulf %281, %285 : vector<8x128xf32>
    %288 = arith.addf %286, %287 : vector<8x128xf32>
    %289 = math.tanh %288 : vector<8x128xf32>
    %290 = arith.mulf %283, %289 : vector<8x128xf32>
    %c0_155 = arith.constant 0 : index
    %c0_156 = arith.constant 0 : index
    %c0_157 = arith.constant 0 : index
    %291 = vector.load %arg15[%c0_155, %c0_156, %c0_157] : memref<2x8x128xf32, #tpu.memory_space<vmem>>, vector<1x8x128xf32>
    %292 = vector.shape_cast %291 : vector<1x8x128xf32> to vector<8x128xf32>
    %293 = vector.shape_cast %290 : vector<8x128xf32> to vector<1x8x128xf32>
    tpu.vector_store %arg15[%c0_155, %c0_156, %c0_157], %293 {strides = array<i32>} : memref<2x8x128xf32, #tpu.memory_space<vmem>>, vector<1x8x128xf32>,
    %c0_158 = arith.constant 0 : index
    %c0_159 = arith.constant 0 : index
    %c0_160 = arith.constant 0 : index
    %294 = vector.load %arg16[%c0_158, %c0_159, %c0_160] : memref<2x8x128xf32, #tpu.memory_space<vmem>>, vector<1x8x128xf32>
    %295 = vector.shape_cast %294 : vector<1x8x128xf32> to vector<8x128xf32>
    %296 = vector.shape_cast %288 : vector<8x128xf32> to vector<1x8x128xf32>
    tpu.vector_store %arg16[%c0_158, %c0_159, %c0_160], %296 {strides = array<i32>} : memref<2x8x128xf32, #tpu.memory_space<vmem>>, vector<1x8x128xf32>,
    %297 = arith.index_cast %264 : i32 to index
    %c0_161 = arith.constant 0 : index
    %298 = vector.load %arg14[%297, %c0_161] : memref<64x128xf32, #tpu.memory_space<vmem>>, vector<8x128xf32>
    tpu.vector_store %arg14[%297, %c0_161], %290 {strides = array<i32>} : memref<64x128xf32, #tpu.memory_space<vmem>>, vector<8x128xf32>,
    %c8_i32_162 = arith.constant 8 : i32
    %c0_163 = arith.constant 0 : index
    %c0_164 = arith.constant 0 : index
    %299 = vector.load %arg14[%c0_163, %c0_164] : memref<64x128xf32, #tpu.memory_space<vmem>>, vector<64x128xf32>
    %c0_165 = arith.constant 0 : index
    %c0_166 = arith.constant 0 : index
    %300 = vector.load %arg6[%c0_165, %c0_166] : memref<128x512xf32, #tpu.memory_space<vmem>>, vector<128x512xf32>
    %cst_167 = arith.constant dense<0.000000e+00> : vector<64x512xf32>
    %301 = tpu.matmul %299, %300, %cst_167 {dimension_numbers = #tpu.dot_dimension_numbers<[1], [0], [0], [1], [0, 0, 1, 1], [], []>} : vector<64x128xf32>, vector<128x512xf32>, vector<64x512xf32> -> vector<64x512xf32>
    %c0_168 = arith.constant 0 : index
    %c0_169 = arith.constant 0 : index
    %302 = vector.load %arg8[%c0_168, %c0_169] : memref<1x512xf32, #tpu.memory_space<vmem>>, vector<1x512xf32>
    %303 = vector.broadcast %302 : vector<1x512xf32> to vector<64x512xf32>
    %304 = arith.addf %301, %303 : vector<64x512xf32>
    %c0_170 = arith.constant 0 : index
    %c0_171 = arith.constant 0 : index
    %305 = vector.load %arg13[%c0_170, %c0_171] : memref<64x512xf32, #tpu.memory_space<vmem>>, vector<64x512xf32>
    tpu.vector_store %arg13[%c0_170, %c0_171], %304 {strides = array<i32>} : memref<64x512xf32, #tpu.memory_space<vmem>>, vector<64x512xf32>,
    %c0_172 = arith.constant 0 : index
    %c0_173 = arith.constant 0 : index
    %306 = vector.load %arg7[%c0_172, %c0_173] : memref<128x512xf32, #tpu.memory_space<vmem>>, vector<128x512xf32>
    %c0_i32_174 = arith.constant 0 : i32
    %c8_i32_175 = arith.constant 8 : i32
    %307 = arith.muli %c0_i32_174, %c8_i32_175 : i32
    %308 = tpu.assume_multiple %307, 8 : i32
    %c1 = arith.constant 1 : index
    %c0_176 = arith.constant 0 : index
    %c0_177 = arith.constant 0 : index
    %309 = vector.load %arg15[%c1, %c0_176, %c0_177] : memref<2x8x128xf32, #tpu.memory_space<vmem>>, vector<1x8x128xf32>
    %310 = vector.shape_cast %309 : vector<1x8x128xf32> to vector<8x128xf32>
    %c1_178 = arith.constant 1 : index
    %c0_179 = arith.constant 0 : index
    %c0_180 = arith.constant 0 : index
    %311 = vector.load %arg16[%c1_178, %c0_179, %c0_180] : memref<2x8x128xf32, #tpu.memory_space<vmem>>, vector<1x8x128xf32>
    %312 = vector.shape_cast %311 : vector<1x8x128xf32> to vector<8x128xf32>
    %313 = arith.index_cast %308 : i32 to index
    %c0_181 = arith.constant 0 : index
    %314 = vector.load %arg13[%313, %c0_181] : memref<64x512xf32, #tpu.memory_space<vmem>>, vector<8x512xf32>
    %cst_182 = arith.constant dense<0.000000e+00> : vector<8x512xf32>
    %315 = tpu.matmul %310, %306, %cst_182 {dimension_numbers = #tpu.dot_dimension_numbers<[1], [0], [0], [1], [0, 0, 1, 1], [], []>} : vector<8x128xf32>, vector<128x512xf32>, vector<8x512xf32> -> vector<8x512xf32>
    %316 = arith.addf %314, %315 : vector<8x512xf32>
    %317 = vector.extract_strided_slice %316 {offsets = [0, 0], sizes = [8, 384], strides = [1, 1]} : vector<8x512xf32> to vector<8x384xf32>
    %cst_183 = arith.constant 5.000000e-01 : f32
    %318 = vector.broadcast %cst_183 : f32 to vector<8x384xf32>
    %319 = arith.mulf %318, %317 : vector<8x384xf32>
    %320 = math.tanh %319 : vector<8x384xf32>
    %cst_184 = arith.constant 5.000000e-01 : f32
    %321 = vector.broadcast %cst_184 : f32 to vector<8x384xf32>
    %322 = arith.mulf %321, %320 : vector<8x384xf32>
    %cst_185 = arith.constant 5.000000e-01 : f32
    %323 = vector.broadcast %cst_185 : f32 to vector<8x384xf32>
    %324 = arith.addf %322, %323 : vector<8x384xf32>
    %325 = vector.extract_strided_slice %324 {offsets = [0, 0], sizes = [8, 128], strides = [1, 1]} : vector<8x384xf32> to vector<8x128xf32>
    %326 = vector.extract_strided_slice %324 {offsets = [0, 128], sizes = [8, 128], strides = [1, 1]} : vector<8x384xf32> to vector<8x128xf32>
    %327 = vector.extract_strided_slice %324 {offsets = [0, 256], sizes = [8, 128], strides = [1, 1]} : vector<8x384xf32> to vector<8x128xf32>
    %328 = vector.extract_strided_slice %316 {offsets = [0, 384], sizes = [8, 128], strides = [1, 1]} : vector<8x512xf32> to vector<8x128xf32>
    %329 = math.tanh %328 : vector<8x128xf32>
    %330 = arith.mulf %326, %312 : vector<8x128xf32>
    %331 = arith.mulf %325, %329 : vector<8x128xf32>
    %332 = arith.addf %330, %331 : vector<8x128xf32>
    %333 = math.tanh %332 : vector<8x128xf32>
    %334 = arith.mulf %327, %333 : vector<8x128xf32>
    %c1_186 = arith.constant 1 : index
    %c0_187 = arith.constant 0 : index
    %c0_188 = arith.constant 0 : index
    %335 = vector.load %arg15[%c1_186, %c0_187, %c0_188] : memref<2x8x128xf32, #tpu.memory_space<vmem>>, vector<1x8x128xf32>
    %336 = vector.shape_cast %335 : vector<1x8x128xf32> to vector<8x128xf32>
    %337 = vector.shape_cast %334 : vector<8x128xf32> to vector<1x8x128xf32>
    tpu.vector_store %arg15[%c1_186, %c0_187, %c0_188], %337 {strides = array<i32>} : memref<2x8x128xf32, #tpu.memory_space<vmem>>, vector<1x8x128xf32>,
    %c1_189 = arith.constant 1 : index
    %c0_190 = arith.constant 0 : index
    %c0_191 = arith.constant 0 : index
    %338 = vector.load %arg16[%c1_189, %c0_190, %c0_191] : memref<2x8x128xf32, #tpu.memory_space<vmem>>, vector<1x8x128xf32>
    %339 = vector.shape_cast %338 : vector<1x8x128xf32> to vector<8x128xf32>
    %340 = vector.shape_cast %332 : vector<8x128xf32> to vector<1x8x128xf32>
    tpu.vector_store %arg16[%c1_189, %c0_190, %c0_191], %340 {strides = array<i32>} : memref<2x8x128xf32, #tpu.memory_space<vmem>>, vector<1x8x128xf32>,
    %c1_i32_192 = arith.constant 1 : i32
    %c8_i32_193 = arith.constant 8 : i32
    %341 = arith.muli %c1_i32_192, %c8_i32_193 : i32
    %342 = tpu.assume_multiple %341, 8 : i32
    %c1_194 = arith.constant 1 : index
    %c0_195 = arith.constant 0 : index
    %c0_196 = arith.constant 0 : index
    %343 = vector.load %arg15[%c1_194, %c0_195, %c0_196] : memref<2x8x128xf32, #tpu.memory_space<vmem>>, vector<1x8x128xf32>
    %344 = vector.shape_cast %343 : vector<1x8x128xf32> to vector<8x128xf32>
    %c1_197 = arith.constant 1 : index
    %c0_198 = arith.constant 0 : index
    %c0_199 = arith.constant 0 : index
    %345 = vector.load %arg16[%c1_197, %c0_198, %c0_199] : memref<2x8x128xf32, #tpu.memory_space<vmem>>, vector<1x8x128xf32>
    %346 = vector.shape_cast %345 : vector<1x8x128xf32> to vector<8x128xf32>
    %347 = arith.index_cast %342 : i32 to index
    %c0_200 = arith.constant 0 : index
    %348 = vector.load %arg13[%347, %c0_200] : memref<64x512xf32, #tpu.memory_space<vmem>>, vector<8x512xf32>
    %cst_201 = arith.constant dense<0.000000e+00> : vector<8x512xf32>
    %349 = tpu.matmul %344, %306, %cst_201 {dimension_numbers = #tpu.dot_dimension_numbers<[1], [0], [0], [1], [0, 0, 1, 1], [], []>} : vector<8x128xf32>, vector<128x512xf32>, vector<8x512xf32> -> vector<8x512xf32>
    %350 = arith.addf %348, %349 : vector<8x512xf32>
    %351 = vector.extract_strided_slice %350 {offsets = [0, 0], sizes = [8, 384], strides = [1, 1]} : vector<8x512xf32> to vector<8x384xf32>
    %cst_202 = arith.constant 5.000000e-01 : f32
    %352 = vector.broadcast %cst_202 : f32 to vector<8x384xf32>
    %353 = arith.mulf %352, %351 : vector<8x384xf32>
    %354 = math.tanh %353 : vector<8x384xf32>
    %cst_203 = arith.constant 5.000000e-01 : f32
    %355 = vector.broadcast %cst_203 : f32 to vector<8x384xf32>
    %356 = arith.mulf %355, %354 : vector<8x384xf32>
    %cst_204 = arith.constant 5.000000e-01 : f32
    %357 = vector.broadcast %cst_204 : f32 to vector<8x384xf32>
    %358 = arith.addf %356, %357 : vector<8x384xf32>
    %359 = vector.extract_strided_slice %358 {offsets = [0, 0], sizes = [8, 128], strides = [1, 1]} : vector<8x384xf32> to vector<8x128xf32>
    %360 = vector.extract_strided_slice %358 {offsets = [0, 128], sizes = [8, 128], strides = [1, 1]} : vector<8x384xf32> to vector<8x128xf32>
    %361 = vector.extract_strided_slice %358 {offsets = [0, 256], sizes = [8, 128], strides = [1, 1]} : vector<8x384xf32> to vector<8x128xf32>
    %362 = vector.extract_strided_slice %350 {offsets = [0, 384], sizes = [8, 128], strides = [1, 1]} : vector<8x512xf32> to vector<8x128xf32>
    %363 = math.tanh %362 : vector<8x128xf32>
    %364 = arith.mulf %360, %346 : vector<8x128xf32>
    %365 = arith.mulf %359, %363 : vector<8x128xf32>
    %366 = arith.addf %364, %365 : vector<8x128xf32>
    %367 = math.tanh %366 : vector<8x128xf32>
    %368 = arith.mulf %361, %367 : vector<8x128xf32>
    %c1_205 = arith.constant 1 : index
    %c0_206 = arith.constant 0 : index
    %c0_207 = arith.constant 0 : index
    %369 = vector.load %arg15[%c1_205, %c0_206, %c0_207] : memref<2x8x128xf32, #tpu.memory_space<vmem>>, vector<1x8x128xf32>
    %370 = vector.shape_cast %369 : vector<1x8x128xf32> to vector<8x128xf32>
    %371 = vector.shape_cast %368 : vector<8x128xf32> to vector<1x8x128xf32>
    tpu.vector_store %arg15[%c1_205, %c0_206, %c0_207], %371 {strides = array<i32>} : memref<2x8x128xf32, #tpu.memory_space<vmem>>, vector<1x8x128xf32>,
    %c1_208 = arith.constant 1 : index
    %c0_209 = arith.constant 0 : index
    %c0_210 = arith.constant 0 : index
    %372 = vector.load %arg16[%c1_208, %c0_209, %c0_210] : memref<2x8x128xf32, #tpu.memory_space<vmem>>, vector<1x8x128xf32>
    %373 = vector.shape_cast %372 : vector<1x8x128xf32> to vector<8x128xf32>
    %374 = vector.shape_cast %366 : vector<8x128xf32> to vector<1x8x128xf32>
    tpu.vector_store %arg16[%c1_208, %c0_209, %c0_210], %374 {strides = array<i32>} : memref<2x8x128xf32, #tpu.memory_space<vmem>>, vector<1x8x128xf32>,
    %c2_i32_211 = arith.constant 2 : i32
    %c8_i32_212 = arith.constant 8 : i32
    %375 = arith.muli %c2_i32_211, %c8_i32_212 : i32
    %376 = tpu.assume_multiple %375, 8 : i32
    %c1_213 = arith.constant 1 : index
    %c0_214 = arith.constant 0 : index
    %c0_215 = arith.constant 0 : index
    %377 = vector.load %arg15[%c1_213, %c0_214, %c0_215] : memref<2x8x128xf32, #tpu.memory_space<vmem>>, vector<1x8x128xf32>
    %378 = vector.shape_cast %377 : vector<1x8x128xf32> to vector<8x128xf32>
    %c1_216 = arith.constant 1 : index
    %c0_217 = arith.constant 0 : index
    %c0_218 = arith.constant 0 : index
    %379 = vector.load %arg16[%c1_216, %c0_217, %c0_218] : memref<2x8x128xf32, #tpu.memory_space<vmem>>, vector<1x8x128xf32>
    %380 = vector.shape_cast %379 : vector<1x8x128xf32> to vector<8x128xf32>
    %381 = arith.index_cast %376 : i32 to index
    %c0_219 = arith.constant 0 : index
    %382 = vector.load %arg13[%381, %c0_219] : memref<64x512xf32, #tpu.memory_space<vmem>>, vector<8x512xf32>
    %cst_220 = arith.constant dense<0.000000e+00> : vector<8x512xf32>
    %383 = tpu.matmul %378, %306, %cst_220 {dimension_numbers = #tpu.dot_dimension_numbers<[1], [0], [0], [1], [0, 0, 1, 1], [], []>} : vector<8x128xf32>, vector<128x512xf32>, vector<8x512xf32> -> vector<8x512xf32>
    %384 = arith.addf %382, %383 : vector<8x512xf32>
    %385 = vector.extract_strided_slice %384 {offsets = [0, 0], sizes = [8, 384], strides = [1, 1]} : vector<8x512xf32> to vector<8x384xf32>
    %cst_221 = arith.constant 5.000000e-01 : f32
    %386 = vector.broadcast %cst_221 : f32 to vector<8x384xf32>
    %387 = arith.mulf %386, %385 : vector<8x384xf32>
    %388 = math.tanh %387 : vector<8x384xf32>
    %cst_222 = arith.constant 5.000000e-01 : f32
    %389 = vector.broadcast %cst_222 : f32 to vector<8x384xf32>
    %390 = arith.mulf %389, %388 : vector<8x384xf32>
    %cst_223 = arith.constant 5.000000e-01 : f32
    %391 = vector.broadcast %cst_223 : f32 to vector<8x384xf32>
    %392 = arith.addf %390, %391 : vector<8x384xf32>
    %393 = vector.extract_strided_slice %392 {offsets = [0, 0], sizes = [8, 128], strides = [1, 1]} : vector<8x384xf32> to vector<8x128xf32>
    %394 = vector.extract_strided_slice %392 {offsets = [0, 128], sizes = [8, 128], strides = [1, 1]} : vector<8x384xf32> to vector<8x128xf32>
    %395 = vector.extract_strided_slice %392 {offsets = [0, 256], sizes = [8, 128], strides = [1, 1]} : vector<8x384xf32> to vector<8x128xf32>
    %396 = vector.extract_strided_slice %384 {offsets = [0, 384], sizes = [8, 128], strides = [1, 1]} : vector<8x512xf32> to vector<8x128xf32>
    %397 = math.tanh %396 : vector<8x128xf32>
    %398 = arith.mulf %394, %380 : vector<8x128xf32>
    %399 = arith.mulf %393, %397 : vector<8x128xf32>
    %400 = arith.addf %398, %399 : vector<8x128xf32>
    %401 = math.tanh %400 : vector<8x128xf32>
    %402 = arith.mulf %395, %401 : vector<8x128xf32>
    %c1_224 = arith.constant 1 : index
    %c0_225 = arith.constant 0 : index
    %c0_226 = arith.constant 0 : index
    %403 = vector.load %arg15[%c1_224, %c0_225, %c0_226] : memref<2x8x128xf32, #tpu.memory_space<vmem>>, vector<1x8x128xf32>
    %404 = vector.shape_cast %403 : vector<1x8x128xf32> to vector<8x128xf32>
    %405 = vector.shape_cast %402 : vector<8x128xf32> to vector<1x8x128xf32>
    tpu.vector_store %arg15[%c1_224, %c0_225, %c0_226], %405 {strides = array<i32>} : memref<2x8x128xf32, #tpu.memory_space<vmem>>, vector<1x8x128xf32>,
    %c1_227 = arith.constant 1 : index
    %c0_228 = arith.constant 0 : index
    %c0_229 = arith.constant 0 : index
    %406 = vector.load %arg16[%c1_227, %c0_228, %c0_229] : memref<2x8x128xf32, #tpu.memory_space<vmem>>, vector<1x8x128xf32>
    %407 = vector.shape_cast %406 : vector<1x8x128xf32> to vector<8x128xf32>
    %408 = vector.shape_cast %400 : vector<8x128xf32> to vector<1x8x128xf32>
    tpu.vector_store %arg16[%c1_227, %c0_228, %c0_229], %408 {strides = array<i32>} : memref<2x8x128xf32, #tpu.memory_space<vmem>>, vector<1x8x128xf32>,
    %c3_i32_230 = arith.constant 3 : i32
    %c8_i32_231 = arith.constant 8 : i32
    %409 = arith.muli %c3_i32_230, %c8_i32_231 : i32
    %410 = tpu.assume_multiple %409, 8 : i32
    %c1_232 = arith.constant 1 : index
    %c0_233 = arith.constant 0 : index
    %c0_234 = arith.constant 0 : index
    %411 = vector.load %arg15[%c1_232, %c0_233, %c0_234] : memref<2x8x128xf32, #tpu.memory_space<vmem>>, vector<1x8x128xf32>
    %412 = vector.shape_cast %411 : vector<1x8x128xf32> to vector<8x128xf32>
    %c1_235 = arith.constant 1 : index
    %c0_236 = arith.constant 0 : index
    %c0_237 = arith.constant 0 : index
    %413 = vector.load %arg16[%c1_235, %c0_236, %c0_237] : memref<2x8x128xf32, #tpu.memory_space<vmem>>, vector<1x8x128xf32>
    %414 = vector.shape_cast %413 : vector<1x8x128xf32> to vector<8x128xf32>
    %415 = arith.index_cast %410 : i32 to index
    %c0_238 = arith.constant 0 : index
    %416 = vector.load %arg13[%415, %c0_238] : memref<64x512xf32, #tpu.memory_space<vmem>>, vector<8x512xf32>
    %cst_239 = arith.constant dense<0.000000e+00> : vector<8x512xf32>
    %417 = tpu.matmul %412, %306, %cst_239 {dimension_numbers = #tpu.dot_dimension_numbers<[1], [0], [0], [1], [0, 0, 1, 1], [], []>} : vector<8x128xf32>, vector<128x512xf32>, vector<8x512xf32> -> vector<8x512xf32>
    %418 = arith.addf %416, %417 : vector<8x512xf32>
    %419 = vector.extract_strided_slice %418 {offsets = [0, 0], sizes = [8, 384], strides = [1, 1]} : vector<8x512xf32> to vector<8x384xf32>
    %cst_240 = arith.constant 5.000000e-01 : f32
    %420 = vector.broadcast %cst_240 : f32 to vector<8x384xf32>
    %421 = arith.mulf %420, %419 : vector<8x384xf32>
    %422 = math.tanh %421 : vector<8x384xf32>
    %cst_241 = arith.constant 5.000000e-01 : f32
    %423 = vector.broadcast %cst_241 : f32 to vector<8x384xf32>
    %424 = arith.mulf %423, %422 : vector<8x384xf32>
    %cst_242 = arith.constant 5.000000e-01 : f32
    %425 = vector.broadcast %cst_242 : f32 to vector<8x384xf32>
    %426 = arith.addf %424, %425 : vector<8x384xf32>
    %427 = vector.extract_strided_slice %426 {offsets = [0, 0], sizes = [8, 128], strides = [1, 1]} : vector<8x384xf32> to vector<8x128xf32>
    %428 = vector.extract_strided_slice %426 {offsets = [0, 128], sizes = [8, 128], strides = [1, 1]} : vector<8x384xf32> to vector<8x128xf32>
    %429 = vector.extract_strided_slice %426 {offsets = [0, 256], sizes = [8, 128], strides = [1, 1]} : vector<8x384xf32> to vector<8x128xf32>
    %430 = vector.extract_strided_slice %418 {offsets = [0, 384], sizes = [8, 128], strides = [1, 1]} : vector<8x512xf32> to vector<8x128xf32>
    %431 = math.tanh %430 : vector<8x128xf32>
    %432 = arith.mulf %428, %414 : vector<8x128xf32>
    %433 = arith.mulf %427, %431 : vector<8x128xf32>
    %434 = arith.addf %432, %433 : vector<8x128xf32>
    %435 = math.tanh %434 : vector<8x128xf32>
    %436 = arith.mulf %429, %435 : vector<8x128xf32>
    %c1_243 = arith.constant 1 : index
    %c0_244 = arith.constant 0 : index
    %c0_245 = arith.constant 0 : index
    %437 = vector.load %arg15[%c1_243, %c0_244, %c0_245] : memref<2x8x128xf32, #tpu.memory_space<vmem>>, vector<1x8x128xf32>
    %438 = vector.shape_cast %437 : vector<1x8x128xf32> to vector<8x128xf32>
    %439 = vector.shape_cast %436 : vector<8x128xf32> to vector<1x8x128xf32>
    tpu.vector_store %arg15[%c1_243, %c0_244, %c0_245], %439 {strides = array<i32>} : memref<2x8x128xf32, #tpu.memory_space<vmem>>, vector<1x8x128xf32>,
    %c1_246 = arith.constant 1 : index
    %c0_247 = arith.constant 0 : index
    %c0_248 = arith.constant 0 : index
    %440 = vector.load %arg16[%c1_246, %c0_247, %c0_248] : memref<2x8x128xf32, #tpu.memory_space<vmem>>, vector<1x8x128xf32>
    %441 = vector.shape_cast %440 : vector<1x8x128xf32> to vector<8x128xf32>
    %442 = vector.shape_cast %434 : vector<8x128xf32> to vector<1x8x128xf32>
    tpu.vector_store %arg16[%c1_246, %c0_247, %c0_248], %442 {strides = array<i32>} : memref<2x8x128xf32, #tpu.memory_space<vmem>>, vector<1x8x128xf32>,
    %c4_i32_249 = arith.constant 4 : i32
    %c8_i32_250 = arith.constant 8 : i32
    %443 = arith.muli %c4_i32_249, %c8_i32_250 : i32
    %444 = tpu.assume_multiple %443, 8 : i32
    %c1_251 = arith.constant 1 : index
    %c0_252 = arith.constant 0 : index
    %c0_253 = arith.constant 0 : index
    %445 = vector.load %arg15[%c1_251, %c0_252, %c0_253] : memref<2x8x128xf32, #tpu.memory_space<vmem>>, vector<1x8x128xf32>
    %446 = vector.shape_cast %445 : vector<1x8x128xf32> to vector<8x128xf32>
    %c1_254 = arith.constant 1 : index
    %c0_255 = arith.constant 0 : index
    %c0_256 = arith.constant 0 : index
    %447 = vector.load %arg16[%c1_254, %c0_255, %c0_256] : memref<2x8x128xf32, #tpu.memory_space<vmem>>, vector<1x8x128xf32>
    %448 = vector.shape_cast %447 : vector<1x8x128xf32> to vector<8x128xf32>
    %449 = arith.index_cast %444 : i32 to index
    %c0_257 = arith.constant 0 : index
    %450 = vector.load %arg13[%449, %c0_257] : memref<64x512xf32, #tpu.memory_space<vmem>>, vector<8x512xf32>
    %cst_258 = arith.constant dense<0.000000e+00> : vector<8x512xf32>
    %451 = tpu.matmul %446, %306, %cst_258 {dimension_numbers = #tpu.dot_dimension_numbers<[1], [0], [0], [1], [0, 0, 1, 1], [], []>} : vector<8x128xf32>, vector<128x512xf32>, vector<8x512xf32> -> vector<8x512xf32>
    %452 = arith.addf %450, %451 : vector<8x512xf32>
    %453 = vector.extract_strided_slice %452 {offsets = [0, 0], sizes = [8, 384], strides = [1, 1]} : vector<8x512xf32> to vector<8x384xf32>
    %cst_259 = arith.constant 5.000000e-01 : f32
    %454 = vector.broadcast %cst_259 : f32 to vector<8x384xf32>
    %455 = arith.mulf %454, %453 : vector<8x384xf32>
    %456 = math.tanh %455 : vector<8x384xf32>
    %cst_260 = arith.constant 5.000000e-01 : f32
    %457 = vector.broadcast %cst_260 : f32 to vector<8x384xf32>
    %458 = arith.mulf %457, %456 : vector<8x384xf32>
    %cst_261 = arith.constant 5.000000e-01 : f32
    %459 = vector.broadcast %cst_261 : f32 to vector<8x384xf32>
    %460 = arith.addf %458, %459 : vector<8x384xf32>
    %461 = vector.extract_strided_slice %460 {offsets = [0, 0], sizes = [8, 128], strides = [1, 1]} : vector<8x384xf32> to vector<8x128xf32>
    %462 = vector.extract_strided_slice %460 {offsets = [0, 128], sizes = [8, 128], strides = [1, 1]} : vector<8x384xf32> to vector<8x128xf32>
    %463 = vector.extract_strided_slice %460 {offsets = [0, 256], sizes = [8, 128], strides = [1, 1]} : vector<8x384xf32> to vector<8x128xf32>
    %464 = vector.extract_strided_slice %452 {offsets = [0, 384], sizes = [8, 128], strides = [1, 1]} : vector<8x512xf32> to vector<8x128xf32>
    %465 = math.tanh %464 : vector<8x128xf32>
    %466 = arith.mulf %462, %448 : vector<8x128xf32>
    %467 = arith.mulf %461, %465 : vector<8x128xf32>
    %468 = arith.addf %466, %467 : vector<8x128xf32>
    %469 = math.tanh %468 : vector<8x128xf32>
    %470 = arith.mulf %463, %469 : vector<8x128xf32>
    %c1_262 = arith.constant 1 : index
    %c0_263 = arith.constant 0 : index
    %c0_264 = arith.constant 0 : index
    %471 = vector.load %arg15[%c1_262, %c0_263, %c0_264] : memref<2x8x128xf32, #tpu.memory_space<vmem>>, vector<1x8x128xf32>
    %472 = vector.shape_cast %471 : vector<1x8x128xf32> to vector<8x128xf32>
    %473 = vector.shape_cast %470 : vector<8x128xf32> to vector<1x8x128xf32>
    tpu.vector_store %arg15[%c1_262, %c0_263, %c0_264], %473 {strides = array<i32>} : memref<2x8x128xf32, #tpu.memory_space<vmem>>, vector<1x8x128xf32>,
    %c1_265 = arith.constant 1 : index
    %c0_266 = arith.constant 0 : index
    %c0_267 = arith.constant 0 : index
    %474 = vector.load %arg16[%c1_265, %c0_266, %c0_267] : memref<2x8x128xf32, #tpu.memory_space<vmem>>, vector<1x8x128xf32>
    %475 = vector.shape_cast %474 : vector<1x8x128xf32> to vector<8x128xf32>
    %476 = vector.shape_cast %468 : vector<8x128xf32> to vector<1x8x128xf32>
    tpu.vector_store %arg16[%c1_265, %c0_266, %c0_267], %476 {strides = array<i32>} : memref<2x8x128xf32, #tpu.memory_space<vmem>>, vector<1x8x128xf32>,
    %c5_i32_268 = arith.constant 5 : i32
    %c8_i32_269 = arith.constant 8 : i32
    %477 = arith.muli %c5_i32_268, %c8_i32_269 : i32
    %478 = tpu.assume_multiple %477, 8 : i32
    %c1_270 = arith.constant 1 : index
    %c0_271 = arith.constant 0 : index
    %c0_272 = arith.constant 0 : index
    %479 = vector.load %arg15[%c1_270, %c0_271, %c0_272] : memref<2x8x128xf32, #tpu.memory_space<vmem>>, vector<1x8x128xf32>
    %480 = vector.shape_cast %479 : vector<1x8x128xf32> to vector<8x128xf32>
    %c1_273 = arith.constant 1 : index
    %c0_274 = arith.constant 0 : index
    %c0_275 = arith.constant 0 : index
    %481 = vector.load %arg16[%c1_273, %c0_274, %c0_275] : memref<2x8x128xf32, #tpu.memory_space<vmem>>, vector<1x8x128xf32>
    %482 = vector.shape_cast %481 : vector<1x8x128xf32> to vector<8x128xf32>
    %483 = arith.index_cast %478 : i32 to index
    %c0_276 = arith.constant 0 : index
    %484 = vector.load %arg13[%483, %c0_276] : memref<64x512xf32, #tpu.memory_space<vmem>>, vector<8x512xf32>
    %cst_277 = arith.constant dense<0.000000e+00> : vector<8x512xf32>
    %485 = tpu.matmul %480, %306, %cst_277 {dimension_numbers = #tpu.dot_dimension_numbers<[1], [0], [0], [1], [0, 0, 1, 1], [], []>} : vector<8x128xf32>, vector<128x512xf32>, vector<8x512xf32> -> vector<8x512xf32>
    %486 = arith.addf %484, %485 : vector<8x512xf32>
    %487 = vector.extract_strided_slice %486 {offsets = [0, 0], sizes = [8, 384], strides = [1, 1]} : vector<8x512xf32> to vector<8x384xf32>
    %cst_278 = arith.constant 5.000000e-01 : f32
    %488 = vector.broadcast %cst_278 : f32 to vector<8x384xf32>
    %489 = arith.mulf %488, %487 : vector<8x384xf32>
    %490 = math.tanh %489 : vector<8x384xf32>
    %cst_279 = arith.constant 5.000000e-01 : f32
    %491 = vector.broadcast %cst_279 : f32 to vector<8x384xf32>
    %492 = arith.mulf %491, %490 : vector<8x384xf32>
    %cst_280 = arith.constant 5.000000e-01 : f32
    %493 = vector.broadcast %cst_280 : f32 to vector<8x384xf32>
    %494 = arith.addf %492, %493 : vector<8x384xf32>
    %495 = vector.extract_strided_slice %494 {offsets = [0, 0], sizes = [8, 128], strides = [1, 1]} : vector<8x384xf32> to vector<8x128xf32>
    %496 = vector.extract_strided_slice %494 {offsets = [0, 128], sizes = [8, 128], strides = [1, 1]} : vector<8x384xf32> to vector<8x128xf32>
    %497 = vector.extract_strided_slice %494 {offsets = [0, 256], sizes = [8, 128], strides = [1, 1]} : vector<8x384xf32> to vector<8x128xf32>
    %498 = vector.extract_strided_slice %486 {offsets = [0, 384], sizes = [8, 128], strides = [1, 1]} : vector<8x512xf32> to vector<8x128xf32>
    %499 = math.tanh %498 : vector<8x128xf32>
    %500 = arith.mulf %496, %482 : vector<8x128xf32>
    %501 = arith.mulf %495, %499 : vector<8x128xf32>
    %502 = arith.addf %500, %501 : vector<8x128xf32>
    %503 = math.tanh %502 : vector<8x128xf32>
    %504 = arith.mulf %497, %503 : vector<8x128xf32>
    %c1_281 = arith.constant 1 : index
    %c0_282 = arith.constant 0 : index
    %c0_283 = arith.constant 0 : index
    %505 = vector.load %arg15[%c1_281, %c0_282, %c0_283] : memref<2x8x128xf32, #tpu.memory_space<vmem>>, vector<1x8x128xf32>
    %506 = vector.shape_cast %505 : vector<1x8x128xf32> to vector<8x128xf32>
    %507 = vector.shape_cast %504 : vector<8x128xf32> to vector<1x8x128xf32>
    tpu.vector_store %arg15[%c1_281, %c0_282, %c0_283], %507 {strides = array<i32>} : memref<2x8x128xf32, #tpu.memory_space<vmem>>, vector<1x8x128xf32>,
    %c1_284 = arith.constant 1 : index
    %c0_285 = arith.constant 0 : index
    %c0_286 = arith.constant 0 : index
    %508 = vector.load %arg16[%c1_284, %c0_285, %c0_286] : memref<2x8x128xf32, #tpu.memory_space<vmem>>, vector<1x8x128xf32>
    %509 = vector.shape_cast %508 : vector<1x8x128xf32> to vector<8x128xf32>
    %510 = vector.shape_cast %502 : vector<8x128xf32> to vector<1x8x128xf32>
    tpu.vector_store %arg16[%c1_284, %c0_285, %c0_286], %510 {strides = array<i32>} : memref<2x8x128xf32, #tpu.memory_space<vmem>>, vector<1x8x128xf32>,
    %c6_i32_287 = arith.constant 6 : i32
    %c8_i32_288 = arith.constant 8 : i32
    %511 = arith.muli %c6_i32_287, %c8_i32_288 : i32
    %512 = tpu.assume_multiple %511, 8 : i32
    %c1_289 = arith.constant 1 : index
    %c0_290 = arith.constant 0 : index
    %c0_291 = arith.constant 0 : index
    %513 = vector.load %arg15[%c1_289, %c0_290, %c0_291] : memref<2x8x128xf32, #tpu.memory_space<vmem>>, vector<1x8x128xf32>
    %514 = vector.shape_cast %513 : vector<1x8x128xf32> to vector<8x128xf32>
    %c1_292 = arith.constant 1 : index
    %c0_293 = arith.constant 0 : index
    %c0_294 = arith.constant 0 : index
    %515 = vector.load %arg16[%c1_292, %c0_293, %c0_294] : memref<2x8x128xf32, #tpu.memory_space<vmem>>, vector<1x8x128xf32>
    %516 = vector.shape_cast %515 : vector<1x8x128xf32> to vector<8x128xf32>
    %517 = arith.index_cast %512 : i32 to index
    %c0_295 = arith.constant 0 : index
    %518 = vector.load %arg13[%517, %c0_295] : memref<64x512xf32, #tpu.memory_space<vmem>>, vector<8x512xf32>
    %cst_296 = arith.constant dense<0.000000e+00> : vector<8x512xf32>
    %519 = tpu.matmul %514, %306, %cst_296 {dimension_numbers = #tpu.dot_dimension_numbers<[1], [0], [0], [1], [0, 0, 1, 1], [], []>} : vector<8x128xf32>, vector<128x512xf32>, vector<8x512xf32> -> vector<8x512xf32>
    %520 = arith.addf %518, %519 : vector<8x512xf32>
    %521 = vector.extract_strided_slice %520 {offsets = [0, 0], sizes = [8, 384], strides = [1, 1]} : vector<8x512xf32> to vector<8x384xf32>
    %cst_297 = arith.constant 5.000000e-01 : f32
    %522 = vector.broadcast %cst_297 : f32 to vector<8x384xf32>
    %523 = arith.mulf %522, %521 : vector<8x384xf32>
    %524 = math.tanh %523 : vector<8x384xf32>
    %cst_298 = arith.constant 5.000000e-01 : f32
    %525 = vector.broadcast %cst_298 : f32 to vector<8x384xf32>
    %526 = arith.mulf %525, %524 : vector<8x384xf32>
    %cst_299 = arith.constant 5.000000e-01 : f32
    %527 = vector.broadcast %cst_299 : f32 to vector<8x384xf32>
    %528 = arith.addf %526, %527 : vector<8x384xf32>
    %529 = vector.extract_strided_slice %528 {offsets = [0, 0], sizes = [8, 128], strides = [1, 1]} : vector<8x384xf32> to vector<8x128xf32>
    %530 = vector.extract_strided_slice %528 {offsets = [0, 128], sizes = [8, 128], strides = [1, 1]} : vector<8x384xf32> to vector<8x128xf32>
    %531 = vector.extract_strided_slice %528 {offsets = [0, 256], sizes = [8, 128], strides = [1, 1]} : vector<8x384xf32> to vector<8x128xf32>
    %532 = vector.extract_strided_slice %520 {offsets = [0, 384], sizes = [8, 128], strides = [1, 1]} : vector<8x512xf32> to vector<8x128xf32>
    %533 = math.tanh %532 : vector<8x128xf32>
    %534 = arith.mulf %530, %516 : vector<8x128xf32>
    %535 = arith.mulf %529, %533 : vector<8x128xf32>
    %536 = arith.addf %534, %535 : vector<8x128xf32>
    %537 = math.tanh %536 : vector<8x128xf32>
    %538 = arith.mulf %531, %537 : vector<8x128xf32>
    %c1_300 = arith.constant 1 : index
    %c0_301 = arith.constant 0 : index
    %c0_302 = arith.constant 0 : index
    %539 = vector.load %arg15[%c1_300, %c0_301, %c0_302] : memref<2x8x128xf32, #tpu.memory_space<vmem>>, vector<1x8x128xf32>
    %540 = vector.shape_cast %539 : vector<1x8x128xf32> to vector<8x128xf32>
    %541 = vector.shape_cast %538 : vector<8x128xf32> to vector<1x8x128xf32>
    tpu.vector_store %arg15[%c1_300, %c0_301, %c0_302], %541 {strides = array<i32>} : memref<2x8x128xf32, #tpu.memory_space<vmem>>, vector<1x8x128xf32>,
    %c1_303 = arith.constant 1 : index
    %c0_304 = arith.constant 0 : index
    %c0_305 = arith.constant 0 : index
    %542 = vector.load %arg16[%c1_303, %c0_304, %c0_305] : memref<2x8x128xf32, #tpu.memory_space<vmem>>, vector<1x8x128xf32>
    %543 = vector.shape_cast %542 : vector<1x8x128xf32> to vector<8x128xf32>
    %544 = vector.shape_cast %536 : vector<8x128xf32> to vector<1x8x128xf32>
    tpu.vector_store %arg16[%c1_303, %c0_304, %c0_305], %544 {strides = array<i32>} : memref<2x8x128xf32, #tpu.memory_space<vmem>>, vector<1x8x128xf32>,
    %c7_i32_306 = arith.constant 7 : i32
    %c8_i32_307 = arith.constant 8 : i32
    %545 = arith.muli %c7_i32_306, %c8_i32_307 : i32
    %546 = tpu.assume_multiple %545, 8 : i32
    %c1_308 = arith.constant 1 : index
    %c0_309 = arith.constant 0 : index
    %c0_310 = arith.constant 0 : index
    %547 = vector.load %arg15[%c1_308, %c0_309, %c0_310] : memref<2x8x128xf32, #tpu.memory_space<vmem>>, vector<1x8x128xf32>
    %548 = vector.shape_cast %547 : vector<1x8x128xf32> to vector<8x128xf32>
    %c1_311 = arith.constant 1 : index
    %c0_312 = arith.constant 0 : index
    %c0_313 = arith.constant 0 : index
    %549 = vector.load %arg16[%c1_311, %c0_312, %c0_313] : memref<2x8x128xf32, #tpu.memory_space<vmem>>, vector<1x8x128xf32>
    %550 = vector.shape_cast %549 : vector<1x8x128xf32> to vector<8x128xf32>
    %551 = arith.index_cast %546 : i32 to index
    %c0_314 = arith.constant 0 : index
    %552 = vector.load %arg13[%551, %c0_314] : memref<64x512xf32, #tpu.memory_space<vmem>>, vector<8x512xf32>
    %cst_315 = arith.constant dense<0.000000e+00> : vector<8x512xf32>
    %553 = tpu.matmul %548, %306, %cst_315 {dimension_numbers = #tpu.dot_dimension_numbers<[1], [0], [0], [1], [0, 0, 1, 1], [], []>} : vector<8x128xf32>, vector<128x512xf32>, vector<8x512xf32> -> vector<8x512xf32>
    %554 = arith.addf %552, %553 : vector<8x512xf32>
    %555 = vector.extract_strided_slice %554 {offsets = [0, 0], sizes = [8, 384], strides = [1, 1]} : vector<8x512xf32> to vector<8x384xf32>
    %cst_316 = arith.constant 5.000000e-01 : f32
    %556 = vector.broadcast %cst_316 : f32 to vector<8x384xf32>
    %557 = arith.mulf %556, %555 : vector<8x384xf32>
    %558 = math.tanh %557 : vector<8x384xf32>
    %cst_317 = arith.constant 5.000000e-01 : f32
    %559 = vector.broadcast %cst_317 : f32 to vector<8x384xf32>
    %560 = arith.mulf %559, %558 : vector<8x384xf32>
    %cst_318 = arith.constant 5.000000e-01 : f32
    %561 = vector.broadcast %cst_318 : f32 to vector<8x384xf32>
    %562 = arith.addf %560, %561 : vector<8x384xf32>
    %563 = vector.extract_strided_slice %562 {offsets = [0, 0], sizes = [8, 128], strides = [1, 1]} : vector<8x384xf32> to vector<8x128xf32>
    %564 = vector.extract_strided_slice %562 {offsets = [0, 128], sizes = [8, 128], strides = [1, 1]} : vector<8x384xf32> to vector<8x128xf32>
    %565 = vector.extract_strided_slice %562 {offsets = [0, 256], sizes = [8, 128], strides = [1, 1]} : vector<8x384xf32> to vector<8x128xf32>
    %566 = vector.extract_strided_slice %554 {offsets = [0, 384], sizes = [8, 128], strides = [1, 1]} : vector<8x512xf32> to vector<8x128xf32>
    %567 = math.tanh %566 : vector<8x128xf32>
    %568 = arith.mulf %564, %550 : vector<8x128xf32>
    %569 = arith.mulf %563, %567 : vector<8x128xf32>
    %570 = arith.addf %568, %569 : vector<8x128xf32>
    %571 = math.tanh %570 : vector<8x128xf32>
    %572 = arith.mulf %565, %571 : vector<8x128xf32>
    %c1_319 = arith.constant 1 : index
    %c0_320 = arith.constant 0 : index
    %c0_321 = arith.constant 0 : index
    %573 = vector.load %arg15[%c1_319, %c0_320, %c0_321] : memref<2x8x128xf32, #tpu.memory_space<vmem>>, vector<1x8x128xf32>
    %574 = vector.shape_cast %573 : vector<1x8x128xf32> to vector<8x128xf32>
    %575 = vector.shape_cast %572 : vector<8x128xf32> to vector<1x8x128xf32>
    tpu.vector_store %arg15[%c1_319, %c0_320, %c0_321], %575 {strides = array<i32>} : memref<2x8x128xf32, #tpu.memory_space<vmem>>, vector<1x8x128xf32>,
    %c1_322 = arith.constant 1 : index
    %c0_323 = arith.constant 0 : index
    %c0_324 = arith.constant 0 : index
    %576 = vector.load %arg16[%c1_322, %c0_323, %c0_324] : memref<2x8x128xf32, #tpu.memory_space<vmem>>, vector<1x8x128xf32>
    %577 = vector.shape_cast %576 : vector<1x8x128xf32> to vector<8x128xf32>
    %578 = vector.shape_cast %570 : vector<8x128xf32> to vector<1x8x128xf32>
    tpu.vector_store %arg16[%c1_322, %c0_323, %c0_324], %578 {strides = array<i32>} : memref<2x8x128xf32, #tpu.memory_space<vmem>>, vector<1x8x128xf32>,
    %c8_i32_325 = arith.constant 8 : i32
    %c0_i32_326 = arith.constant 0 : i32
    %579 = arith.cmpi eq, %arg0, %c0_i32_326 : i32
    %580 = arith.extui %579 : i1 to i32
    %c0_i32_327 = arith.constant 0 : i32
    %581 = arith.cmpi ne, %580, %c0_i32_327 : i32
    scf.if %581 {
      %c1_328 = arith.constant 1 : index
      %c0_329 = arith.constant 0 : index
      %c0_330 = arith.constant 0 : index
      %582 = vector.load %arg15[%c1_328, %c0_329, %c0_330] : memref<2x8x128xf32, #tpu.memory_space<vmem>>, vector<1x8x128xf32>
      %583 = vector.shape_cast %582 : vector<1x8x128xf32> to vector<8x128xf32>
      %c0_331 = arith.constant 0 : index
      %c0_332 = arith.constant 0 : index
      %584 = vector.load %arg9[%c0_331, %c0_332] : memref<128x3xf32, #tpu.memory_space<vmem>>, vector<128x3xf32>
      %cst_333 = arith.constant dense<0.000000e+00> : vector<8x3xf32>
      %585 = tpu.matmul %583, %584, %cst_333 {dimension_numbers = #tpu.dot_dimension_numbers<[1], [0], [0], [1], [0, 0, 1, 1], [], []>} : vector<8x128xf32>, vector<128x3xf32>, vector<8x3xf32> -> vector<8x3xf32>
      %c0_334 = arith.constant 0 : index
      %c0_335 = arith.constant 0 : index
      %586 = vector.load %arg2[%c0_334, %c0_335] : memref<8x6xf32, #tpu.memory_space<vmem>>, vector<8x6xf32>
      %c0_336 = arith.constant 0 : index
      %c0_337 = arith.constant 0 : index
      %587 = vector.load %arg10[%c0_336, %c0_337] : memref<6x3xf32, #tpu.memory_space<vmem>>, vector<6x3xf32>
      %cst_338 = arith.constant dense<0.000000e+00> : vector<8x3xf32>
      %588 = tpu.matmul %586, %587, %cst_338 {dimension_numbers = #tpu.dot_dimension_numbers<[1], [0], [0], [1], [0, 0, 1, 1], [], []>} : vector<8x6xf32>, vector<6x3xf32>, vector<8x3xf32> -> vector<8x3xf32>
      %589 = arith.addf %585, %588 : vector<8x3xf32>
      %c0_339 = arith.constant 0 : index
      %c0_340 = arith.constant 0 : index
      %590 = vector.load %arg11[%c0_339, %c0_340] : memref<1x3xf32, #tpu.memory_space<vmem>>, vector<1x3xf32>
      %591 = vector.broadcast %590 : vector<1x3xf32> to vector<8x3xf32>
      %592 = arith.addf %589, %591 : vector<8x3xf32>
      %c0_341 = arith.constant 0 : index
      %c0_342 = arith.constant 0 : index
      %593 = vector.load %arg12[%c0_341, %c0_342] : memref<8x3xf32, #tpu.memory_space<vmem>>, vector<8x3xf32>
      tpu.vector_store %arg12[%c0_341, %c0_342], %592 {strides = array<i32>} : memref<8x3xf32, #tpu.memory_space<vmem>>, vector<8x3xf32>,
    } else {
    }
    return
  }
  func.func @transform_0(%arg0: i32) -> (i32, i32) {
    %c0_i32 = arith.constant 0 : i32
    %c0_i32_0 = arith.constant 0 : i32
    return %arg0, %c0_i32 : i32, i32
  }
  func.func @transform_1(%arg0: i32) -> (i32, i32) {
    %c0_i32 = arith.constant 0 : i32
    %c0_i32_0 = arith.constant 0 : i32
    %c0_i32_1 = arith.constant 0 : i32
    return %c0_i32, %c0_i32_0 : i32, i32
  }
  func.func @transform_2(%arg0: i32) -> (i32, i32) {
    %c0_i32 = arith.constant 0 : i32
    %c0_i32_0 = arith.constant 0 : i32
    %c0_i32_1 = arith.constant 0 : i32
    return %c0_i32, %c0_i32_0 : i32, i32
  }
  func.func @transform_3(%arg0: i32) -> (i32, i32) {
    %c0_i32 = arith.constant 0 : i32
    %c0_i32_0 = arith.constant 0 : i32
    %c0_i32_1 = arith.constant 0 : i32
    return %c0_i32, %c0_i32_0 : i32, i32
  }
  func.func @transform_4(%arg0: i32) -> (i32, i32) {
    %c0_i32 = arith.constant 0 : i32
    %c0_i32_0 = arith.constant 0 : i32
    %c0_i32_1 = arith.constant 0 : i32
    return %c0_i32, %c0_i32_0 : i32, i32
  }
  func.func @transform_5(%arg0: i32) -> (i32, i32) {
    %c0_i32 = arith.constant 0 : i32
    %c0_i32_0 = arith.constant 0 : i32
    %c0_i32_1 = arith.constant 0 : i32
    return %c0_i32, %c0_i32_0 : i32, i32
  }
  func.func @transform_6(%arg0: i32) -> (i32, i32) {
    %c0_i32 = arith.constant 0 : i32
    %c0_i32_0 = arith.constant 0 : i32
    %c0_i32_1 = arith.constant 0 : i32
    return %c0_i32, %c0_i32_0 : i32, i32
  }
  func.func @transform_7(%arg0: i32) -> (i32, i32) {
    %c0_i32 = arith.constant 0 : i32
    %c0_i32_0 = arith.constant 0 : i32
    %c0_i32_1 = arith.constant 0 : i32
    return %c0_i32, %c0_i32_0 : i32, i32
  }
  func.func @transform_8(%arg0: i32) -> (i32, i32) {
    %c0_i32 = arith.constant 0 : i32
    %c0_i32_0 = arith.constant 0 : i32
    %c0_i32_1 = arith.constant 0 : i32
    return %c0_i32, %c0_i32_0 : i32, i32
  }
  func.func @transform_9(%arg0: i32) -> (i32, i32) {
    %c0_i32 = arith.constant 0 : i32
    %c0_i32_0 = arith.constant 0 : i32
    %c0_i32_1 = arith.constant 0 : i32
    return %c0_i32, %c0_i32_0 : i32, i32
  }
  func.func @transform_10(%arg0: i32) -> (i32, i32) {
    %c0_i32 = arith.constant 0 : i32
    %c0_i32_0 = arith.constant 0 : i32
    %c0_i32_1 = arith.constant 0 : i32
    return %c0_i32, %c0_i32_0 : i32, i32
  }
  func.func @transform_11(%arg0: i32) -> (i32, i32) {
    %c0_i32 = arith.constant 0 : i32
    %c0_i32_0 = arith.constant 0 : i32
    %c0_i32_1 = arith.constant 0 : i32
    return %c0_i32, %c0_i32_0 : i32, i32
  }
}

</mosaic_0001>

<bundles_post_ra>
// kernel: tpu_custom_call.1
= control target key start
LH: loop header
LB: loop body
LE: loop exit
PB: predicated region body
PF: predicated region fallthrough
CT: control target
= control target key end

     0   :  { %16 = vsyncpa [#allocation7], 0  ;;  %s6590_s0 = inlined_call_operand.vmem [shape: f32[64,4], index: 0, kind: input, shape index: {}]   ;;  %s6591_s1 = inlined_call_operand.vmem [shape: f32[8,6], index: 1, kind: input, shape index: {}]   ;;  %s6592_s2 = inlined_call_operand.vmem [shape: f32[4,512], index: 2, kind: input, shape index: {}]   ;;  %s6593_s3 = inlined_call_operand.hbm [shape: f32[128,512], index: 3, kind: input, shape index: {}]   ;;  %s6594_s4 = inlined_call_operand.vmem [shape: f32[1,512], index: 4, kind: input, shape index: {}]   ;;  %s6595_s5 = inlined_call_operand.hbm [shape: f32[128,512], index: 5, kind: input, shape index: {}]   ;;  %s6596_s6 = inlined_call_operand.hbm [shape: f32[128,512], index: 6, kind: input, shape index: {}]   ;;  %s6597_s7 = inlined_call_operand.vmem [shape: f32[1,512], index: 7, kind: input, shape index: {}]   ;;  %s6598_s8 = inlined_call_operand.vmem [shape: f32[128,3], index: 8, kind: input, shape index: {}]   ;;  %s6599_s9 = inlined_call_operand.vmem [shape: f32[6,3], index: 9, kind: input, shape index: {}]   ;;  %s6600_s10 = inlined_call_operand.vmem [shape: f32[1,3], index: 10, kind: input, shape index: {}]   ;;  %s6601_s11 = inlined_call_operand.vmem [shape: f32[8,3], index: 11, kind: output, shape index: {}]  }
   0x1   :  { %17 = vsyncpa [#allocation9], 0  ;;  %s5443_s17 = smov [#allocation8]   ;;  %s5444_s19 = smov [#allocation6]  }
   0x2   :  { %s43_s18 = sshll.u32 %s5443_s17, 4  ;;  %s29_s20 = sshll.u32 %s5444_s19, 4  ;;  %s44_s18 = int_to_ptr.vmem [resolvable:$true] %s43_s18  ;;  %s5511_s20 = int_to_ptr.vmem [resolvable:$true] %s29_s20 }
   0x3   :  { %s5373_s23 = scalar_lea.hbm %s6595_s5, 8192 }
   0x4   :  { %p5374_p0 = scmp.ne.s32.totalorder %s6595_s5, %s5373_s23  ;;  %p5377_p1 = scmp.lt.u32.totalorder %s5373_s23, %s6595_s5 }
   0x6   :  { %p5379_p2 = pnand %p5377_p1, %p5374_p0 }
   0x8   :  { %5382 = shalt.err (!%p5379_p2)
}
   0x9   :  { %s5383_s28 = scalar_lea.vmem %s44_s18, 8192  ;;  %p5388_p4 = scmp.lt.s32.totalorder %s44_s18, %s44_s18 }
   0xa   :  { %p5384_p3 = scmp.ne.s32.totalorder %s44_s18, %s5383_s28  ;;  %p5389_p5 = scmp.lt.s32.totalorder %s5383_s28, %s5383_s28 }
   0xc   :  { %p5390_p6 = por %p5389_p5, %p5388_p4 }
   0xe   :  { %p5391_p7 = pnand %p5390_p6, %p5384_p3 }
  0x10   :  { %5394 = shalt.err (!%p5391_p7)
}
  0x11   :  { %s5445_s29 = smov 512   ;;  %s5446_s30 = smov 32  }
  0x12   :  { %49 = dma.hbm_to_vmem [thread:$0]  %s6595_s5, 8192, %s44_s18, [#allocation9], %s5445_s29, %s5445_s29, %s5446_s30  }
  0x13   :  { %s5395_s16 = scalar_lea.hbm %s6593_s3, 8192 }
  0x14   :  { %p5396_p8 = scmp.ne.s32.totalorder %s6593_s3, %s5395_s16  ;;  %p5399_p9 = scmp.lt.u32.totalorder %s5395_s16, %s6593_s3 }
  0x16   :  { %p5401_p10 = pnand %p5399_p9, %p5396_p8 }
  0x18   :  { %5404 = shalt.err (!%p5401_p10)
}
  0x19   :  { %s5405_s23 = scalar_lea.vmem %s5511_s20, 8192  ;;  %p5410_p12 = scmp.lt.s32.totalorder %s5511_s20, %s5511_s20 }
  0x1a   :  { %p5406_p11 = scmp.ne.s32.totalorder %s5511_s20, %s5405_s23  ;;  %p5411_p13 = scmp.lt.s32.totalorder %s5405_s23, %s5405_s23 }
  0x1c   :  { %p5412_p0 = por %p5411_p13, %p5410_p12 }
  0x1e   :  { %p5413_p1 = pnand %p5412_p0, %p5406_p11 }
  0x20   :  { %5416 = shalt.err (!%p5413_p1)
}
  0x21   :  { %35 = dma.hbm_to_vmem [thread:$0]  %s6593_s3, 8192, %s5511_s20, [#allocation7], %s5445_s29, %s5445_s29, %s5446_s30  }
  0x22   :  { %s5447_s24 = smov [#allocation10]   ;;  %s5417_s28 = scalar_lea.hbm %s6596_s6, 8192 }
  0x23   :  { %s55_s25 = sshll.u32 %s5447_s24, 4  ;;  %p5418_p2 = scmp.ne.s32.totalorder %s6596_s6, %s5417_s28  ;;  %s56_s25 = int_to_ptr.vmem [resolvable:$true] %s55_s25 }
  0x24   :  { %p5421_p3 = scmp.lt.u32.totalorder %s5417_s28, %s6596_s6 }
  0x26   :  { %p5423_p4 = pnand %p5421_p3, %p5418_p2 }
  0x28   :  { %5426 = shalt.err (!%p5423_p4)
}
  0x29   :  { %s5427_s16 = scalar_lea.vmem %s56_s25, 8192  ;;  %p5432_p6 = scmp.lt.s32.totalorder %s56_s25, %s56_s25 }
  0x2a   :  { %p5428_p5 = scmp.ne.s32.totalorder %s56_s25, %s5427_s16  ;;  %p5433_p7 = scmp.lt.s32.totalorder %s5427_s16, %s5427_s16 }
  0x2c   :  { %p5434_p8 = por %p5433_p7, %p5432_p6 }
  0x2e   :  { %p5435_p9 = pnand %p5434_p8, %p5428_p5 }
  0x30   :  { %5438 = shalt.err (!%p5435_p9)
}
  0x31   :  { %61 = dma.hbm_to_vmem [thread:$0]  %s6596_s6, 8192, %s56_s25, [#allocation9], %s5445_s29, %s5445_s29, %s5446_s30  }
  0x32   :  { %5439 = dma.done.wait [#allocation7], 8192  }
  0x33   :  { %5440 = vsyncadd [#allocation7], 4294959104 }
  0x34   :  { %5441 = dma.done.wait [#allocation9], 16384  }
  0x35   :  { %5442 = vsyncadd [#allocation9], 4294950912  ;;  %v5448_v0 = vmov 0.0   ;;  %v95_v1 = vld [vmem:[%s6592_s2] sm:$0xff]  ;;  %vm148_vm0 = vcmask 1043456   ;;  %v96_v2 = vld [vmem:[%s6592_s2 + $0x8] sm:$0xff] }
  0x36   :  { %221 = vmatprep.mubr.f32.mxu0 %v5448_v0  ;;  %334 = vmatprep.mubr.f32.mxu1 %v5448_v0  ;;  %v87_v3 = vld [vmem:[%s6590_s0] sm:$0xff]  ;;  %v121_v4 = vcombine.high %v95_v1, %v95_v1  ;;  %v122_v5 = vcombine.high %v96_v2, %v96_v2  ;;  %v416_v6 = vld [vmem:[#allocation6 + $0x8] sm:$0xff]  ;;  %v418_v8 = vld [vmem:[#allocation6 + $0x18] sm:$0xff]  ;;  %vm123_vm1 = vcmask 31744   ;;  %vm3714_vm2 = vcmask 1045504  }
  0x37   :  { %v420_v7 = vld [vmem:[#allocation6 + $0x28] sm:$0xff]  ;;  %v422_v10 = vld [vmem:[#allocation6 + $0x38] sm:$0xff]  ;;  %v415_v11 = vld [vmem:[#allocation6] sm:$0xff]  ;;  %vm5450_vm3 = vmmov 0   ;;  %vm3710_vm4 = vcmask 48128   ;;  %vm3866_vm5 = vcmask 23552  }
  0x38   :  { %v5574_v9 = vpack.c.bf16 %v420_v7, %v416_v6  ;;  %v419_v12 = vld [vmem:[#allocation6 + $0x20] sm:$0xff]  ;;  %3881 = vmatprep.subr.msk.mxu0 %vm148_vm0, %v121_v4  ;;  %3891 = vmatprep.subr.msk.mxu1 %vm148_vm0, %v122_v5  ;;  %v5578_v13 = vpack.c.bf16 %v422_v10, %v418_v8  ;;  %v417_v15 = vld [vmem:[#allocation6 + $0x10] sm:$0xff]  ;;  %v424_v18 = vld [vmem:[#allocation6 + $0x48] sm:$0xff] }
  0x39   :  { %v5580_v14 = vpack.c.bf16 %v419_v12, %v415_v11  ;;  %v421_v16 = vld [vmem:[#allocation6 + $0x30] sm:$0xff]  ;;  %3882 = vmatpush1.msk.msra.mxu0 %vm148_vm0, %v95_v1  ;;  %3892 = vmatpush1.msk.msra.mxu1 %vm148_vm0, %v96_v2  ;;  %v428_v19 = vld [vmem:[#allocation6 + $0x68] sm:$0xff]  ;;  %v426_v20 = vld [vmem:[#allocation6 + $0x58] sm:$0xff] }
  0x3a   :  { %v5584_v17 = vpack.c.bf16 %v421_v16, %v417_v15  ;;  %3883 = vmatmul.mubr.msk.f32.vlgmr.msra.gmra.mrb[0].mxu0 %vm123_vm1, %v87_v3  ;;  %3893 = vmatmul.mubr.msk.f32.vlgmr.msra.gmra.mrb[0].mxu1 %vm123_vm1, %v87_v3  ;;  %v430_v21 = vld [vmem:[#allocation6 + $0x78] sm:$0xff]  ;;  %v423_v22 = vld [vmem:[#allocation6 + $0x40] sm:$0xff]  ;;  %v88_v24 = vld [vmem:[%s6590_s0 + $0x8] sm:$0xff]  ;;  %v5593_v25 = vpack.c.bf16 %v428_v19, %v424_v18 }
  0x3b   :  { %v427_v23 = vld [vmem:[#allocation6 + $0x60] sm:$0xff]  ;;  %3964 = vmatprep.subr.bf16.mxu0 %v5574_v9  ;;  %3996 = vmatprep.subr.bf16.mxu1 %v5578_v13  ;;  %v5595_v26 = vpack.c.bf16 %v430_v21, %v426_v20  ;;  %v425_v27 = vld [vmem:[#allocation6 + $0x50] sm:$0xff]  ;;  %v432_v31 = vld [vmem:[#allocation6 + $0x88] sm:$0xff] }
  0x3c   :  { %v429_v28 = vld [vmem:[#allocation6 + $0x70] sm:$0xff]  ;;  %3966 = vmatpush1.bf16.msra.mxu0 %v5580_v14  ;;  %3998 = vmatpush1.bf16.msra.mxu1 %v5584_v17  ;;  %v5599_v29 = vpack.c.bf16 %v427_v23, %v423_v22  ;;  %v436_v32 = vld [vmem:[#allocation6 + $0xa8] sm:$0xff]  ;;  %v434_v33 = vld [vmem:[#allocation6 + $0x98] sm:$0xff] }
  0x3d   :  { %v5601_v30 = vpack.c.bf16 %v429_v28, %v425_v27  ;;  %227 = vmatprep.mubr.f32.mxu0 %v5448_v0  ;;  %340 = vmatprep.mubr.f32.mxu1 %v5448_v0  ;;  %v438_v34 = vld [vmem:[#allocation6 + $0xb8] sm:$0xff]  ;;  %v431_v35 = vld [vmem:[#allocation6 + $0x80] sm:$0xff]  ;;  %v433_v37 = vld [vmem:[#allocation6 + $0x90] sm:$0xff]  ;;  %v5612_v40 = vpack.c.bf16 %v436_v32, %v432_v31 }
  0x3e   :  { %v435_v36 = vld [vmem:[#allocation6 + $0xa0] sm:$0xff]  ;;  %3884 = vmatmul.mubr.msk.f32.gmra.mrb[2].mxu0 %vm123_vm1, %v88_v24  ;;  %3894 = vmatmul.mubr.msk.f32.gmra.mrb[2].mxu1 %vm123_vm1, %v88_v24  ;;  %v437_v38 = vld [vmem:[#allocation6 + $0xb0] sm:$0xff]  ;;  %v5614_v41 = vpack.c.bf16 %v438_v34, %v434_v33  ;;  %v440_v42 = vld [vmem:[#allocation6 + $0xc8] sm:$0xff] }
  0x3f   :  { %3968 = vmatprep.subr.bf16.mxu0 %v5593_v25  ;;  %4000 = vmatprep.subr.bf16.mxu1 %v5595_v26  ;;  %v89_v39 = vld [vmem:[%s6590_s0 + $0x10] sm:$0xff]  ;;  %v444_v43 = vld [vmem:[#allocation6 + $0xe8] sm:$0xff]  ;;  %v5618_v44 = vpack.c.bf16 %v435_v36, %v431_v35  ;;  %v5620_v45 = vpack.c.bf16 %v437_v38, %v433_v37  ;;  %v442_v46 = vld [vmem:[#allocation6 + $0xd8] sm:$0xff] }
  0x40   :  { %3970 = vmatpush1.bf16.msra.mxu0 %v5599_v29  ;;  %4002 = vmatpush1.bf16.msra.mxu1 %v5601_v30  ;;  %v446_v47 = vld [vmem:[#allocation6 + $0xf8] sm:$0xff]  ;;  %v439_v48 = vld [vmem:[#allocation6 + $0xc0] sm:$0xff]  ;;  %v441_v50 = vld [vmem:[#allocation6 + $0xd0] sm:$0xff]  ;;  %v5631_v53 = vpack.c.bf16 %v444_v43, %v440_v42 }
  0x41   :  { %233 = vmatprep.mubr.f32.mxu0 %v5448_v0  ;;  %346 = vmatprep.mubr.f32.mxu1 %v5448_v0  ;;  %v443_v49 = vld [vmem:[#allocation6 + $0xe0] sm:$0xff]  ;;  %v445_v51 = vld [vmem:[#allocation6 + $0xf0] sm:$0xff]  ;;  %v90_v52 = vld [vmem:[%s6590_s0 + $0x18] sm:$0xff]  ;;  %v5633_v54 = vpack.c.bf16 %v446_v47, %v442_v46 }
  0x42   :  { %3885 = vmatmul.mubr.msk.f32.gmra.mrb[4].mxu0 %vm123_vm1, %v89_v39  ;;  %3895 = vmatmul.mubr.msk.f32.gmra.mrb[4].mxu1 %vm123_vm1, %v89_v39  ;;  %v448_v55 = vld [vmem:[#allocation6 + $0x108] sm:$0xff]  ;;  %v5637_v57 = vpack.c.bf16 %v443_v49, %v439_v48  ;;  %v5639_v58 = vpack.c.bf16 %v445_v51, %v441_v50  ;;  %v450_v59 = vld [vmem:[#allocation6 + $0x118] sm:$0xff]  ;;  %v447_v61 = vld [vmem:[#allocation6 + $0x100] sm:$0xff] }
  0x43   :  { %3972 = vmatprep.subr.bf16.mxu0 %v5612_v40  ;;  %4004 = vmatprep.subr.bf16.mxu1 %v5614_v41  ;;  %v452_v56 = vld [vmem:[#allocation6 + $0x128] sm:$0xff]  ;;  %v454_v60 = vld [vmem:[#allocation6 + $0x138] sm:$0xff]  ;;  %v451_v62 = vld [vmem:[#allocation6 + $0x120] sm:$0xff] }
  0x44   :  { %3974 = vmatpush1.bf16.msra.mxu0 %v5618_v44  ;;  %4006 = vmatpush1.bf16.msra.mxu1 %v5620_v45  ;;  %v449_v63 = vld [vmem:[#allocation6 + $0x110] sm:$0xff]  ;;  %v91_v2 = vld [vmem:[%s6590_s0 + $0x20] sm:$0xff]  ;;  %v5650_v3 = vpack.c.bf16 %v452_v56, %v448_v55  ;;  %v5652_v4 = vpack.c.bf16 %v454_v60, %v450_v59  ;;  %v456_v5 = vld [vmem:[#allocation6 + $0x148] sm:$0xff]  ;;  %v5656_v7 = vpack.c.bf16 %v451_v62, %v447_v61  ;;  %v99_v62 = vlaneseq }
  0x45   :  { %239 = vmatprep.mubr.f32.mxu0 %v5448_v0  ;;  %352 = vmatprep.mubr.f32.mxu1 %v5448_v0  ;;  %v453_v1 = vld [vmem:[#allocation6 + $0x130] sm:$0xff]  ;;  %v460_v6 = vld [vmem:[#allocation6 + $0x168] sm:$0xff]  ;;  %v458_v10 = vld [vmem:[#allocation6 + $0x158] sm:$0xff] }
  0x46   :  { %3886 = vmatmul.mubr.msk.f32.gmra.mrb[6].mxu0 %vm123_vm1, %v90_v52  ;;  %3896 = vmatmul.mubr.msk.f32.gmra.mrb[6].mxu1 %vm123_vm1, %v90_v52  ;;  %v5658_v8 = vpack.c.bf16 %v453_v1, %v449_v63  ;;  %v462_v11 = vld [vmem:[#allocation6 + $0x178] sm:$0xff]  ;;  %v455_v12 = vld [vmem:[#allocation6 + $0x140] sm:$0xff]  ;;  %v457_v16 = vld [vmem:[#allocation6 + $0x150] sm:$0xff]  ;;  %v5669_v20 = vpack.c.bf16 %v460_v6, %v456_v5  ;;  %v5765_v63 = vshrl.u32 %v99_v62, 7 }
  0x47   :  { %3976 = vmatprep.subr.bf16.mxu0 %v5631_v53  ;;  %4008 = vmatprep.subr.bf16.mxu1 %v5633_v54  ;;  %v459_v15 = vld [vmem:[#allocation6 + $0x160] sm:$0xff]  ;;  %v461_v18 = vld [vmem:[#allocation6 + $0x170] sm:$0xff]  ;;  %v92_v19 = vld [vmem:[%s6590_s0 + $0x28] sm:$0xff]  ;;  %v5671_v21 = vpack.c.bf16 %v462_v11, %v458_v10 }
  0x48   :  { %3978 = vmatpush1.bf16.msra.mxu0 %v5637_v57  ;;  %4010 = vmatpush1.bf16.msra.mxu1 %v5639_v58  ;;  %v464_v22 = vld [vmem:[#allocation6 + $0x188] sm:$0xff]  ;;  %v5675_v24 = vpack.c.bf16 %v459_v15, %v455_v12  ;;  %v5677_v27 = vpack.c.bf16 %v461_v18, %v457_v16  ;;  %v466_v28 = vld [vmem:[#allocation6 + $0x198] sm:$0xff]  ;;  %v463_v32 = vld [vmem:[#allocation6 + $0x180] sm:$0xff]  ;;  %v101_v1 = vsub.s32 0, %v5765_v63  ;;  %v105_v5 = vsub.s32 1, %v5765_v63 }
  0x49   :  { %245 = vmatprep.mubr.f32.mxu0 %v5448_v0  ;;  %358 = vmatprep.mubr.f32.mxu1 %v5448_v0  ;;  %v468_v23 = vld [vmem:[#allocation6 + $0x1a8] sm:$0xff]  ;;  %v470_v31 = vld [vmem:[#allocation6 + $0x1b8] sm:$0xff]  ;;  %v467_v33 = vld [vmem:[#allocation6 + $0x1a0] sm:$0xff]  ;;  %v113_v10 = vsub.s32 3, %v5765_v63 }
  0x4a   :  { %3887 = vmatmul.mubr.msk.f32.gmra.mrb[8].mxu0 %vm123_vm1, %v91_v2  ;;  %3897 = vmatmul.mubr.msk.f32.gmra.mrb[8].mxu1 %vm123_vm1, %v91_v2  ;;  %v465_v34 = vld [vmem:[#allocation6 + $0x190] sm:$0xff]  ;;  %v5688_v37 = vpack.c.bf16 %v468_v23, %v464_v22  ;;  %v5690_v38 = vpack.c.bf16 %v470_v31, %v466_v28  ;;  %v472_v39 = vld [vmem:[#allocation6 + $0x1c8] sm:$0xff]  ;;  %v5694_v43 = vpack.c.bf16 %v467_v33, %v463_v32  ;;  %v474_v47 = vld [vmem:[#allocation6 + $0x1d8] sm:$0xff]  ;;  %v6602_v23 = vsub.s32 2, %v5765_v63 }
  0x4b   :  { %3980 = vmatprep.subr.bf16.mxu0 %v5650_v3  ;;  %4012 = vmatprep.subr.bf16.mxu1 %v5652_v4  ;;  %v469_v35 = vld [vmem:[#allocation6 + $0x1b0] sm:$0xff]  ;;  %v476_v42 = vld [vmem:[#allocation6 + $0x1e8] sm:$0xff]  ;;  %v478_v48 = vld [vmem:[#allocation6 + $0x1f8] sm:$0xff] }
  0x4c   :  { %3982 = vmatpush1.bf16.msra.mxu0 %v5656_v7  ;;  %4014 = vmatpush1.bf16.msra.mxu1 %v5658_v8  ;;  %v93_v36 = vld [vmem:[%s6590_s0 + $0x30] sm:$0xff]  ;;  %v5696_v46 = vpack.c.bf16 %v469_v35, %v465_v34  ;;  %v471_v49 = vld [vmem:[#allocation6 + $0x1c0] sm:$0xff]  ;;  %v94_v55 = vld [vmem:[%s6590_s0 + $0x38] sm:$0xff]  ;;  %v5707_v56 = vpack.c.bf16 %v476_v42, %v472_v39  ;;  %v5709_v59 = vpack.c.bf16 %v478_v48, %v474_v47 }
  0x4d   :  { %251 = vmatprep.mubr.f32.mxu0 %v5448_v0  ;;  %364 = vmatprep.mubr.f32.mxu1 %v5448_v0  ;;  %v475_v50 = vld [vmem:[#allocation6 + $0x1e0] sm:$0xff]  ;;  %v473_v51 = vld [vmem:[#allocation6 + $0x1d0] sm:$0xff] }
  0x4e   :  { %3888 = vmatmul.mubr.msk.f32.gmra.mrb[10].mxu0 %vm123_vm1, %v92_v19  ;;  %3898 = vmatmul.mubr.msk.f32.gmra.mrb[10].mxu1 %vm123_vm1, %v92_v19  ;;  %v477_v52 = vld [vmem:[#allocation6 + $0x1f0] sm:$0xff]  ;;  %v5713_v60 = vpack.c.bf16 %v475_v50, %v471_v49  ;;  %v97_v2 = vld [vmem:[%s6594_s4] sm:$0xf] }
  0x4f   :  { %3984 = vmatprep.subr.bf16.mxu0 %v5669_v20  ;;  %4016 = vmatprep.subr.bf16.mxu1 %v5671_v21  ;;  %v5715_v61 = vpack.c.bf16 %v477_v52, %v473_v51  ;;  %v5774_v6 = vrot.slane %v97_v2, %v101_v1  ;;  %v5779_v11 = vrot.slane %v97_v2, %v105_v5 }
  0x50   :  { %3986 = vmatpush1.bf16.msra.mxu0 %v5675_v24  ;;  %4018 = vmatpush1.bf16.msra.mxu1 %v5677_v27  ;;  %v5784_v19 = vrot.slane %v97_v2, %v113_v10  ;;  %v5791_v34 = vrot.slane %v97_v2, %v6602_v23 }
  0x51   :  { %257 = vmatprep.mubr.f32.mxu0 %v5448_v0  ;;  %370 = vmatprep.mubr.f32.mxu1 %v5448_v0 }
  0x52   :  { %3889 = vmatmul.mubr.msk.f32.gmra.mrb[12].mxu0 %vm123_vm1, %v93_v36  ;;  %3899 = vmatmul.mubr.msk.f32.gmra.mrb[12].mxu1 %vm123_vm1, %v93_v36 }
  0x53   :  { %3988 = vmatprep.subr.bf16.mxu0 %v5688_v37  ;;  %4020 = vmatprep.subr.bf16.mxu1 %v5690_v38 }
  0x54   :  { %3990 = vmatpush1.bf16.msra.mxu0 %v5694_v43  ;;  %4022 = vmatpush1.bf16.msra.mxu1 %v5696_v46 }
  0x55   :  { %263 = vmatprep.mubr.f32.mxu0 %v5448_v0  ;;  %376 = vmatprep.mubr.f32.mxu1 %v5448_v0 }
  0x56   :  { %3890 = vmatmul.mubr.msk.f32.gmra.mrb[14].mxu0 %vm123_vm1, %v94_v55  ;;  %3900 = vmatmul.mubr.msk.f32.gmra.mrb[14].mxu1 %vm123_vm1, %v94_v55 }
  0x57   :  { %3992 = vmatprep.subr.bf16.mxu0 %v5707_v56  ;;  %4024 = vmatprep.subr.bf16.mxu1 %v5709_v59 }
  0x58   :  { %3994 = vmatpush1.bf16.msra.mxu0 %v5713_v60  ;;  %4026 = vmatpush1.bf16.msra.mxu1 %v5715_v61 }
  0x59   :  { %552 = vmatprep.mubr.f32.mxu0 %v5448_v0  ;;  %623 = vmatprep.mubr.f32.mxu1 %v5448_v0 }
  0x5a   :  { %4028 = vmatprep.subr.bf16.mxu0 %v5574_v9  ;;  %4060 = vmatprep.subr.bf16.mxu1 %v5578_v13 }
  0x5b   :  { %553 = vmatmul.mubr.f32.vlgmr.msra.gmra.mrb[0].mxu0 %v5448_v0  ;;  %624 = vmatmul.mubr.f32.vlgmr.msra.gmra.mrb[0].mxu1 %v5448_v0 }
  0x5c   :  { %4030 = vmatpush1.bf16.msra.mxu0 %v5580_v14  ;;  %4062 = vmatpush1.bf16.msra.mxu1 %v5584_v17 }
  0x5d   :  { %4032 = vmatprep.subr.bf16.mxu0 %v5593_v25  ;;  %4064 = vmatprep.subr.bf16.mxu1 %v5595_v26 }
  0x5e   :  { %728 = vmatprep.mubr.f32.mxu0 %v5448_v0  ;;  %799 = vmatprep.mubr.f32.mxu1 %v5448_v0 }
  0x60   :  { %4034 = vmatpush1.bf16.msra.mxu0 %v5599_v29  ;;  %4066 = vmatpush1.bf16.msra.mxu1 %v5601_v30 }
  0x61   :  { %4036 = vmatprep.subr.bf16.mxu0 %v5612_v40  ;;  %4068 = vmatprep.subr.bf16.mxu1 %v5614_v41 }
  0x64   :  { %4038 = vmatpush1.bf16.msra.mxu0 %v5618_v44  ;;  %4070 = vmatpush1.bf16.msra.mxu1 %v5620_v45 }
  0x65   :  { %4040 = vmatprep.subr.bf16.mxu0 %v5631_v53  ;;  %4072 = vmatprep.subr.bf16.mxu1 %v5633_v54 }
  0x68   :  { %4042 = vmatpush1.bf16.msra.mxu0 %v5637_v57  ;;  %4074 = vmatpush1.bf16.msra.mxu1 %v5639_v58 }
  0x69   :  { %4044 = vmatprep.subr.bf16.mxu0 %v5650_v3  ;;  %4076 = vmatprep.subr.bf16.mxu1 %v5652_v4 }
  0x6c   :  { %4046 = vmatpush1.bf16.msra.mxu0 %v5656_v7  ;;  %4078 = vmatpush1.bf16.msra.mxu1 %v5658_v8 }
  0x6d   :  { %4048 = vmatprep.subr.bf16.mxu0 %v5669_v20  ;;  %4080 = vmatprep.subr.bf16.mxu1 %v5671_v21 }
  0x70   :  { %4050 = vmatpush1.bf16.msra.mxu0 %v5675_v24  ;;  %4082 = vmatpush1.bf16.msra.mxu1 %v5677_v27 }
  0x71   :  { %4052 = vmatprep.subr.bf16.mxu0 %v5688_v37  ;;  %4084 = vmatprep.subr.bf16.mxu1 %v5690_v38 }
  0x74   :  { %4054 = vmatpush1.bf16.msra.mxu0 %v5694_v43  ;;  %4086 = vmatpush1.bf16.msra.mxu1 %v5696_v46 }
  0x75   :  { %4056 = vmatprep.subr.bf16.mxu0 %v5707_v56  ;;  %4088 = vmatprep.subr.bf16.mxu1 %v5709_v59 }
  0x78   :  { %4058 = vmatpush1.bf16.msra.mxu0 %v5713_v60  ;;  %4090 = vmatpush1.bf16.msra.mxu1 %v5715_v61 }
  0x79   :  { %4092 = vmatprep.subr.bf16.mxu0 %v5574_v9  ;;  %4124 = vmatprep.subr.bf16.mxu1 %v5578_v13 }
 0x12e   :  { %v554_v12 = vpop.f32.mrb[0].mxu0  ;;  %v625_v15 = vpop.f32.mrb[0].mxu1 }
 0x12f   :  { %v5075_v16 = vadd.f32 %v554_v12, %v5774_v6  ;;  %v556_v18 = vpop.f32.mrb[1].mxu0  ;;  %v627_v22 = vpop.f32.mrb[1].mxu1  ;;  %v5091_v35 = vadd.f32 %v625_v15, %v5791_v34 }
 0x130   :  { %v5076_v28 = vadd.f32 %v556_v18, %v5779_v11  ;;  %v5092_v33 = vadd.f32 %v627_v22, %v5784_v19 }
 0x131   :  { %v634_v31 = vmul.f32 0.5, %v5075_v16  ;;  %v636_v36 = vmul.f32 0.5, %v5091_v35 }
 0x132   :  { %v635_v32 = vmul.f32 0.5, %v5076_v28 }
 0x133   :  { %5213 = vtanh.f32 %v634_v31 }
 0x134   :  { %5215 = vtanh.f32 %v635_v32 }
 0x135   :  { %5217 = vtanh.f32 %v5092_v33 }
 0x136   :  { %5219 = vtanh.f32 %v636_v36 }
 0x13d   :  { %v5214_v39 = vpop.eup %5213 }
 0x13e   :  { %v640_v42 = vmul.f32 0.5, %v5214_v39  ;;  %v5216_v47 = vpop.eup %5215 }
 0x13f   :  { %v641_v49 = vmul.f32 0.5, %v5216_v47  ;;  %v5218_v50 = vpop.eup %5217 }
 0x140   :  { %v643_v48 = vadd.f32 0.5, %v640_v42  ;;  %v5220_v2 = vpop.eup %5219 }
 0x141   :  { %v644_v51 = vadd.f32 0.5, %v641_v49  ;;  %v642_v12 = vmul.f32 0.5, %v5220_v2 }
 0x142   :  { %v648_v52 = vmul.f32 %v5218_v50, %v643_v48 }
 0x143   :  { %v647_v55 = vmul.f32 0.0, %v644_v51  ;;  %v645_v16 = vadd.f32 0.5, %v642_v12 }
 0x145   :  { %v5794_v62 = vadd.f32 %v648_v52, %v647_v55 }
 0x147   :  { %5221 = vtanh.f32 %v5794_v62 }
 0x151   :  { %v5222_v18 = vpop.eup %5221 }
 0x152   :  { %v5797_v15 = vmul.f32 %v5222_v18, %v645_v16 }
 0x154   :  { %729 = vmatmul.mubr.f32.vlgmr.msra.gmra.mrb[2].mxu0 %v5797_v15  ;;  %800 = vmatmul.mubr.f32.vlgmr.msra.gmra.mrb[2].mxu1 %v5797_v15 }
 0x155   :  { %4094 = vmatpush1.bf16.msra.mxu0 %v5580_v14  ;;  %4126 = vmatpush1.bf16.msra.mxu1 %v5584_v17 }
 0x156   :  { %4096 = vmatprep.subr.bf16.mxu0 %v5593_v25  ;;  %4128 = vmatprep.subr.bf16.mxu1 %v5595_v26 }
 0x157   :  { %905 = vmatprep.mubr.f32.mxu0 %v5448_v0  ;;  %976 = vmatprep.mubr.f32.mxu1 %v5448_v0 }
 0x159   :  { %4098 = vmatpush1.bf16.msra.mxu0 %v5599_v29  ;;  %4130 = vmatpush1.bf16.msra.mxu1 %v5601_v30 }
 0x15a   :  { %4100 = vmatprep.subr.bf16.mxu0 %v5612_v40  ;;  %4132 = vmatprep.subr.bf16.mxu1 %v5614_v41 }
 0x15d   :  { %4102 = vmatpush1.bf16.msra.mxu0 %v5618_v44  ;;  %4134 = vmatpush1.bf16.msra.mxu1 %v5620_v45 }
 0x15e   :  { %4104 = vmatprep.subr.bf16.mxu0 %v5631_v53  ;;  %4136 = vmatprep.subr.bf16.mxu1 %v5633_v54 }
 0x161   :  { %4106 = vmatpush1.bf16.msra.mxu0 %v5637_v57  ;;  %4138 = vmatpush1.bf16.msra.mxu1 %v5639_v58 }
 0x162   :  { %4108 = vmatprep.subr.bf16.mxu0 %v5650_v3  ;;  %4140 = vmatprep.subr.bf16.mxu1 %v5652_v4 }
 0x165   :  { %4110 = vmatpush1.bf16.msra.mxu0 %v5656_v7  ;;  %4142 = vmatpush1.bf16.msra.mxu1 %v5658_v8 }
 0x166   :  { %4112 = vmatprep.subr.bf16.mxu0 %v5669_v20  ;;  %4144 = vmatprep.subr.bf16.mxu1 %v5671_v21 }
 0x169   :  { %4114 = vmatpush1.bf16.msra.mxu0 %v5675_v24  ;;  %4146 = vmatpush1.bf16.msra.mxu1 %v5677_v27 }
 0x16a   :  { %4116 = vmatprep.subr.bf16.mxu0 %v5688_v37  ;;  %4148 = vmatprep.subr.bf16.mxu1 %v5690_v38 }
 0x16d   :  { %4118 = vmatpush1.bf16.msra.mxu0 %v5694_v43  ;;  %4150 = vmatpush1.bf16.msra.mxu1 %v5696_v46 }
 0x16e   :  { %4120 = vmatprep.subr.bf16.mxu0 %v5707_v56  ;;  %4152 = vmatprep.subr.bf16.mxu1 %v5709_v59 }
 0x171   :  { %4122 = vmatpush1.bf16.msra.mxu0 %v5713_v60  ;;  %4154 = vmatpush1.bf16.msra.mxu1 %v5715_v61 }
 0x172   :  { %4156 = vmatprep.subr.bf16.mxu0 %v5574_v9  ;;  %4188 = vmatprep.subr.bf16.mxu1 %v5578_v13 }
 0x227   :  { %v730_v22 = vpop.f32.mrb[2].mxu0  ;;  %v801_v28 = vpop.f32.mrb[2].mxu1 }
 0x228   :  { %v5077_v31 = vadd.f32 %v730_v22, %v5774_v6  ;;  %v732_v32 = vpop.f32.mrb[3].mxu0  ;;  %v803_v33 = vpop.f32.mrb[3].mxu1  ;;  %v5093_v47 = vadd.f32 %v801_v28, %v5791_v34 }
 0x229   :  { %v5078_v35 = vadd.f32 %v732_v32, %v5779_v11  ;;  %v5094_v42 = vadd.f32 %v803_v33, %v5784_v19 }
 0x22a   :  { %v810_v36 = vmul.f32 0.5, %v5077_v31  ;;  %v812_v48 = vmul.f32 0.5, %v5093_v47 }
 0x22b   :  { %v811_v39 = vmul.f32 0.5, %v5078_v35 }
 0x22c   :  { %5223 = vtanh.f32 %v810_v36 }
 0x22d   :  { %5225 = vtanh.f32 %v811_v39 }
 0x22e   :  { %5227 = vtanh.f32 %v5094_v42 }
 0x22f   :  { %5229 = vtanh.f32 %v812_v48 }
 0x236   :  { %v5224_v49 = vpop.eup %5223 }
 0x237   :  { %v816_v50 = vmul.f32 0.5, %v5224_v49  ;;  %v5226_v51 = vpop.eup %5225 }
 0x238   :  { %v817_v55 = vmul.f32 0.5, %v5226_v51  ;;  %v5228_v2 = vpop.eup %5227 }
 0x239   :  { %v819_v52 = vadd.f32 0.5, %v816_v50  ;;  %v5230_v31 = vpop.eup %5229 }
 0x23a   :  { %v820_v12 = vadd.f32 0.5, %v817_v55  ;;  %v818_v32 = vmul.f32 0.5, %v5230_v31 }
 0x23b   :  { %v824_v16 = vmul.f32 %v5228_v2, %v819_v52 }
 0x23c   :  { %v823_v18 = vmul.f32 %v820_v12, %v5794_v62  ;;  %v821_v33 = vadd.f32 0.5, %v818_v32 }
 0x23e   :  { %v5840_v22 = vadd.f32 %v824_v16, %v823_v18 }
 0x240   :  { %5231 = vtanh.f32 %v5840_v22 }
 0x24a   :  { %v5232_v28 = vpop.eup %5231 }
 0x24b   :  { %v5843_v35 = vmul.f32 %v5232_v28, %v821_v33 }
 0x24d   :  { %906 = vmatmul.mubr.f32.vlgmr.msra.gmra.mrb[4].mxu0 %v5843_v35  ;;  %977 = vmatmul.mubr.f32.vlgmr.msra.gmra.mrb[4].mxu1 %v5843_v35 }
 0x24e   :  { %4158 = vmatpush1.bf16.msra.mxu0 %v5580_v14  ;;  %4190 = vmatpush1.bf16.msra.mxu1 %v5584_v17 }
 0x24f   :  { %4160 = vmatprep.subr.bf16.mxu0 %v5593_v25  ;;  %4192 = vmatprep.subr.bf16.mxu1 %v5595_v26 }
 0x250   :  { %1082 = vmatprep.mubr.f32.mxu0 %v5448_v0  ;;  %1153 = vmatprep.mubr.f32.mxu1 %v5448_v0 }
 0x252   :  { %4162 = vmatpush1.bf16.msra.mxu0 %v5599_v29  ;;  %4194 = vmatpush1.bf16.msra.mxu1 %v5601_v30 }
 0x253   :  { %4164 = vmatprep.subr.bf16.mxu0 %v5612_v40  ;;  %4196 = vmatprep.subr.bf16.mxu1 %v5614_v41 }
 0x256   :  { %4166 = vmatpush1.bf16.msra.mxu0 %v5618_v44  ;;  %4198 = vmatpush1.bf16.msra.mxu1 %v5620_v45 }
 0x257   :  { %4168 = vmatprep.subr.bf16.mxu0 %v5631_v53  ;;  %4200 = vmatprep.subr.bf16.mxu1 %v5633_v54 }
 0x25a   :  { %4170 = vmatpush1.bf16.msra.mxu0 %v5637_v57  ;;  %4202 = vmatpush1.bf16.msra.mxu1 %v5639_v58 }
 0x25b   :  { %4172 = vmatprep.subr.bf16.mxu0 %v5650_v3  ;;  %4204 = vmatprep.subr.bf16.mxu1 %v5652_v4 }
 0x25e   :  { %4174 = vmatpush1.bf16.msra.mxu0 %v5656_v7  ;;  %4206 = vmatpush1.bf16.msra.mxu1 %v5658_v8 }
 0x25f   :  { %4176 = vmatprep.subr.bf16.mxu0 %v5669_v20  ;;  %4208 = vmatprep.subr.bf16.mxu1 %v5671_v21 }
 0x262   :  { %4178 = vmatpush1.bf16.msra.mxu0 %v5675_v24  ;;  %4210 = vmatpush1.bf16.msra.mxu1 %v5677_v27 }
 0x263   :  { %4180 = vmatprep.subr.bf16.mxu0 %v5688_v37  ;;  %4212 = vmatprep.subr.bf16.mxu1 %v5690_v38 }
 0x266   :  { %4182 = vmatpush1.bf16.msra.mxu0 %v5694_v43  ;;  %4214 = vmatpush1.bf16.msra.mxu1 %v5696_v46 }
 0x267   :  { %4184 = vmatprep.subr.bf16.mxu0 %v5707_v56  ;;  %4216 = vmatprep.subr.bf16.mxu1 %v5709_v59 }
 0x26a   :  { %4186 = vmatpush1.bf16.msra.mxu0 %v5713_v60  ;;  %4218 = vmatpush1.bf16.msra.mxu1 %v5715_v61 }
 0x26b   :  { %4220 = vmatprep.subr.bf16.mxu0 %v5574_v9  ;;  %4252 = vmatprep.subr.bf16.mxu1 %v5578_v13 }
 0x320   :  { %v907_v62 = vpop.f32.mrb[4].mxu0  ;;  %v978_v36 = vpop.f32.mrb[4].mxu1 }
 0x321   :  { %v5079_v39 = vadd.f32 %v907_v62, %v5774_v6  ;;  %v909_v42 = vpop.f32.mrb[5].mxu0  ;;  %v980_v47 = vpop.f32.mrb[5].mxu1  ;;  %v5095_v52 = vadd.f32 %v978_v36, %v5791_v34 }
 0x322   :  { %v5080_v48 = vadd.f32 %v909_v42, %v5779_v11  ;;  %v5096_v51 = vadd.f32 %v980_v47, %v5784_v19 }
 0x323   :  { %v987_v49 = vmul.f32 0.5, %v5079_v39  ;;  %v989_v55 = vmul.f32 0.5, %v5095_v52 }
 0x324   :  { %v988_v50 = vmul.f32 0.5, %v5080_v48 }
 0x325   :  { %5233 = vtanh.f32 %v987_v49 }
 0x326   :  { %5235 = vtanh.f32 %v988_v50 }
 0x327   :  { %5237 = vtanh.f32 %v5096_v51 }
 0x328   :  { %5239 = vtanh.f32 %v989_v55 }
 0x32f   :  { %v5234_v2 = vpop.eup %5233 }
 0x330   :  { %v993_v12 = vmul.f32 0.5, %v5234_v2  ;;  %v5236_v16 = vpop.eup %5235 }
 0x331   :  { %v994_v31 = vmul.f32 0.5, %v5236_v16  ;;  %v5238_v32 = vpop.eup %5237 }
 0x332   :  { %v996_v18 = vadd.f32 0.5, %v993_v12  ;;  %v5240_v42 = vpop.eup %5239 }
 0x333   :  { %v997_v33 = vadd.f32 0.5, %v994_v31  ;;  %v995_v47 = vmul.f32 0.5, %v5240_v42 }
 0x334   :  { %v1001_v28 = vmul.f32 %v5238_v32, %v996_v18 }
 0x335   :  { %v1000_v62 = vmul.f32 %v997_v33, %v5840_v22  ;;  %v998_v48 = vadd.f32 0.5, %v995_v47 }
 0x337   :  { %v5886_v39 = vadd.f32 %v1001_v28, %v1000_v62 }
 0x339   :  { %5241 = vtanh.f32 %v5886_v39 }
 0x343   :  { %v5242_v36 = vpop.eup %5241 }
 0x344   :  { %v5889_v49 = vmul.f32 %v5242_v36, %v998_v48 }
 0x346   :  { %1083 = vmatmul.mubr.f32.vlgmr.msra.gmra.mrb[6].mxu0 %v5889_v49  ;;  %1154 = vmatmul.mubr.f32.vlgmr.msra.gmra.mrb[6].mxu1 %v5889_v49 }
 0x347   :  { %4222 = vmatpush1.bf16.msra.mxu0 %v5580_v14  ;;  %4254 = vmatpush1.bf16.msra.mxu1 %v5584_v17 }
 0x348   :  { %4224 = vmatprep.subr.bf16.mxu0 %v5593_v25  ;;  %4256 = vmatprep.subr.bf16.mxu1 %v5595_v26 }
 0x349   :  { %1259 = vmatprep.mubr.f32.mxu0 %v5448_v0  ;;  %1330 = vmatprep.mubr.f32.mxu1 %v5448_v0 }
 0x34b   :  { %4226 = vmatpush1.bf16.msra.mxu0 %v5599_v29  ;;  %4258 = vmatpush1.bf16.msra.mxu1 %v5601_v30 }
 0x34c   :  { %4228 = vmatprep.subr.bf16.mxu0 %v5612_v40  ;;  %4260 = vmatprep.subr.bf16.mxu1 %v5614_v41 }
 0x34f   :  { %4230 = vmatpush1.bf16.msra.mxu0 %v5618_v44  ;;  %4262 = vmatpush1.bf16.msra.mxu1 %v5620_v45 }
 0x350   :  { %4232 = vmatprep.subr.bf16.mxu0 %v5631_v53  ;;  %4264 = vmatprep.subr.bf16.mxu1 %v5633_v54 }
 0x353   :  { %4234 = vmatpush1.bf16.msra.mxu0 %v5637_v57  ;;  %4266 = vmatpush1.bf16.msra.mxu1 %v5639_v58 }
 0x354   :  { %4236 = vmatprep.subr.bf16.mxu0 %v5650_v3  ;;  %4268 = vmatprep.subr.bf16.mxu1 %v5652_v4 }
 0x357   :  { %4238 = vmatpush1.bf16.msra.mxu0 %v5656_v7  ;;  %4270 = vmatpush1.bf16.msra.mxu1 %v5658_v8 }
 0x358   :  { %4240 = vmatprep.subr.bf16.mxu0 %v5669_v20  ;;  %4272 = vmatprep.subr.bf16.mxu1 %v5671_v21 }
 0x35b   :  { %4242 = vmatpush1.bf16.msra.mxu0 %v5675_v24  ;;  %4274 = vmatpush1.bf16.msra.mxu1 %v5677_v27 }
 0x35c   :  { %4244 = vmatprep.subr.bf16.mxu0 %v5688_v37  ;;  %4276 = vmatprep.subr.bf16.mxu1 %v5690_v38 }
 0x35f   :  { %4246 = vmatpush1.bf16.msra.mxu0 %v5694_v43  ;;  %4278 = vmatpush1.bf16.msra.mxu1 %v5696_v46 }
 0x360   :  { %4248 = vmatprep.subr.bf16.mxu0 %v5707_v56  ;;  %4280 = vmatprep.subr.bf16.mxu1 %v5709_v59 }
 0x363   :  { %4250 = vmatpush1.bf16.msra.mxu0 %v5713_v60  ;;  %4282 = vmatpush1.bf16.msra.mxu1 %v5715_v61 }
 0x364   :  { %4284 = vmatprep.subr.bf16.mxu0 %v5574_v9  ;;  %4316 = vmatprep.subr.bf16.mxu1 %v5578_v13 }
 0x419   :  { %v1084_v22 = vpop.f32.mrb[6].mxu0  ;;  %v1155_v50 = vpop.f32.mrb[6].mxu1 }
 0x41a   :  { %v5081_v51 = vadd.f32 %v1084_v22, %v5774_v6  ;;  %v1086_v52 = vpop.f32.mrb[7].mxu0  ;;  %v1157_v55 = vpop.f32.mrb[7].mxu1  ;;  %v5097_v31 = vadd.f32 %v1155_v50, %v5791_v34 }
 0x41b   :  { %v5082_v2 = vadd.f32 %v1086_v52, %v5779_v11  ;;  %v5098_v18 = vadd.f32 %v1157_v55, %v5784_v19 }
 0x41c   :  { %v1164_v12 = vmul.f32 0.5, %v5081_v51  ;;  %v1166_v32 = vmul.f32 0.5, %v5097_v31 }
 0x41d   :  { %v1165_v16 = vmul.f32 0.5, %v5082_v2 }
 0x41e   :  { %5243 = vtanh.f32 %v1164_v12 }
 0x41f   :  { %5245 = vtanh.f32 %v1165_v16 }
 0x420   :  { %5247 = vtanh.f32 %v5098_v18 }
 0x421   :  { %5249 = vtanh.f32 %v1166_v32 }
 0x428   :  { %v5244_v33 = vpop.eup %5243 }
 0x429   :  { %v1170_v28 = vmul.f32 0.5, %v5244_v33  ;;  %v5246_v62 = vpop.eup %5245 }
 0x42a   :  { %v1171_v47 = vmul.f32 0.5, %v5246_v62  ;;  %v5248_v48 = vpop.eup %5247 }
 0x42b   :  { %v1173_v42 = vadd.f32 0.5, %v1170_v28  ;;  %v5250_v55 = vpop.eup %5249 }
 0x42c   :  { %v1174_v36 = vadd.f32 0.5, %v1171_v47  ;;  %v1172_v2 = vmul.f32 0.5, %v5250_v55 }
 0x42d   :  { %v1178_v22 = vmul.f32 %v5248_v48, %v1173_v42 }
 0x42e   :  { %v1177_v51 = vmul.f32 %v1174_v36, %v5886_v39  ;;  %v1175_v12 = vadd.f32 0.5, %v1172_v2 }
 0x430   :  { %v5932_v52 = vadd.f32 %v1178_v22, %v1177_v51 }
 0x432   :  { %5251 = vtanh.f32 %v5932_v52 }
 0x43c   :  { %v5252_v50 = vpop.eup %5251 }
 0x43d   :  { %v5935_v16 = vmul.f32 %v5252_v50, %v1175_v12 }
 0x43f   :  { %1260 = vmatmul.mubr.f32.vlgmr.msra.gmra.mrb[8].mxu0 %v5935_v16  ;;  %1331 = vmatmul.mubr.f32.vlgmr.msra.gmra.mrb[8].mxu1 %v5935_v16 }
 0x440   :  { %4286 = vmatpush1.bf16.msra.mxu0 %v5580_v14  ;;  %4318 = vmatpush1.bf16.msra.mxu1 %v5584_v17 }
 0x441   :  { %4288 = vmatprep.subr.bf16.mxu0 %v5593_v25  ;;  %4320 = vmatprep.subr.bf16.mxu1 %v5595_v26 }
 0x442   :  { %1436 = vmatprep.mubr.f32.mxu0 %v5448_v0  ;;  %1507 = vmatprep.mubr.f32.mxu1 %v5448_v0 }
 0x444   :  { %4290 = vmatpush1.bf16.msra.mxu0 %v5599_v29  ;;  %4322 = vmatpush1.bf16.msra.mxu1 %v5601_v30 }
 0x445   :  { %4292 = vmatprep.subr.bf16.mxu0 %v5612_v40  ;;  %4324 = vmatprep.subr.bf16.mxu1 %v5614_v41 }
 0x448   :  { %4294 = vmatpush1.bf16.msra.mxu0 %v5618_v44  ;;  %4326 = vmatpush1.bf16.msra.mxu1 %v5620_v45 }
 0x449   :  { %4296 = vmatprep.subr.bf16.mxu0 %v5631_v53  ;;  %4328 = vmatprep.subr.bf16.mxu1 %v5633_v54 }
 0x44c   :  { %4298 = vmatpush1.bf16.msra.mxu0 %v5637_v57  ;;  %4330 = vmatpush1.bf16.msra.mxu1 %v5639_v58 }
 0x44d   :  { %4300 = vmatprep.subr.bf16.mxu0 %v5650_v3  ;;  %4332 = vmatprep.subr.bf16.mxu1 %v5652_v4 }
 0x450   :  { %4302 = vmatpush1.bf16.msra.mxu0 %v5656_v7  ;;  %4334 = vmatpush1.bf16.msra.mxu1 %v5658_v8 }
 0x451   :  { %4304 = vmatprep.subr.bf16.mxu0 %v5669_v20  ;;  %4336 = vmatprep.subr.bf16.mxu1 %v5671_v21 }
 0x454   :  { %4306 = vmatpush1.bf16.msra.mxu0 %v5675_v24  ;;  %4338 = vmatpush1.bf16.msra.mxu1 %v5677_v27 }
 0x455   :  { %4308 = vmatprep.subr.bf16.mxu0 %v5688_v37  ;;  %4340 = vmatprep.subr.bf16.mxu1 %v5690_v38 }
 0x458   :  { %4310 = vmatpush1.bf16.msra.mxu0 %v5694_v43  ;;  %4342 = vmatpush1.bf16.msra.mxu1 %v5696_v46 }
 0x459   :  { %4312 = vmatprep.subr.bf16.mxu0 %v5707_v56  ;;  %4344 = vmatprep.subr.bf16.mxu1 %v5709_v59 }
 0x45c   :  { %4314 = vmatpush1.bf16.msra.mxu0 %v5713_v60  ;;  %4346 = vmatpush1.bf16.msra.mxu1 %v5715_v61 }
 0x45d   :  { %4348 = vmatprep.subr.bf16.mxu0 %v5574_v9  ;;  %4380 = vmatprep.subr.bf16.mxu1 %v5578_v13 }
 0x512   :  { %v1261_v39 = vpop.f32.mrb[8].mxu0  ;;  %v1332_v18 = vpop.f32.mrb[8].mxu1 }
 0x513   :  { %v5083_v31 = vadd.f32 %v1261_v39, %v5774_v6  ;;  %v1263_v32 = vpop.f32.mrb[9].mxu0  ;;  %v1334_v33 = vpop.f32.mrb[9].mxu1  ;;  %v5099_v48 = vadd.f32 %v1332_v18, %v5791_v34 }
 0x514   :  { %v5084_v28 = vadd.f32 %v1263_v32, %v5779_v11  ;;  %v5100_v47 = vadd.f32 %v1334_v33, %v5784_v19 }
 0x515   :  { %v1341_v62 = vmul.f32 0.5, %v5083_v31  ;;  %v1343_v36 = vmul.f32 0.5, %v5099_v48 }
 0x516   :  { %v1342_v42 = vmul.f32 0.5, %v5084_v28 }
 0x517   :  { %5253 = vtanh.f32 %v1341_v62 }
 0x518   :  { %5255 = vtanh.f32 %v1342_v42 }
 0x519   :  { %5257 = vtanh.f32 %v5100_v47 }
 0x51a   :  { %5259 = vtanh.f32 %v1343_v36 }
 0x521   :  { %v5254_v22 = vpop.eup %5253 }
 0x522   :  { %v1347_v51 = vmul.f32 0.5, %v5254_v22  ;;  %v5256_v55 = vpop.eup %5255 }
 0x523   :  { %v1348_v12 = vmul.f32 0.5, %v5256_v55  ;;  %v5258_v50 = vpop.eup %5257 }
 0x524   :  { %v1350_v2 = vadd.f32 0.5, %v1347_v51  ;;  %v5260_v33 = vpop.eup %5259 }
 0x525   :  { %v1351_v39 = vadd.f32 0.5, %v1348_v12  ;;  %v1349_v28 = vmul.f32 0.5, %v5260_v33 }
 0x526   :  { %v1355_v23 = vmul.f32 %v5258_v50, %v1350_v2 }
 0x527   :  { %v1354_v31 = vmul.f32 %v1351_v39, %v5932_v52  ;;  %v1352_v62 = vadd.f32 0.5, %v1349_v28 }
 0x529   :  { %v5978_v32 = vadd.f32 %v1355_v23, %v1354_v31 }
 0x52b   :  { %5261 = vtanh.f32 %v5978_v32 }
 0x535   :  { %v5262_v18 = vpop.eup %5261 }
 0x536   :  { %v5981_v42 = vmul.f32 %v5262_v18, %v1352_v62 }
 0x538   :  { %1437 = vmatmul.mubr.f32.vlgmr.msra.gmra.mrb[10].mxu0 %v5981_v42  ;;  %1508 = vmatmul.mubr.f32.vlgmr.msra.gmra.mrb[10].mxu1 %v5981_v42 }
 0x539   :  { %4350 = vmatpush1.bf16.msra.mxu0 %v5580_v14  ;;  %4382 = vmatpush1.bf16.msra.mxu1 %v5584_v17 }
 0x53a   :  { %4352 = vmatprep.subr.bf16.mxu0 %v5593_v25  ;;  %4384 = vmatprep.subr.bf16.mxu1 %v5595_v26 }
 0x53b   :  { %1613 = vmatprep.mubr.f32.mxu0 %v5448_v0  ;;  %1684 = vmatprep.mubr.f32.mxu1 %v5448_v0 }
 0x53d   :  { %4354 = vmatpush1.bf16.msra.mxu0 %v5599_v29  ;;  %4386 = vmatpush1.bf16.msra.mxu1 %v5601_v30 }
 0x53e   :  { %4356 = vmatprep.subr.bf16.mxu0 %v5612_v40  ;;  %4388 = vmatprep.subr.bf16.mxu1 %v5614_v41 }
 0x541   :  { %4358 = vmatpush1.bf16.msra.mxu0 %v5618_v44  ;;  %4390 = vmatpush1.bf16.msra.mxu1 %v5620_v45 }
 0x542   :  { %4360 = vmatprep.subr.bf16.mxu0 %v5631_v53  ;;  %4392 = vmatprep.subr.bf16.mxu1 %v5633_v54 }
 0x545   :  { %4362 = vmatpush1.bf16.msra.mxu0 %v5637_v57  ;;  %4394 = vmatpush1.bf16.msra.mxu1 %v5639_v58 }
 0x546   :  { %4364 = vmatprep.subr.bf16.mxu0 %v5650_v3  ;;  %4396 = vmatprep.subr.bf16.mxu1 %v5652_v4 }
 0x549   :  { %4366 = vmatpush1.bf16.msra.mxu0 %v5656_v7  ;;  %4398 = vmatpush1.bf16.msra.mxu1 %v5658_v8 }
 0x54a   :  { %4368 = vmatprep.subr.bf16.mxu0 %v5669_v20  ;;  %4400 = vmatprep.subr.bf16.mxu1 %v5671_v21 }
 0x54d   :  { %4370 = vmatpush1.bf16.msra.mxu0 %v5675_v24  ;;  %4402 = vmatpush1.bf16.msra.mxu1 %v5677_v27 }
 0x54e   :  { %4372 = vmatprep.subr.bf16.mxu0 %v5688_v37  ;;  %4404 = vmatprep.subr.bf16.mxu1 %v5690_v38 }
 0x551   :  { %4374 = vmatpush1.bf16.msra.mxu0 %v5694_v43  ;;  %4406 = vmatpush1.bf16.msra.mxu1 %v5696_v46 }
 0x552   :  { %4376 = vmatprep.subr.bf16.mxu0 %v5707_v56  ;;  %4408 = vmatprep.subr.bf16.mxu1 %v5709_v59 }
 0x555   :  { %4378 = vmatpush1.bf16.msra.mxu0 %v5713_v60  ;;  %4410 = vmatpush1.bf16.msra.mxu1 %v5715_v61 }
 0x556   :  { %4412 = vmatprep.subr.bf16.mxu0 %v5574_v9  ;;  %4444 = vmatprep.subr.bf16.mxu1 %v5578_v13 }
 0x60b   :  { %v1438_v23 = vpop.f32.mrb[10].mxu0  ;;  %v1509_v52 = vpop.f32.mrb[10].mxu1 }
 0x60c   :  { %v5085_v47 = vadd.f32 %v1438_v23, %v5774_v6  ;;  %v1440_v48 = vpop.f32.mrb[11].mxu0  ;;  %v1511_v36 = vpop.f32.mrb[11].mxu1  ;;  %v5101_v12 = vadd.f32 %v1509_v52, %v5791_v34 }
 0x60d   :  { %v5086_v22 = vadd.f32 %v1440_v48, %v5779_v11  ;;  %v5102_v2 = vadd.f32 %v1511_v36, %v5784_v19 }
 0x60e   :  { %v1518_v51 = vmul.f32 0.5, %v5085_v47  ;;  %v1520_v9 = vmul.f32 0.5, %v5101_v12  ;;  %v1911_v12 = vld [vmem:[#allocation8 + $0x48] sm:$0xff] }
 0x60f   :  { %v1519_v55 = vmul.f32 0.5, %v5086_v22 }
 0x610   :  { %5263 = vtanh.f32 %v1518_v51 }
 0x611   :  { %5265 = vtanh.f32 %v1519_v55  ;;  %v1904_v55 = vld [vmem:[#allocation8 + $0x10] sm:$0xff] }
 0x612   :  { %5267 = vtanh.f32 %v5102_v2  ;;  %v1908_v2 = vld [vmem:[#allocation8 + $0x30] sm:$0xff] }
 0x613   :  { %5269 = vtanh.f32 %v1520_v9  ;;  %v1915_v9 = vld [vmem:[#allocation8 + $0x68] sm:$0xff] }
 0x61a   :  { %v5264_v50 = vpop.eup %5263 }
 0x61b   :  { %v1524_v13 = vmul.f32 0.5, %v5264_v50  ;;  %v5266_v39 = vpop.eup %5265  ;;  %v1913_v50 = vld [vmem:[#allocation8 + $0x58] sm:$0xff] }
 0x61c   :  { %v1525_v33 = vmul.f32 0.5, %v5266_v39  ;;  %v5268_v28 = vpop.eup %5267 }
 0x61d   :  { %v1527_v31 = vadd.f32 0.5, %v1524_v13  ;;  %v5270_v48 = vpop.eup %5269  ;;  %v1917_v13 = vld [vmem:[#allocation8 + $0x78] sm:$0xff] }
 0x61e   :  { %v1528_v62 = vadd.f32 0.5, %v1525_v33  ;;  %v1526_v36 = vmul.f32 0.5, %v5270_v48  ;;  %v4511_v48 = vpack.c.bf16 %v1917_v13, %v1913_v50  ;;  %v1940_v50 = vld [vmem:[#allocation8 + $0x130] sm:$0xff]  ;;  %v1943_v13 = vld [vmem:[#allocation8 + $0x148] sm:$0xff] }
 0x61f   :  { %v1532_v18 = vmul.f32 %v5268_v28, %v1527_v31  ;;  %v4509_v28 = vpack.c.bf16 %v1908_v2, %v1904_v55  ;;  %v1938_v55 = vld [vmem:[#allocation8 + $0x120] sm:$0xff] }
 0x620   :  { %v1531_v23 = vmul.f32 %v1528_v62, %v5978_v32  ;;  %v1529_v22 = vadd.f32 0.5, %v1526_v36  ;;  %v1906_v32 = vld [vmem:[#allocation8 + $0x20] sm:$0xff]  ;;  %v1912_v36 = vld [vmem:[#allocation8 + $0x50] sm:$0xff] }
 0x621   :  { %v1910_v62 = vld [vmem:[#allocation8 + $0x40] sm:$0xff] }
 0x622   :  { %v6024_v47 = vadd.f32 %v1532_v18, %v1531_v23  ;;  %v1914_v18 = vld [vmem:[#allocation8 + $0x60] sm:$0xff] }
 0x624   :  { %5271 = vtanh.f32 %v6024_v47 }
 0x62e   :  { %v5272_v52 = vpop.eup %5271 }
 0x62f   :  { %v6027_v51 = vmul.f32 %v5272_v52, %v1529_v22  ;;  %v1916_v22 = vld [vmem:[#allocation8 + $0x70] sm:$0xff]  ;;  %v1919_v52 = vld [vmem:[#allocation8 + $0x88] sm:$0xff] }
 0x631   :  { %1614 = vmatmul.mubr.f32.vlgmr.msra.gmra.mrb[12].mxu0 %v6027_v51  ;;  %1685 = vmatmul.mubr.f32.vlgmr.msra.gmra.mrb[12].mxu1 %v6027_v51 }
 0x632   :  { %4414 = vmatpush1.bf16.msra.mxu0 %v5580_v14  ;;  %4446 = vmatpush1.bf16.msra.mxu1 %v5584_v17  ;;  %v1903_v14 = vld [vmem:[#allocation8 + $0x8] sm:$0xff] }
 0x633   :  { %4416 = vmatprep.subr.bf16.mxu0 %v5593_v25  ;;  %4448 = vmatprep.subr.bf16.mxu1 %v5595_v26  ;;  %v1907_v17 = vld [vmem:[#allocation8 + $0x28] sm:$0xff]  ;;  %v1905_v25 = vld [vmem:[#allocation8 + $0x18] sm:$0xff] }
 0x634   :  { %1790 = vmatprep.mubr.f32.mxu0 %v5448_v0  ;;  %1861 = vmatprep.mubr.f32.mxu1 %v5448_v0  ;;  %v4475_v26 = vpack.c.bf16 %v1907_v17, %v1903_v14  ;;  %v1923_v14 = vld [vmem:[#allocation8 + $0xa8] sm:$0xff]  ;;  %v1921_v17 = vld [vmem:[#allocation8 + $0x98] sm:$0xff] }
 0x636   :  { %4418 = vmatpush1.bf16.msra.mxu0 %v5599_v29  ;;  %4450 = vmatpush1.bf16.msra.mxu1 %v5601_v30  ;;  %v1909_v29 = vld [vmem:[#allocation8 + $0x38] sm:$0xff] }
 0x637   :  { %4420 = vmatprep.subr.bf16.mxu0 %v5612_v40  ;;  %4452 = vmatprep.subr.bf16.mxu1 %v5614_v41  ;;  %v4507_v30 = vpack.c.bf16 %v1909_v29, %v1905_v25  ;;  %v1925_v25 = vld [vmem:[#allocation8 + $0xb8] sm:$0xff]  ;;  %v4513_v29 = vpack.c.bf16 %v1916_v22, %v1912_v36  ;;  %v1944_v22 = vld [vmem:[#allocation8 + $0x150] sm:$0xff] }
 0x63a   :  { %4422 = vmatpush1.bf16.msra.mxu0 %v5618_v44  ;;  %4454 = vmatpush1.bf16.msra.mxu1 %v5620_v45 }
 0x63b   :  { %4424 = vmatprep.subr.bf16.mxu0 %v5631_v53  ;;  %4456 = vmatprep.subr.bf16.mxu1 %v5633_v54 }
 0x63e   :  { %4426 = vmatpush1.bf16.msra.mxu0 %v5637_v57  ;;  %4458 = vmatpush1.bf16.msra.mxu1 %v5639_v58 }
 0x63f   :  { %4428 = vmatprep.subr.bf16.mxu0 %v5650_v3  ;;  %4460 = vmatprep.subr.bf16.mxu1 %v5652_v4 }
 0x642   :  { %4430 = vmatpush1.bf16.msra.mxu0 %v5656_v7  ;;  %4462 = vmatpush1.bf16.msra.mxu1 %v5658_v8 }
 0x643   :  { %4432 = vmatprep.subr.bf16.mxu0 %v5669_v20  ;;  %4464 = vmatprep.subr.bf16.mxu1 %v5671_v21 }
 0x646   :  { %4434 = vmatpush1.bf16.msra.mxu0 %v5675_v24  ;;  %4466 = vmatpush1.bf16.msra.mxu1 %v5677_v27 }
 0x647   :  { %4436 = vmatprep.subr.bf16.mxu0 %v5688_v37  ;;  %4468 = vmatprep.subr.bf16.mxu1 %v5690_v38 }
 0x64a   :  { %4438 = vmatpush1.bf16.msra.mxu0 %v5694_v43  ;;  %4470 = vmatpush1.bf16.msra.mxu1 %v5696_v46 }
 0x64b   :  { %4440 = vmatprep.subr.bf16.mxu0 %v5707_v56  ;;  %4472 = vmatprep.subr.bf16.mxu1 %v5709_v59 }
 0x64e   :  { %4442 = vmatpush1.bf16.msra.mxu0 %v5713_v60  ;;  %4474 = vmatpush1.bf16.msra.mxu1 %v5715_v61  ;;  %v1902_v61 = vld [vmem:[#allocation8] sm:$0xff] }
 0x64f   :  { %4476 = vmatprep.subr.bf16.mxu0 %v4475_v26  ;;  %4508 = vmatprep.subr.bf16.mxu1 %v4507_v30  ;;  %v4477_v33 = vpack.c.bf16 %v1906_v32, %v1902_v61  ;;  %v4481_v26 = vpack.c.bf16 %v1914_v18, %v1910_v62  ;;  %v1918_v30 = vld [vmem:[#allocation8 + $0x80] sm:$0xff] }
 0x650   :  { %v1934_v32 = vld [vmem:[#allocation8 + $0x100] sm:$0xff] }
 0x651   :  { %v1942_v18 = vld [vmem:[#allocation8 + $0x140] sm:$0xff] }
 0x704   :  { %v1615_v40 = vpop.f32.mrb[12].mxu0  ;;  %v1686_v41 = vpop.f32.mrb[12].mxu1 }
 0x705   :  { %v5087_v44 = vadd.f32 %v1615_v40, %v5774_v6  ;;  %v1617_v45 = vpop.f32.mrb[13].mxu0  ;;  %v1688_v53 = vpop.f32.mrb[13].mxu1  ;;  %v5103_v4 = vadd.f32 %v1686_v41, %v5791_v34  ;;  %v1922_v40 = vld [vmem:[#allocation8 + $0xa0] sm:$0xff]  ;;  %v4483_v41 = vpack.c.bf16 %v1923_v14, %v1919_v52  ;;  %v1948_v52 = vld [vmem:[#allocation8 + $0x170] sm:$0xff]  ;;  %v1951_v14 = vld [vmem:[#allocation8 + $0x188] sm:$0xff] }
 0x706   :  { %v5088_v54 = vadd.f32 %v1617_v45, %v5779_v11  ;;  %v5104_v3 = vadd.f32 %v1688_v53, %v5784_v19  ;;  %v1920_v45 = vld [vmem:[#allocation8 + $0x90] sm:$0xff] }
 0x707   :  { %v1695_v57 = vmul.f32 0.5, %v5087_v44  ;;  %v1697_v7 = vmul.f32 0.5, %v5103_v4  ;;  %v4515_v44 = vpack.c.bf16 %v1925_v25, %v1921_v17  ;;  %v1924_v53 = vld [vmem:[#allocation8 + $0xb0] sm:$0xff]  ;;  %v4485_v4 = vpack.c.bf16 %v1922_v40, %v1918_v30  ;;  %v1955_v17 = vld [vmem:[#allocation8 + $0x1a8] sm:$0xff]  ;;  %v1953_v25 = vld [vmem:[#allocation8 + $0x198] sm:$0xff] }
 0x708   :  { %v1696_v58 = vmul.f32 0.5, %v5088_v54  ;;  %v1927_v54 = vld [vmem:[#allocation8 + $0xc8] sm:$0xff]  ;;  %v4529_v30 = vpack.c.bf16 %v1948_v52, %v1944_v22  ;;  %v1950_v40 = vld [vmem:[#allocation8 + $0x180] sm:$0xff]  ;;  %v2265_v22 = vld [vmem:[#allocation10 + $0x98] sm:$0xff] }
 0x709   :  { %5273 = vtanh.f32 %v1695_v57  ;;  %v1931_v57 = vld [vmem:[#allocation8 + $0xe8] sm:$0xff] }
 0x70a   :  { %5275 = vtanh.f32 %v1696_v58  ;;  %v1929_v58 = vld [vmem:[#allocation8 + $0xd8] sm:$0xff] }
 0x70b   :  { %5277 = vtanh.f32 %v5104_v3  ;;  %v1933_v3 = vld [vmem:[#allocation8 + $0xf8] sm:$0xff] }
 0x70c   :  { %5279 = vtanh.f32 %v1697_v7  ;;  %v4517_v7 = vpack.c.bf16 %v1924_v53, %v1920_v45  ;;  %v1952_v53 = vld [vmem:[#allocation8 + $0x190] sm:$0xff] }
 0x713   :  { %v5274_v8 = vpop.eup %5273 }
 0x714   :  { %v1701_v20 = vmul.f32 0.5, %v5274_v8  ;;  %v5276_v21 = vpop.eup %5275  ;;  %v1926_v8 = vld [vmem:[#allocation8 + $0xc0] sm:$0xff] }
 0x715   :  { %v1702_v27 = vmul.f32 0.5, %v5276_v21  ;;  %v5278_v37 = vpop.eup %5277  ;;  %v4487_v21 = vpack.c.bf16 %v1931_v57, %v1927_v54  ;;  %v1956_v54 = vld [vmem:[#allocation8 + $0x1b0] sm:$0xff]  ;;  %v1959_v57 = vld [vmem:[#allocation8 + $0x1c8] sm:$0xff] }
 0x716   :  { %v1704_v24 = vadd.f32 0.5, %v1701_v20  ;;  %v5280_v59 = vpop.eup %5279  ;;  %v1930_v20 = vld [vmem:[#allocation8 + $0xe0] sm:$0xff] }
 0x717   :  { %v1705_v38 = vadd.f32 0.5, %v1702_v27  ;;  %v1703_v60 = vmul.f32 0.5, %v5280_v59  ;;  %v1928_v27 = vld [vmem:[#allocation8 + $0xd0] sm:$0xff]  ;;  %v1941_v59 = vld [vmem:[#allocation8 + $0x138] sm:$0xff] }
 0x718   :  { %v1709_v43 = vmul.f32 %v5278_v37, %v1704_v24  ;;  %v4519_v24 = vpack.c.bf16 %v1933_v3, %v1929_v58  ;;  %v1932_v37 = vld [vmem:[#allocation8 + $0xf0] sm:$0xff]  ;;  %v1963_v58 = vld [vmem:[#allocation8 + $0x1e8] sm:$0xff]  ;;  %v1961_v3 = vld [vmem:[#allocation8 + $0x1d8] sm:$0xff] }
 0x719   :  { %v1708_v46 = vmul.f32 %v1705_v38, %v6024_v47  ;;  %v1706_v39 = vadd.f32 0.5, %v1703_v60  ;;  %v4479_v47 = vpack.c.bf16 %v1915_v9, %v1911_v12  ;;  %v1935_v38 = vld [vmem:[#allocation8 + $0x108] sm:$0xff]  ;;  %v4489_v60 = vpack.c.bf16 %v1930_v20, %v1926_v8  ;;  %v1936_v9 = vld [vmem:[#allocation8 + $0x110] sm:$0xff]  ;;  %v1958_v20 = vld [vmem:[#allocation8 + $0x1c0] sm:$0xff] }
 0x71a   :  { %v4521_v61 = vpack.c.bf16 %v1932_v37, %v1928_v27  ;;  %v4525_v62 = vpack.c.bf16 %v1940_v50, %v1936_v9  ;;  %v4533_v8 = vpack.c.bf16 %v1956_v54, %v1952_v53  ;;  %v1962_v27 = vld [vmem:[#allocation8 + $0x1e0] sm:$0xff]  ;;  %v1960_v37 = vld [vmem:[#allocation8 + $0x1d0] sm:$0xff]  ;;  %v2257_v9 = vld [vmem:[#allocation10 + $0x58] sm:$0xff] }
 0x71b   :  { %v6068_v56 = vadd.f32 %v1709_v43, %v1708_v46  ;;  %v1939_v43 = vld [vmem:[#allocation8 + $0x128] sm:$0xff]  ;;  %v1937_v46 = vld [vmem:[#allocation8 + $0x118] sm:$0xff] }
 0x71c   :  { %v4491_v2 = vpack.c.bf16 %v1939_v43, %v1935_v38  ;;  %v4523_v12 = vpack.c.bf16 %v1941_v59, %v1937_v46  ;;  %v1964_v38 = vld [vmem:[#allocation8 + $0x1f0] sm:$0xff]  ;;  %v4505_v43 = vpack.c.bf16 %v1962_v27, %v1958_v20  ;;  %v2246_v59 = vld [vmem:[#allocation10] sm:$0xff]  ;;  %v2273_v53 = vld [vmem:[#allocation10 + $0xd8] sm:$0xff] }
 0x71d   :  { %5281 = vtanh.f32 %v6068_v56  ;;  %v4537_v46 = vpack.c.bf16 %v1964_v38, %v1960_v37  ;;  %v2276_v20 = vld [vmem:[#allocation10 + $0xf0] sm:$0xff]  ;;  %v2283_v27 = vld [vmem:[#allocation10 + $0x128] sm:$0xff]  ;;  %v2281_v37 = vld [vmem:[#allocation10 + $0x118] sm:$0xff] }
 0x727   :  { %v5282_v31 = vpop.eup %5281 }
 0x728   :  { %v6071_v23 = vmul.f32 %v5282_v31, %v1706_v39  ;;  %v1947_v39 = vld [vmem:[#allocation8 + $0x168] sm:$0xff]  ;;  %v1945_v31 = vld [vmem:[#allocation8 + $0x158] sm:$0xff] }
 0x72a   :  { %1791 = vmatmul.mubr.f32.vlgmr.msra.gmra.mrb[14].mxu0 %v6071_v23  ;;  %1862 = vmatmul.mubr.f32.vlgmr.msra.gmra.mrb[14].mxu1 %v6071_v23 }
 0x72b   :  { %4478 = vmatpush1.bf16.msra.mxu0 %v4477_v33  ;;  %4510 = vmatpush1.bf16.msra.mxu1 %v4509_v28  ;;  %v1949_v33 = vld [vmem:[#allocation8 + $0x178] sm:$0xff]  ;;  %v4493_v28 = vpack.c.bf16 %v1938_v55, %v1934_v32  ;;  %v2248_v32 = vld [vmem:[#allocation10 + $0x10] sm:$0xff] }
 0x72c   :  { %4480 = vmatprep.subr.bf16.mxu0 %v4479_v47  ;;  %4512 = vmatprep.subr.bf16.mxu1 %v4511_v48  ;;  %v1946_v47 = vld [vmem:[#allocation8 + $0x160] sm:$0xff]  ;;  %v4495_v48 = vpack.c.bf16 %v1947_v39, %v1943_v13  ;;  %v4527_v36 = vpack.c.bf16 %v1949_v33, %v1945_v31  ;;  %v2252_v55 = vld [vmem:[#allocation10 + $0x30] sm:$0xff]  ;;  %v2261_v13 = vld [vmem:[#allocation10 + $0x78] sm:$0xff] }
 0x72d   :  { %2052 = vmatprep.mubr.f32.mxu0 %v5448_v0  ;;  %2165 = vmatprep.mubr.f32.mxu1 %v5448_v0  ;;  %v2254_v39 = vld [vmem:[#allocation10 + $0x40] sm:$0xff]  ;;  %v6119_v33 = vpack.c.bf16 %v2261_v13, %v2257_v9 }
 0x72e   :  { %v2258_v31 = vld [vmem:[#allocation10 + $0x60] sm:$0xff] }
 0x72f   :  { %4482 = vmatpush1.bf16.msra.mxu0 %v4481_v26  ;;  %4514 = vmatpush1.bf16.msra.mxu1 %v4513_v29  ;;  %v1957_v26 = vld [vmem:[#allocation8 + $0x1b8] sm:$0xff]  ;;  %v4497_v29 = vpack.c.bf16 %v1946_v47, %v1942_v18  ;;  %v2260_v18 = vld [vmem:[#allocation10 + $0x70] sm:$0xff] }
 0x730   :  { %4484 = vmatprep.subr.bf16.mxu0 %v4483_v41  ;;  %4516 = vmatprep.subr.bf16.mxu1 %v4515_v44  ;;  %v1954_v41 = vld [vmem:[#allocation8 + $0x1a0] sm:$0xff]  ;;  %v4499_v44 = vpack.c.bf16 %v1955_v17, %v1951_v14  ;;  %v4531_v45 = vpack.c.bf16 %v1957_v26, %v1953_v25  ;;  %v2269_v14 = vld [vmem:[#allocation10 + $0xb8] sm:$0xff] }
 0x731   :  { %v2262_v17 = vld [vmem:[#allocation10 + $0x80] sm:$0xff]  ;;  %v6131_v26 = vpack.c.bf16 %v2269_v14, %v2265_v22  ;;  %v2299_v22 = vld [vmem:[#allocation10 + $0x1a8] sm:$0xff] }
 0x732   :  { %v2266_v25 = vld [vmem:[#allocation10 + $0xa0] sm:$0xff] }
 0x733   :  { %4486 = vmatpush1.bf16.msra.mxu0 %v4485_v4  ;;  %4518 = vmatpush1.bf16.msra.mxu1 %v4517_v7  ;;  %v1965_v4 = vld [vmem:[#allocation8 + $0x1f8] sm:$0xff]  ;;  %v4501_v7 = vpack.c.bf16 %v1954_v41, %v1950_v40  ;;  %v2268_v40 = vld [vmem:[#allocation10 + $0xb0] sm:$0xff] }
 0x734   :  { %4488 = vmatprep.subr.bf16.mxu0 %v4487_v21  ;;  %4520 = vmatprep.subr.bf16.mxu1 %v4519_v24  ;;  %v4503_v21 = vpack.c.bf16 %v1963_v58, %v1959_v57  ;;  %v4535_v24 = vpack.c.bf16 %v1965_v4, %v1961_v3  ;;  %v2277_v57 = vld [vmem:[#allocation10 + $0xf8] sm:$0xff]  ;;  %v2270_v58 = vld [vmem:[#allocation10 + $0xc0] sm:$0xff] }
 0x735   :  { %v2274_v3 = vld [vmem:[#allocation10 + $0xe0] sm:$0xff]  ;;  %v6143_v4 = vpack.c.bf16 %v2277_v57, %v2273_v53  ;;  %v2296_v53 = vld [vmem:[#allocation10 + $0x190] sm:$0xff] }
 0x736   :  { %v2300_v57 = vld [vmem:[#allocation10 + $0x1b0] sm:$0xff] }
 0x737   :  { %4490 = vmatpush1.bf16.msra.mxu0 %v4489_v60  ;;  %4522 = vmatpush1.bf16.msra.mxu1 %v4521_v61 }
 0x738   :  { %4492 = vmatprep.subr.bf16.mxu0 %v4491_v2  ;;  %4524 = vmatprep.subr.bf16.mxu1 %v4523_v12  ;;  %v2255_v2 = vld [vmem:[#allocation10 + $0x48] sm:$0xff] }
 0x739   :  { %v2259_v12 = vld [vmem:[#allocation10 + $0x68] sm:$0xff] }
 0x73a   :  { %v6117_v50 = vpack.c.bf16 %v2259_v12, %v2255_v2  ;;  %v2289_v2 = vld [vmem:[#allocation10 + $0x158] sm:$0xff] }
 0x73b   :  { %4494 = vmatpush1.bf16.msra.mxu0 %v4493_v28  ;;  %4526 = vmatpush1.bf16.msra.mxu1 %v4525_v62  ;;  %v6121_v28 = vpack.c.bf16 %v2258_v31, %v2254_v39  ;;  %v2256_v62 = vld [vmem:[#allocation10 + $0x50] sm:$0xff]  ;;  %v2293_v12 = vld [vmem:[#allocation10 + $0x178] sm:$0xff]  ;;  %v2286_v39 = vld [vmem:[#allocation10 + $0x140] sm:$0xff] }
 0x73c   :  { %4496 = vmatprep.subr.bf16.mxu0 %v4495_v48  ;;  %4528 = vmatprep.subr.bf16.mxu1 %v4527_v36  ;;  %v6124_v47 = vpack.c.bf16 %v2260_v18, %v2256_v62  ;;  %v2263_v48 = vld [vmem:[#allocation10 + $0x88] sm:$0xff]  ;;  %v6166_v13 = vpack.c.bf16 %v2293_v12, %v2289_v2  ;;  %v2290_v31 = vld [vmem:[#allocation10 + $0x160] sm:$0xff]  ;;  %v2288_v62 = vld [vmem:[#allocation10 + $0x150] sm:$0xff] }
 0x73d   :  { %v2267_v36 = vld [vmem:[#allocation10 + $0xa8] sm:$0xff]  ;;  %v6169_v18 = vpack.c.bf16 %v2290_v31, %v2286_v39 }
 0x73e   :  { %v6129_v52 = vpack.c.bf16 %v2267_v36, %v2263_v48  ;;  %v2292_v48 = vld [vmem:[#allocation10 + $0x170] sm:$0xff]  ;;  %v2295_v36 = vld [vmem:[#allocation10 + $0x188] sm:$0xff] }
 0x73f   :  { %4498 = vmatpush1.bf16.msra.mxu0 %v4497_v29  ;;  %4530 = vmatpush1.bf16.msra.mxu1 %v4529_v30  ;;  %v6133_v29 = vpack.c.bf16 %v2266_v25, %v2262_v17  ;;  %v2264_v30 = vld [vmem:[#allocation10 + $0x90] sm:$0xff]  ;;  %v6173_v14 = vpack.c.bf16 %v2292_v48, %v2288_v62  ;;  %v6175_v17 = vpack.c.bf16 %v2299_v22, %v2295_v36  ;;  %v2297_v25 = vld [vmem:[#allocation10 + $0x198] sm:$0xff] }
 0x740   :  { %4500 = vmatprep.subr.bf16.mxu0 %v4499_v44  ;;  %4532 = vmatprep.subr.bf16.mxu1 %v4531_v45  ;;  %v6136_v41 = vpack.c.bf16 %v2268_v40, %v2264_v30  ;;  %v2271_v44 = vld [vmem:[#allocation10 + $0xc8] sm:$0xff]  ;;  %v2301_v30 = vld [vmem:[#allocation10 + $0x1b8] sm:$0xff]  ;;  %v2294_v40 = vld [vmem:[#allocation10 + $0x180] sm:$0xff] }
 0x741   :  { %v2275_v45 = vld [vmem:[#allocation10 + $0xe8] sm:$0xff] }
 0x742   :  { %v6141_v54 = vpack.c.bf16 %v2275_v45, %v2271_v44  ;;  %v6177_v44 = vpack.c.bf16 %v2301_v30, %v2297_v25  ;;  %v2298_v45 = vld [vmem:[#allocation10 + $0x1a0] sm:$0xff] }
 0x743   :  { %4502 = vmatpush1.bf16.msra.mxu0 %v4501_v7  ;;  %4534 = vmatpush1.bf16.msra.mxu1 %v4533_v8  ;;  %v6145_v7 = vpack.c.bf16 %v2274_v3, %v2270_v58  ;;  %v2272_v8 = vld [vmem:[#allocation10 + $0xd0] sm:$0xff]  ;;  %v6180_v58 = vpack.c.bf16 %v2298_v45, %v2294_v40  ;;  %v6184_v3 = vpack.c.bf16 %v2300_v57, %v2296_v53 }
 0x744   :  { %4504 = vmatprep.subr.bf16.mxu0 %v4503_v21  ;;  %4536 = vmatprep.subr.bf16.mxu1 %v4535_v24  ;;  %v6148_v21 = vpack.c.bf16 %v2276_v20, %v2272_v8  ;;  %v2279_v24 = vld [vmem:[#allocation10 + $0x108] sm:$0xff] }
 0x745   :  { %v6153_v38 = vpack.c.bf16 %v2283_v27, %v2279_v24  ;;  %v2303_v8 = vld [vmem:[#allocation10 + $0x1c8] sm:$0xff]  ;;  %v2305_v24 = vld [vmem:[#allocation10 + $0x1d8] sm:$0xff] }
 0x746   :  { %v2307_v20 = vld [vmem:[#allocation10 + $0x1e8] sm:$0xff] }
 0x747   :  { %4506 = vmatpush1.bf16.msra.mxu0 %v4505_v43  ;;  %4538 = vmatpush1.bf16.msra.mxu1 %v4537_v46  ;;  %v2285_v43 = vld [vmem:[#allocation10 + $0x138] sm:$0xff]  ;;  %v2278_v46 = vld [vmem:[#allocation10 + $0x100] sm:$0xff]  ;;  %v6189_v27 = vpack.c.bf16 %v2307_v20, %v2303_v8 }
 0x74a   :  { %2053 = vmatmul.mubr.f32.vlgmr.msra.gmra.mrb[16].mxu0 %v5797_v15  ;;  %2166 = vmatmul.mubr.f32.vlgmr.msra.gmra.mrb[16].mxu1 %v5797_v15  ;;  %v2247_v15 = vld [vmem:[#allocation10 + $0x8] sm:$0xff] }
 0x74b   :  { %2058 = vmatprep.mubr.f32.mxu0 %v5448_v0  ;;  %2171 = vmatprep.mubr.f32.mxu1 %v5448_v0 }
 0x74e   :  { %2059 = vmatmul.mubr.f32.gmra.mrb[18].mxu0 %v5843_v35  ;;  %2172 = vmatmul.mubr.f32.gmra.mrb[18].mxu1 %v5843_v35  ;;  %v2251_v35 = vld [vmem:[#allocation10 + $0x28] sm:$0xff] }
 0x74f   :  { %2064 = vmatprep.mubr.f32.mxu0 %v5448_v0  ;;  %2177 = vmatprep.mubr.f32.mxu1 %v5448_v0 }
 0x752   :  { %2065 = vmatmul.mubr.f32.gmra.mrb[20].mxu0 %v5889_v49  ;;  %2178 = vmatmul.mubr.f32.gmra.mrb[20].mxu1 %v5889_v49  ;;  %v2249_v49 = vld [vmem:[#allocation10 + $0x18] sm:$0xff] }
 0x753   :  { %2070 = vmatprep.mubr.f32.mxu0 %v5448_v0  ;;  %2183 = vmatprep.mubr.f32.mxu1 %v5448_v0 }
 0x756   :  { %2071 = vmatmul.mubr.f32.gmra.mrb[22].mxu0 %v5935_v16  ;;  %2184 = vmatmul.mubr.f32.gmra.mrb[22].mxu1 %v5935_v16  ;;  %v6105_v16 = vpack.c.bf16 %v2251_v35, %v2247_v15  ;;  %v2282_v15 = vld [vmem:[#allocation10 + $0x120] sm:$0xff]  ;;  %v6155_v35 = vpack.c.bf16 %v2285_v43, %v2281_v37  ;;  %v2309_v37 = vld [vmem:[#allocation10 + $0x1f8] sm:$0xff] }
 0x757   :  { %2076 = vmatprep.mubr.f32.mxu0 %v5448_v0  ;;  %2189 = vmatprep.mubr.f32.mxu1 %v5448_v0  ;;  %v2302_v43 = vld [vmem:[#allocation10 + $0x1c0] sm:$0xff] }
 0x758   :  { %4540 = vmatprep.subr.bf16.mxu0 %v6105_v16 }
 0x75a   :  { %2077 = vmatmul.mubr.f32.gmra.mrb[24].mxu0 %v5981_v42  ;;  %2190 = vmatmul.mubr.f32.gmra.mrb[24].mxu1 %v5981_v42  ;;  %v2253_v42 = vld [vmem:[#allocation10 + $0x38] sm:$0xff] }
 0x75b   :  { %2082 = vmatprep.mubr.f32.mxu0 %v5448_v0  ;;  %2195 = vmatprep.mubr.f32.mxu1 %v5448_v0  ;;  %v6107_v60 = vpack.c.bf16 %v2253_v42, %v2249_v49  ;;  %v6157_v49 = vpack.c.bf16 %v2282_v15, %v2278_v46  ;;  %v2280_v42 = vld [vmem:[#allocation10 + $0x110] sm:$0xff]  ;;  %v2306_v46 = vld [vmem:[#allocation10 + $0x1e0] sm:$0xff]  ;;  %v6191_v15 = vpack.c.bf16 %v2309_v37, %v2305_v24 }
 0x75d   :  { %4572 = vmatprep.subr.bf16.mxu1 %v6107_v60 }
 0x75e   :  { %2083 = vmatmul.mubr.f32.gmra.mrb[26].mxu0 %v6027_v51  ;;  %2196 = vmatmul.mubr.f32.gmra.mrb[26].mxu1 %v6027_v51  ;;  %v2250_v51 = vld [vmem:[#allocation10 + $0x20] sm:$0xff] }
 0x75f   :  { %2088 = vmatprep.mubr.f32.mxu0 %v5448_v0  ;;  %2201 = vmatprep.mubr.f32.mxu1 %v5448_v0  ;;  %v6109_v61 = vpack.c.bf16 %v2250_v51, %v2246_v59  ;;  %v2284_v59 = vld [vmem:[#allocation10 + $0x130] sm:$0xff]  ;;  %v2287_v51 = vld [vmem:[#allocation10 + $0x148] sm:$0xff] }
 0x761   :  { %4542 = vmatpush1.bf16.msra.mxu0 %v6109_v61 }
 0x762   :  { %2089 = vmatmul.mubr.f32.gmra.mrb[28].mxu0 %v6071_v23  ;;  %2202 = vmatmul.mubr.f32.gmra.mrb[28].mxu1 %v6071_v23  ;;  %v6112_v23 = vpack.c.bf16 %v2252_v55, %v2248_v32  ;;  %v6160_v32 = vpack.c.bf16 %v2284_v59, %v2280_v42  ;;  %v2291_v55 = vld [vmem:[#allocation10 + $0x168] sm:$0xff]  ;;  %v6193_v42 = vpack.c.bf16 %v2306_v46, %v2302_v43  ;;  %v2304_v59 = vld [vmem:[#allocation10 + $0x1d0] sm:$0xff] }
 0x763   :  { %2094 = vmatprep.mubr.f32.mxu0 %v5448_v0  ;;  %2207 = vmatprep.mubr.f32.mxu1 %v5448_v0  ;;  %v6164_v9 = vpack.c.bf16 %v2291_v55, %v2287_v51  ;;  %v2308_v51 = vld [vmem:[#allocation10 + $0x1f0] sm:$0xff] }
 0x764   :  { %4574 = vmatpush1.bf16.msra.mxu1 %v6112_v23  ;;  %4544 = vmatprep.subr.bf16.mxu0 %v6117_v50  ;;  %v6196_v55 = vpack.c.bf16 %v2308_v51, %v2304_v59 }
 0x765   :  { %4576 = vmatprep.subr.bf16.mxu1 %v6119_v33  ;;  %4546 = vmatpush1.bf16.msra.mxu0 %v6121_v28 }
 0x766   :  { %4548 = vmatprep.subr.bf16.mxu0 %v6129_v52 }
 0x768   :  { %4578 = vmatpush1.bf16.msra.mxu1 %v6124_v47 }
 0x769   :  { %4580 = vmatprep.subr.bf16.mxu1 %v6131_v26  ;;  %4550 = vmatpush1.bf16.msra.mxu0 %v6133_v29 }
 0x76a   :  { %4552 = vmatprep.subr.bf16.mxu0 %v6141_v54 }
 0x76c   :  { %4582 = vmatpush1.bf16.msra.mxu1 %v6136_v41 }
 0x76d   :  { %4584 = vmatprep.subr.bf16.mxu1 %v6143_v4  ;;  %4554 = vmatpush1.bf16.msra.mxu0 %v6145_v7 }
 0x76e   :  { %4556 = vmatprep.subr.bf16.mxu0 %v6153_v38 }
 0x770   :  { %4586 = vmatpush1.bf16.msra.mxu1 %v6148_v21 }
 0x771   :  { %4588 = vmatprep.subr.bf16.mxu1 %v6155_v35  ;;  %4558 = vmatpush1.bf16.msra.mxu0 %v6157_v49 }
 0x772   :  { %4560 = vmatprep.subr.bf16.mxu0 %v6164_v9 }
 0x774   :  { %4590 = vmatpush1.bf16.msra.mxu1 %v6160_v32 }
 0x775   :  { %4592 = vmatprep.subr.bf16.mxu1 %v6166_v13  ;;  %4562 = vmatpush1.bf16.msra.mxu0 %v6169_v18 }
 0x776   :  { %4564 = vmatprep.subr.bf16.mxu0 %v6175_v17 }
 0x778   :  { %4594 = vmatpush1.bf16.msra.mxu1 %v6173_v14 }
 0x779   :  { %4596 = vmatprep.subr.bf16.mxu1 %v6177_v44  ;;  %4566 = vmatpush1.bf16.msra.mxu0 %v6180_v58 }
 0x77a   :  { %4568 = vmatprep.subr.bf16.mxu0 %v6189_v27 }
 0x77c   :  { %4598 = vmatpush1.bf16.msra.mxu1 %v6184_v3 }
 0x77d   :  { %4600 = vmatprep.subr.bf16.mxu1 %v6191_v15  ;;  %4570 = vmatpush1.bf16.msra.mxu0 %v6193_v42 }
 0x77e   :  { %4604 = vmatprep.subr.bf16.mxu0 %v6105_v16 }
 0x780   :  { %4602 = vmatpush1.bf16.msra.mxu1 %v6196_v55 }
 0x781   :  { %4636 = vmatprep.subr.bf16.mxu1 %v6107_v60 }
 0x7fd   :  { %v1792_v2 = vpop.f32.mrb[14].mxu0  ;;  %v1863_v12 = vpop.f32.mrb[14].mxu1 }
 0x7fe   :  { %v5089_v39 = vadd.f32 %v1792_v2, %v5774_v6  ;;  %v1794_v31 = vpop.f32.mrb[15].mxu0  ;;  %v1865_v62 = vpop.f32.mrb[15].mxu1  ;;  %v5105_v30 = vadd.f32 %v1863_v12, %v5791_v34  ;;  %v1966_v34 = vld [vmem:[%s6597_s7] sm:$0xf] }
 0x7ff   :  { %v5090_v48 = vadd.f32 %v1794_v31, %v5779_v11  ;;  %v5106_v25 = vadd.f32 %v1865_v62, %v5784_v19  ;;  %v6255_v12 = vrot.slane %v1966_v34, %v105_v5  ;;  %v6603_v5 = vsub.s32 2, %v5765_v63 }
 0x800   :  { %v1872_v36 = vmul.f32 0.5, %v5089_v39  ;;  %v1874_v40 = vmul.f32 0.5, %v5105_v30 }
 0x801   :  { %v1873_v22 = vmul.f32 0.5, %v5090_v48 }
 0x802   :  { %5283 = vtanh.f32 %v1872_v36  ;;  %v6260_v36 = vrot.slane %v1966_v34, %v113_v10 }
 0x803   :  { %5285 = vtanh.f32 %v1873_v22 }
 0x804   :  { %5287 = vtanh.f32 %v5106_v25 }
 0x805   :  { %5289 = vtanh.f32 %v1874_v40 }
 0x80c   :  { %v5284_v45 = vpop.eup %5283 }
 0x80d   :  { %v1878_v53 = vmul.f32 0.5, %v5284_v45  ;;  %v5286_v57 = vpop.eup %5285  ;;  %v6266_v45 = vrot.slane %v1966_v34, %v6603_v5 }
 0x80e   :  { %v1879_v6 = vmul.f32 0.5, %v5286_v57  ;;  %v5288_v20 = vpop.eup %5287 }
 0x80f   :  { %v1881_v8 = vadd.f32 0.5, %v1878_v53  ;;  %v5290_v46 = vpop.eup %5289 }
 0x810   :  { %v1882_v24 = vadd.f32 0.5, %v1879_v6  ;;  %v1880_v19 = vmul.f32 0.5, %v5290_v46 }
 0x811   :  { %v1886_v37 = vmul.f32 %v5288_v20, %v1881_v8 }
 0x812   :  { %v1885_v11 = vmul.f32 %v1882_v24, %v6068_v56  ;;  %v1883_v59 = vadd.f32 0.5, %v1880_v19  ;;  %v6251_v56 = vrot.slane %v1966_v34, %v101_v1 }
 0x814   :  { %v1887_v43 = vadd.f32 %v1886_v37, %v1885_v11 }
 0x816   :  { %5291 = vtanh.f32 %v1887_v43 }
 0x820   :  { %v5292_v51 = vpop.eup %5291 }
 0x821   :  { %v1889_v2 = vmul.f32 %v5292_v51, %v1883_v59 }
 0x823   :  { %2095 = vmatmul.mubr.f32.gmra.mrb[30].mxu0 %v1889_v2  ;;  %2208 = vmatmul.mubr.f32.gmra.mrb[30].mxu1 %v1889_v2 }
 0x824   :  { %2382 = vmatprep.mubr.f32.mxu0 %v5448_v0  ;;  %2453 = vmatprep.mubr.f32.mxu1 %v5448_v0 }
 0x827   :  { %2383 = vmatmul.mubr.f32.vlgmr.msra.gmra.mrb[16].mxu0 %v5448_v0  ;;  %2454 = vmatmul.mubr.f32.vlgmr.msra.gmra.mrb[16].mxu1 %v5448_v0 }
 0x828   :  { %4606 = vmatpush1.bf16.msra.mxu0 %v6109_v61  ;;  %4638 = vmatpush1.bf16.msra.mxu1 %v6112_v23 }
 0x829   :  { %4608 = vmatprep.subr.bf16.mxu0 %v6117_v50  ;;  %4640 = vmatprep.subr.bf16.mxu1 %v6119_v33 }
 0x82a   :  { %2554 = vmatprep.mubr.f32.mxu0 %v5448_v0  ;;  %2625 = vmatprep.mubr.f32.mxu1 %v5448_v0 }
 0x82c   :  { %4610 = vmatpush1.bf16.msra.mxu0 %v6121_v28  ;;  %4642 = vmatpush1.bf16.msra.mxu1 %v6124_v47 }
 0x82d   :  { %4612 = vmatprep.subr.bf16.mxu0 %v6129_v52  ;;  %4644 = vmatprep.subr.bf16.mxu1 %v6131_v26 }
 0x830   :  { %4614 = vmatpush1.bf16.msra.mxu0 %v6133_v29  ;;  %4646 = vmatpush1.bf16.msra.mxu1 %v6136_v41 }
 0x831   :  { %4616 = vmatprep.subr.bf16.mxu0 %v6141_v54  ;;  %4648 = vmatprep.subr.bf16.mxu1 %v6143_v4 }
 0x834   :  { %4618 = vmatpush1.bf16.msra.mxu0 %v6145_v7  ;;  %4650 = vmatpush1.bf16.msra.mxu1 %v6148_v21 }
 0x835   :  { %4620 = vmatprep.subr.bf16.mxu0 %v6153_v38  ;;  %4652 = vmatprep.subr.bf16.mxu1 %v6155_v35 }
 0x838   :  { %4622 = vmatpush1.bf16.msra.mxu0 %v6157_v49  ;;  %4654 = vmatpush1.bf16.msra.mxu1 %v6160_v32 }
 0x839   :  { %4624 = vmatprep.subr.bf16.mxu0 %v6164_v9  ;;  %4656 = vmatprep.subr.bf16.mxu1 %v6166_v13 }
 0x83c   :  { %4626 = vmatpush1.bf16.msra.mxu0 %v6169_v18  ;;  %4658 = vmatpush1.bf16.msra.mxu1 %v6173_v14 }
 0x83d   :  { %4628 = vmatprep.subr.bf16.mxu0 %v6175_v17  ;;  %4660 = vmatprep.subr.bf16.mxu1 %v6177_v44 }
 0x840   :  { %4630 = vmatpush1.bf16.msra.mxu0 %v6180_v58  ;;  %4662 = vmatpush1.bf16.msra.mxu1 %v6184_v3 }
 0x841   :  { %4632 = vmatprep.subr.bf16.mxu0 %v6189_v27  ;;  %4664 = vmatprep.subr.bf16.mxu1 %v6191_v15 }
 0x844   :  { %4634 = vmatpush1.bf16.msra.mxu0 %v6193_v42  ;;  %4666 = vmatpush1.bf16.msra.mxu1 %v6196_v55 }
 0x845   :  { %4668 = vmatprep.subr.bf16.mxu0 %v6105_v16  ;;  %4700 = vmatprep.subr.bf16.mxu1 %v6107_v60 }
 0x8fa   :  { %v2384_v39 = vpop.f32.mrb[16].mxu0  ;;  %v2455_v31 = vpop.f32.mrb[16].mxu1 }
 0x8fb   :  { %v5107_v62 = vadd.f32 %v2384_v39, %v6251_v56  ;;  %v2386_v48 = vpop.f32.mrb[17].mxu0  ;;  %v2457_v22 = vpop.f32.mrb[17].mxu1  ;;  %v5123_v53 = vadd.f32 %v2455_v31, %v6266_v45 }
 0x8fc   :  { %v5108_v25 = vadd.f32 %v2386_v48, %v6255_v12  ;;  %v5124_v1 = vadd.f32 %v2457_v22, %v6260_v36 }
 0x8fd   :  { %v2464_v30 = vmul.f32 0.5, %v5107_v62  ;;  %v2466_v57 = vmul.f32 0.5, %v5123_v53 }
 0x8fe   :  { %v2465_v40 = vmul.f32 0.5, %v5108_v25 }
 0x8ff   :  { %5293 = vtanh.f32 %v2464_v30 }
 0x900   :  { %5295 = vtanh.f32 %v2465_v40 }
 0x901   :  { %5297 = vtanh.f32 %v5124_v1 }
 0x902   :  { %5299 = vtanh.f32 %v2466_v57 }
 0x909   :  { %v5294_v8 = vpop.eup %5293 }
 0x90a   :  { %v2470_v10 = vmul.f32 0.5, %v5294_v8  ;;  %v5296_v6 = vpop.eup %5295 }
 0x90b   :  { %v2471_v24 = vmul.f32 0.5, %v5296_v6  ;;  %v5298_v37 = vpop.eup %5297 }
 0x90c   :  { %v2473_v20 = vadd.f32 0.5, %v2470_v10  ;;  %v5300_v63 = vpop.eup %5299 }
 0x90d   :  { %v2474_v11 = vadd.f32 0.5, %v2471_v24  ;;  %v2472_v59 = vmul.f32 0.5, %v5300_v63 }
 0x90e   :  { %v2478_v43 = vmul.f32 %v5298_v37, %v2473_v20 }
 0x90f   :  { %v2477_v46 = vmul.f32 0.0, %v2474_v11  ;;  %v2475_v51 = vadd.f32 0.5, %v2472_v59 }
 0x911   :  { %v6269_v19 = vadd.f32 %v2478_v43, %v2477_v46 }
 0x913   :  { %5301 = vtanh.f32 %v6269_v19 }
 0x91d   :  { %v5302_v2 = vpop.eup %5301 }
 0x91e   :  { %v2481_v34 = vmul.f32 %v5302_v2, %v2475_v51 }
 0x920   :  { %2555 = vmatmul.mubr.f32.vlgmr.msra.gmra.mrb[18].mxu0 %v2481_v34  ;;  %2626 = vmatmul.mubr.f32.vlgmr.msra.gmra.mrb[18].mxu1 %v2481_v34 }
 0x921   :  { %4670 = vmatpush1.bf16.msra.mxu0 %v6109_v61  ;;  %4702 = vmatpush1.bf16.msra.mxu1 %v6112_v23 }
 0x922   :  { %4672 = vmatprep.subr.bf16.mxu0 %v6117_v50  ;;  %4704 = vmatprep.subr.bf16.mxu1 %v6119_v33 }
 0x923   :  { %2726 = vmatprep.mubr.f32.mxu0 %v5448_v0  ;;  %2797 = vmatprep.mubr.f32.mxu1 %v5448_v0 }
 0x925   :  { %4674 = vmatpush1.bf16.msra.mxu0 %v6121_v28  ;;  %4706 = vmatpush1.bf16.msra.mxu1 %v6124_v47 }
 0x926   :  { %4676 = vmatprep.subr.bf16.mxu0 %v6129_v52  ;;  %4708 = vmatprep.subr.bf16.mxu1 %v6131_v26 }
 0x929   :  { %4678 = vmatpush1.bf16.msra.mxu0 %v6133_v29  ;;  %4710 = vmatpush1.bf16.msra.mxu1 %v6136_v41 }
 0x92a   :  { %4680 = vmatprep.subr.bf16.mxu0 %v6141_v54  ;;  %4712 = vmatprep.subr.bf16.mxu1 %v6143_v4 }
 0x92d   :  { %4682 = vmatpush1.bf16.msra.mxu0 %v6145_v7  ;;  %4714 = vmatpush1.bf16.msra.mxu1 %v6148_v21 }
 0x92e   :  { %4684 = vmatprep.subr.bf16.mxu0 %v6153_v38  ;;  %4716 = vmatprep.subr.bf16.mxu1 %v6155_v35 }
 0x931   :  { %4686 = vmatpush1.bf16.msra.mxu0 %v6157_v49  ;;  %4718 = vmatpush1.bf16.msra.mxu1 %v6160_v32 }
 0x932   :  { %4688 = vmatprep.subr.bf16.mxu0 %v6164_v9  ;;  %4720 = vmatprep.subr.bf16.mxu1 %v6166_v13 }
 0x935   :  { %4690 = vmatpush1.bf16.msra.mxu0 %v6169_v18  ;;  %4722 = vmatpush1.bf16.msra.mxu1 %v6173_v14 }
 0x936   :  { %4692 = vmatprep.subr.bf16.mxu0 %v6175_v17  ;;  %4724 = vmatprep.subr.bf16.mxu1 %v6177_v44 }
 0x939   :  { %4694 = vmatpush1.bf16.msra.mxu0 %v6180_v58  ;;  %4726 = vmatpush1.bf16.msra.mxu1 %v6184_v3 }
 0x93a   :  { %4696 = vmatprep.subr.bf16.mxu0 %v6189_v27  ;;  %4728 = vmatprep.subr.bf16.mxu1 %v6191_v15 }
 0x93d   :  { %4698 = vmatpush1.bf16.msra.mxu0 %v6193_v42  ;;  %4730 = vmatpush1.bf16.msra.mxu1 %v6196_v55 }
 0x93e   :  { %4732 = vmatprep.subr.bf16.mxu0 %v6105_v16  ;;  %4764 = vmatprep.subr.bf16.mxu1 %v6107_v60 }
 0x9f3   :  { %v2556_v39 = vpop.f32.mrb[18].mxu0  ;;  %v2627_v31 = vpop.f32.mrb[18].mxu1 }
 0x9f4   :  { %v5109_v62 = vadd.f32 %v2556_v39, %v6251_v56  ;;  %v2558_v48 = vpop.f32.mrb[19].mxu0  ;;  %v2629_v22 = vpop.f32.mrb[19].mxu1  ;;  %v5125_v5 = vadd.f32 %v2627_v31, %v6266_v45 }
 0x9f5   :  { %v5110_v25 = vadd.f32 %v2558_v48, %v6255_v12  ;;  %v5126_v1 = vadd.f32 %v2629_v22, %v6260_v36 }
 0x9f6   :  { %v2636_v30 = vmul.f32 0.5, %v5109_v62  ;;  %v2638_v53 = vmul.f32 0.5, %v5125_v5 }
 0x9f7   :  { %v2637_v40 = vmul.f32 0.5, %v5110_v25 }
 0x9f8   :  { %5303 = vtanh.f32 %v2636_v30 }
 0x9f9   :  { %5305 = vtanh.f32 %v2637_v40 }
 0x9fa   :  { %5307 = vtanh.f32 %v5126_v1 }
 0x9fb   :  { %5309 = vtanh.f32 %v2638_v53 }
 0xa02   :  { %v5304_v57 = vpop.eup %5303 }
 0xa03   :  { %v2642_v8 = vmul.f32 0.5, %v5304_v57  ;;  %v5306_v10 = vpop.eup %5305 }
 0xa04   :  { %v2643_v20 = vmul.f32 0.5, %v5306_v10  ;;  %v5308_v24 = vpop.eup %5307 }
 0xa05   :  { %v2645_v6 = vadd.f32 0.5, %v2642_v8  ;;  %v5310_v63 = vpop.eup %5309 }
 0xa06   :  { %v2646_v37 = vadd.f32 0.5, %v2643_v20  ;;  %v2644_v59 = vmul.f32 0.5, %v5310_v63 }
 0xa07   :  { %v2650_v11 = vmul.f32 %v5308_v24, %v2645_v6 }
 0xa08   :  { %v2649_v43 = vmul.f32 %v2646_v37, %v6269_v19  ;;  %v2647_v51 = vadd.f32 0.5, %v2644_v59 }
 0xa0a   :  { %v6311_v46 = vadd.f32 %v2650_v11, %v2649_v43 }
 0xa0c   :  { %5311 = vtanh.f32 %v6311_v46 }
 0xa16   :  { %v5312_v2 = vpop.eup %5311 }
 0xa17   :  { %v2653_v34 = vmul.f32 %v5312_v2, %v2647_v51 }
 0xa19   :  { %2727 = vmatmul.mubr.f32.vlgmr.msra.gmra.mrb[20].mxu0 %v2653_v34  ;;  %2798 = vmatmul.mubr.f32.vlgmr.msra.gmra.mrb[20].mxu1 %v2653_v34 }
 0xa1a   :  { %4734 = vmatpush1.bf16.msra.mxu0 %v6109_v61  ;;  %4766 = vmatpush1.bf16.msra.mxu1 %v6112_v23 }
 0xa1b   :  { %4736 = vmatprep.subr.bf16.mxu0 %v6117_v50  ;;  %4768 = vmatprep.subr.bf16.mxu1 %v6119_v33 }
 0xa1c   :  { %2898 = vmatprep.mubr.f32.mxu0 %v5448_v0  ;;  %2969 = vmatprep.mubr.f32.mxu1 %v5448_v0 }
 0xa1e   :  { %4738 = vmatpush1.bf16.msra.mxu0 %v6121_v28  ;;  %4770 = vmatpush1.bf16.msra.mxu1 %v6124_v47 }
 0xa1f   :  { %4740 = vmatprep.subr.bf16.mxu0 %v6129_v52  ;;  %4772 = vmatprep.subr.bf16.mxu1 %v6131_v26 }
 0xa22   :  { %4742 = vmatpush1.bf16.msra.mxu0 %v6133_v29  ;;  %4774 = vmatpush1.bf16.msra.mxu1 %v6136_v41 }
 0xa23   :  { %4744 = vmatprep.subr.bf16.mxu0 %v6141_v54  ;;  %4776 = vmatprep.subr.bf16.mxu1 %v6143_v4 }
 0xa26   :  { %4746 = vmatpush1.bf16.msra.mxu0 %v6145_v7  ;;  %4778 = vmatpush1.bf16.msra.mxu1 %v6148_v21 }
 0xa27   :  { %4748 = vmatprep.subr.bf16.mxu0 %v6153_v38  ;;  %4780 = vmatprep.subr.bf16.mxu1 %v6155_v35 }
 0xa2a   :  { %4750 = vmatpush1.bf16.msra.mxu0 %v6157_v49  ;;  %4782 = vmatpush1.bf16.msra.mxu1 %v6160_v32 }
 0xa2b   :  { %4752 = vmatprep.subr.bf16.mxu0 %v6164_v9  ;;  %4784 = vmatprep.subr.bf16.mxu1 %v6166_v13 }
 0xa2e   :  { %4754 = vmatpush1.bf16.msra.mxu0 %v6169_v18  ;;  %4786 = vmatpush1.bf16.msra.mxu1 %v6173_v14 }
 0xa2f   :  { %4756 = vmatprep.subr.bf16.mxu0 %v6175_v17  ;;  %4788 = vmatprep.subr.bf16.mxu1 %v6177_v44 }
 0xa32   :  { %4758 = vmatpush1.bf16.msra.mxu0 %v6180_v58  ;;  %4790 = vmatpush1.bf16.msra.mxu1 %v6184_v3 }
 0xa33   :  { %4760 = vmatprep.subr.bf16.mxu0 %v6189_v27  ;;  %4792 = vmatprep.subr.bf16.mxu1 %v6191_v15 }
 0xa36   :  { %4762 = vmatpush1.bf16.msra.mxu0 %v6193_v42  ;;  %4794 = vmatpush1.bf16.msra.mxu1 %v6196_v55 }
 0xa37   :  { %4796 = vmatprep.subr.bf16.mxu0 %v6105_v16  ;;  %4828 = vmatprep.subr.bf16.mxu1 %v6107_v60 }
 0xaec   :  { %v2728_v19 = vpop.f32.mrb[20].mxu0  ;;  %v2799_v39 = vpop.f32.mrb[20].mxu1 }
 0xaed   :  { %v5111_v31 = vadd.f32 %v2728_v19, %v6251_v56  ;;  %v2730_v62 = vpop.f32.mrb[21].mxu0  ;;  %v2801_v48 = vpop.f32.mrb[21].mxu1  ;;  %v5127_v1 = vadd.f32 %v2799_v39, %v6266_v45 }
 0xaee   :  { %v5112_v22 = vadd.f32 %v2730_v62, %v6255_v12  ;;  %v5128_v40 = vadd.f32 %v2801_v48, %v6260_v36 }
 0xaef   :  { %v2808_v25 = vmul.f32 0.5, %v5111_v31  ;;  %v2810_v5 = vmul.f32 0.5, %v5127_v1 }
 0xaf0   :  { %v2809_v30 = vmul.f32 0.5, %v5112_v22 }
 0xaf1   :  { %5313 = vtanh.f32 %v2808_v25 }
 0xaf2   :  { %5315 = vtanh.f32 %v2809_v30 }
 0xaf3   :  { %5317 = vtanh.f32 %v5128_v40 }
 0xaf4   :  { %5319 = vtanh.f32 %v2810_v5 }
 0xafb   :  { %v5314_v53 = vpop.eup %5313 }
 0xafc   :  { %v2814_v57 = vmul.f32 0.5, %v5314_v53  ;;  %v5316_v8 = vpop.eup %5315 }
 0xafd   :  { %v2815_v6 = vmul.f32 0.5, %v5316_v8  ;;  %v5318_v20 = vpop.eup %5317 }
 0xafe   :  { %v2817_v10 = vadd.f32 0.5, %v2814_v57  ;;  %v5320_v63 = vpop.eup %5319 }
 0xaff   :  { %v2818_v24 = vadd.f32 0.5, %v2815_v6  ;;  %v2816_v59 = vmul.f32 0.5, %v5320_v63 }
 0xb00   :  { %v2822_v37 = vmul.f32 %v5318_v20, %v2817_v10 }
 0xb01   :  { %v2821_v11 = vmul.f32 %v2818_v24, %v6311_v46  ;;  %v2819_v51 = vadd.f32 0.5, %v2816_v59 }
 0xb03   :  { %v6353_v43 = vadd.f32 %v2822_v37, %v2821_v11 }
 0xb05   :  { %5321 = vtanh.f32 %v6353_v43 }
 0xb0f   :  { %v5322_v2 = vpop.eup %5321 }
 0xb10   :  { %v2825_v34 = vmul.f32 %v5322_v2, %v2819_v51 }
 0xb12   :  { %2899 = vmatmul.mubr.f32.vlgmr.msra.gmra.mrb[22].mxu0 %v2825_v34  ;;  %2970 = vmatmul.mubr.f32.vlgmr.msra.gmra.mrb[22].mxu1 %v2825_v34 }
 0xb13   :  { %4798 = vmatpush1.bf16.msra.mxu0 %v6109_v61  ;;  %4830 = vmatpush1.bf16.msra.mxu1 %v6112_v23 }
 0xb14   :  { %4800 = vmatprep.subr.bf16.mxu0 %v6117_v50  ;;  %4832 = vmatprep.subr.bf16.mxu1 %v6119_v33 }
 0xb15   :  { %3070 = vmatprep.mubr.f32.mxu0 %v5448_v0  ;;  %3141 = vmatprep.mubr.f32.mxu1 %v5448_v0 }
 0xb17   :  { %4802 = vmatpush1.bf16.msra.mxu0 %v6121_v28  ;;  %4834 = vmatpush1.bf16.msra.mxu1 %v6124_v47 }
 0xb18   :  { %4804 = vmatprep.subr.bf16.mxu0 %v6129_v52  ;;  %4836 = vmatprep.subr.bf16.mxu1 %v6131_v26 }
 0xb1b   :  { %4806 = vmatpush1.bf16.msra.mxu0 %v6133_v29  ;;  %4838 = vmatpush1.bf16.msra.mxu1 %v6136_v41 }
 0xb1c   :  { %4808 = vmatprep.subr.bf16.mxu0 %v6141_v54  ;;  %4840 = vmatprep.subr.bf16.mxu1 %v6143_v4 }
 0xb1f   :  { %4810 = vmatpush1.bf16.msra.mxu0 %v6145_v7  ;;  %4842 = vmatpush1.bf16.msra.mxu1 %v6148_v21 }
 0xb20   :  { %4812 = vmatprep.subr.bf16.mxu0 %v6153_v38  ;;  %4844 = vmatprep.subr.bf16.mxu1 %v6155_v35 }
 0xb23   :  { %4814 = vmatpush1.bf16.msra.mxu0 %v6157_v49  ;;  %4846 = vmatpush1.bf16.msra.mxu1 %v6160_v32 }
 0xb24   :  { %4816 = vmatprep.subr.bf16.mxu0 %v6164_v9  ;;  %4848 = vmatprep.subr.bf16.mxu1 %v6166_v13 }
 0xb27   :  { %4818 = vmatpush1.bf16.msra.mxu0 %v6169_v18  ;;  %4850 = vmatpush1.bf16.msra.mxu1 %v6173_v14 }
 0xb28   :  { %4820 = vmatprep.subr.bf16.mxu0 %v6175_v17  ;;  %4852 = vmatprep.subr.bf16.mxu1 %v6177_v44 }
 0xb2b   :  { %4822 = vmatpush1.bf16.msra.mxu0 %v6180_v58  ;;  %4854 = vmatpush1.bf16.msra.mxu1 %v6184_v3 }
 0xb2c   :  { %4824 = vmatprep.subr.bf16.mxu0 %v6189_v27  ;;  %4856 = vmatprep.subr.bf16.mxu1 %v6191_v15 }
 0xb2f   :  { %4826 = vmatpush1.bf16.msra.mxu0 %v6193_v42  ;;  %4858 = vmatpush1.bf16.msra.mxu1 %v6196_v55 }
 0xb30   :  { %4860 = vmatprep.subr.bf16.mxu0 %v6105_v16  ;;  %4892 = vmatprep.subr.bf16.mxu1 %v6107_v60 }
 0xbe5   :  { %v2900_v46 = vpop.f32.mrb[22].mxu0  ;;  %v2971_v19 = vpop.f32.mrb[22].mxu1 }
 0xbe6   :  { %v5113_v39 = vadd.f32 %v2900_v46, %v6251_v56  ;;  %v2902_v31 = vpop.f32.mrb[23].mxu0  ;;  %v2973_v62 = vpop.f32.mrb[23].mxu1  ;;  %v5129_v40 = vadd.f32 %v2971_v19, %v6266_v45 }
 0xbe7   :  { %v5114_v48 = vadd.f32 %v2902_v31, %v6255_v12  ;;  %v5130_v30 = vadd.f32 %v2973_v62, %v6260_v36 }
 0xbe8   :  { %v2980_v22 = vmul.f32 0.5, %v5113_v39  ;;  %v2982_v1 = vmul.f32 0.5, %v5129_v40 }
 0xbe9   :  { %v2981_v25 = vmul.f32 0.5, %v5114_v48 }
 0xbea   :  { %5323 = vtanh.f32 %v2980_v22 }
 0xbeb   :  { %5325 = vtanh.f32 %v2981_v25 }
 0xbec   :  { %5327 = vtanh.f32 %v5130_v30 }
 0xbed   :  { %5329 = vtanh.f32 %v2982_v1 }
 0xbf4   :  { %v5324_v5 = vpop.eup %5323 }
 0xbf5   :  { %v2986_v53 = vmul.f32 0.5, %v5324_v5  ;;  %v5326_v57 = vpop.eup %5325 }
 0xbf6   :  { %v2987_v10 = vmul.f32 0.5, %v5326_v57  ;;  %v5328_v6 = vpop.eup %5327 }
 0xbf7   :  { %v2989_v8 = vadd.f32 0.5, %v2986_v53  ;;  %v5330_v63 = vpop.eup %5329 }
 0xbf8   :  { %v2990_v20 = vadd.f32 0.5, %v2987_v10  ;;  %v2988_v59 = vmul.f32 0.5, %v5330_v63 }
 0xbf9   :  { %v2994_v24 = vmul.f32 %v5328_v6, %v2989_v8 }
 0xbfa   :  { %v2993_v37 = vmul.f32 %v2990_v20, %v6353_v43  ;;  %v2991_v51 = vadd.f32 0.5, %v2988_v59 }
 0xbfc   :  { %v6395_v11 = vadd.f32 %v2994_v24, %v2993_v37 }
 0xbfe   :  { %5331 = vtanh.f32 %v6395_v11 }
 0xc08   :  { %v5332_v2 = vpop.eup %5331 }
 0xc09   :  { %v2997_v34 = vmul.f32 %v5332_v2, %v2991_v51 }
 0xc0b   :  { %3071 = vmatmul.mubr.f32.vlgmr.msra.gmra.mrb[24].mxu0 %v2997_v34  ;;  %3142 = vmatmul.mubr.f32.vlgmr.msra.gmra.mrb[24].mxu1 %v2997_v34 }
 0xc0c   :  { %4862 = vmatpush1.bf16.msra.mxu0 %v6109_v61  ;;  %4894 = vmatpush1.bf16.msra.mxu1 %v6112_v23 }
 0xc0d   :  { %4864 = vmatprep.subr.bf16.mxu0 %v6117_v50  ;;  %4896 = vmatprep.subr.bf16.mxu1 %v6119_v33 }
 0xc0e   :  { %3242 = vmatprep.mubr.f32.mxu0 %v5448_v0  ;;  %3313 = vmatprep.mubr.f32.mxu1 %v5448_v0 }
 0xc10   :  { %4866 = vmatpush1.bf16.msra.mxu0 %v6121_v28  ;;  %4898 = vmatpush1.bf16.msra.mxu1 %v6124_v47 }
 0xc11   :  { %4868 = vmatprep.subr.bf16.mxu0 %v6129_v52  ;;  %4900 = vmatprep.subr.bf16.mxu1 %v6131_v26 }
 0xc14   :  { %4870 = vmatpush1.bf16.msra.mxu0 %v6133_v29  ;;  %4902 = vmatpush1.bf16.msra.mxu1 %v6136_v41 }
 0xc15   :  { %4872 = vmatprep.subr.bf16.mxu0 %v6141_v54  ;;  %4904 = vmatprep.subr.bf16.mxu1 %v6143_v4 }
 0xc18   :  { %4874 = vmatpush1.bf16.msra.mxu0 %v6145_v7  ;;  %4906 = vmatpush1.bf16.msra.mxu1 %v6148_v21 }
 0xc19   :  { %4876 = vmatprep.subr.bf16.mxu0 %v6153_v38  ;;  %4908 = vmatprep.subr.bf16.mxu1 %v6155_v35 }
 0xc1c   :  { %4878 = vmatpush1.bf16.msra.mxu0 %v6157_v49  ;;  %4910 = vmatpush1.bf16.msra.mxu1 %v6160_v32 }
 0xc1d   :  { %4880 = vmatprep.subr.bf16.mxu0 %v6164_v9  ;;  %4912 = vmatprep.subr.bf16.mxu1 %v6166_v13 }
 0xc20   :  { %4882 = vmatpush1.bf16.msra.mxu0 %v6169_v18  ;;  %4914 = vmatpush1.bf16.msra.mxu1 %v6173_v14 }
 0xc21   :  { %4884 = vmatprep.subr.bf16.mxu0 %v6175_v17  ;;  %4916 = vmatprep.subr.bf16.mxu1 %v6177_v44 }
 0xc24   :  { %4886 = vmatpush1.bf16.msra.mxu0 %v6180_v58  ;;  %4918 = vmatpush1.bf16.msra.mxu1 %v6184_v3 }
 0xc25   :  { %4888 = vmatprep.subr.bf16.mxu0 %v6189_v27  ;;  %4920 = vmatprep.subr.bf16.mxu1 %v6191_v15 }
 0xc28   :  { %4890 = vmatpush1.bf16.msra.mxu0 %v6193_v42  ;;  %4922 = vmatpush1.bf16.msra.mxu1 %v6196_v55 }
 0xc29   :  { %4924 = vmatprep.subr.bf16.mxu0 %v6105_v16  ;;  %4956 = vmatprep.subr.bf16.mxu1 %v6107_v60 }
 0xcde   :  { %v3072_v43 = vpop.f32.mrb[24].mxu0  ;;  %v3143_v46 = vpop.f32.mrb[24].mxu1 }
 0xcdf   :  { %v5115_v19 = vadd.f32 %v3072_v43, %v6251_v56  ;;  %v3074_v39 = vpop.f32.mrb[25].mxu0  ;;  %v3145_v31 = vpop.f32.mrb[25].mxu1  ;;  %v5131_v30 = vadd.f32 %v3143_v46, %v6266_v45 }
 0xce0   :  { %v5116_v62 = vadd.f32 %v3074_v39, %v6255_v12  ;;  %v5132_v25 = vadd.f32 %v3145_v31, %v6260_v36 }
 0xce1   :  { %v3152_v48 = vmul.f32 0.5, %v5115_v19  ;;  %v3154_v40 = vmul.f32 0.5, %v5131_v30 }
 0xce2   :  { %v3153_v22 = vmul.f32 0.5, %v5116_v62 }
 0xce3   :  { %5333 = vtanh.f32 %v3152_v48 }
 0xce4   :  { %5335 = vtanh.f32 %v3153_v22 }
 0xce5   :  { %5337 = vtanh.f32 %v5132_v25 }
 0xce6   :  { %5339 = vtanh.f32 %v3154_v40 }
 0xced   :  { %v5334_v1 = vpop.eup %5333 }
 0xcee   :  { %v3158_v5 = vmul.f32 0.5, %v5334_v1  ;;  %v5336_v53 = vpop.eup %5335 }
 0xcef   :  { %v3159_v8 = vmul.f32 0.5, %v5336_v53  ;;  %v5338_v10 = vpop.eup %5337 }
 0xcf0   :  { %v3161_v57 = vadd.f32 0.5, %v3158_v5  ;;  %v5340_v63 = vpop.eup %5339 }
 0xcf1   :  { %v3162_v6 = vadd.f32 0.5, %v3159_v8  ;;  %v3160_v59 = vmul.f32 0.5, %v5340_v63 }
 0xcf2   :  { %v3166_v20 = vmul.f32 %v5338_v10, %v3161_v57 }
 0xcf3   :  { %v3165_v24 = vmul.f32 %v3162_v6, %v6395_v11  ;;  %v3163_v51 = vadd.f32 0.5, %v3160_v59 }
 0xcf5   :  { %v6437_v37 = vadd.f32 %v3166_v20, %v3165_v24 }
 0xcf7   :  { %5341 = vtanh.f32 %v6437_v37 }
 0xd01   :  { %v5342_v2 = vpop.eup %5341 }
 0xd02   :  { %v3169_v34 = vmul.f32 %v5342_v2, %v3163_v51  ;;  %v3695_v2 = vld [vmem:[%s6598_s8 + $0x18] sm:$0xff] }
 0xd04   :  { %3243 = vmatmul.mubr.f32.vlgmr.msra.gmra.mrb[26].mxu0 %v3169_v34  ;;  %3314 = vmatmul.mubr.f32.vlgmr.msra.gmra.mrb[26].mxu1 %v3169_v34 }
 0xd05   :  { %4926 = vmatpush1.bf16.msra.mxu0 %v6109_v61  ;;  %4958 = vmatpush1.bf16.msra.mxu1 %v6112_v23 }
 0xd06   :  { %4928 = vmatprep.subr.bf16.mxu0 %v6117_v50  ;;  %4960 = vmatprep.subr.bf16.mxu1 %v6119_v33 }
 0xd07   :  { %3414 = vmatprep.mubr.f32.mxu0 %v5448_v0  ;;  %3485 = vmatprep.mubr.f32.mxu1 %v5448_v0 }
 0xd09   :  { %4930 = vmatpush1.bf16.msra.mxu0 %v6121_v28  ;;  %4962 = vmatpush1.bf16.msra.mxu1 %v6124_v47 }
 0xd0a   :  { %4932 = vmatprep.subr.bf16.mxu0 %v6129_v52  ;;  %4964 = vmatprep.subr.bf16.mxu1 %v6131_v26 }
 0xd0d   :  { %4934 = vmatpush1.bf16.msra.mxu0 %v6133_v29  ;;  %4966 = vmatpush1.bf16.msra.mxu1 %v6136_v41 }
 0xd0e   :  { %4936 = vmatprep.subr.bf16.mxu0 %v6141_v54  ;;  %4968 = vmatprep.subr.bf16.mxu1 %v6143_v4 }
 0xd11   :  { %4938 = vmatpush1.bf16.msra.mxu0 %v6145_v7  ;;  %4970 = vmatpush1.bf16.msra.mxu1 %v6148_v21 }
 0xd12   :  { %4940 = vmatprep.subr.bf16.mxu0 %v6153_v38  ;;  %4972 = vmatprep.subr.bf16.mxu1 %v6155_v35 }
 0xd15   :  { %4942 = vmatpush1.bf16.msra.mxu0 %v6157_v49  ;;  %4974 = vmatpush1.bf16.msra.mxu1 %v6160_v32 }
 0xd16   :  { %4944 = vmatprep.subr.bf16.mxu0 %v6164_v9  ;;  %4976 = vmatprep.subr.bf16.mxu1 %v6166_v13 }
 0xd19   :  { %4946 = vmatpush1.bf16.msra.mxu0 %v6169_v18  ;;  %4978 = vmatpush1.bf16.msra.mxu1 %v6173_v14 }
 0xd1a   :  { %4948 = vmatprep.subr.bf16.mxu0 %v6175_v17  ;;  %4980 = vmatprep.subr.bf16.mxu1 %v6177_v44 }
 0xd1d   :  { %4950 = vmatpush1.bf16.msra.mxu0 %v6180_v58  ;;  %4982 = vmatpush1.bf16.msra.mxu1 %v6184_v3 }
 0xd1e   :  { %4952 = vmatprep.subr.bf16.mxu0 %v6189_v27  ;;  %4984 = vmatprep.subr.bf16.mxu1 %v6191_v15 }
 0xd21   :  { %4954 = vmatpush1.bf16.msra.mxu0 %v6193_v42  ;;  %4986 = vmatpush1.bf16.msra.mxu1 %v6196_v55 }
 0xd22   :  { %4988 = vmatprep.subr.bf16.mxu0 %v6105_v16  ;;  %5020 = vmatprep.subr.bf16.mxu1 %v6107_v60 }
 0xdd7   :  { %v3244_v11 = vpop.f32.mrb[26].mxu0  ;;  %v3315_v43 = vpop.f32.mrb[26].mxu1 }
 0xdd8   :  { %v5117_v46 = vadd.f32 %v3244_v11, %v6251_v56  ;;  %v3246_v19 = vpop.f32.mrb[27].mxu0  ;;  %v3317_v39 = vpop.f32.mrb[27].mxu1  ;;  %v5133_v25 = vadd.f32 %v3315_v43, %v6266_v45  ;;  %v3696_v11 = vld [vmem:[%s6598_s8 + $0x20] sm:$0xff]  ;;  %v3697_v43 = vld [vmem:[%s6598_s8 + $0x28] sm:$0xff] }
 0xdd9   :  { %v5118_v31 = vadd.f32 %v3246_v19, %v6255_v12  ;;  %v5134_v22 = vadd.f32 %v3317_v39, %v6260_v36  ;;  %v3698_v19 = vld [vmem:[%s6598_s8 + $0x30] sm:$0xff]  ;;  %v3699_v39 = vld [vmem:[%s6598_s8 + $0x38] sm:$0xff] }
 0xdda   :  { %v3324_v62 = vmul.f32 0.5, %v5117_v46  ;;  %v3326_v16 = vmul.f32 0.5, %v5133_v25  ;;  %v5058_v46 = vpack.c.bf16 %v3697_v43, %v3696_v11  ;;  %v3702_v25 = vld [vmem:[%s6598_s8 + $0x50] sm:$0xff] }
 0xddb   :  { %v3325_v48 = vmul.f32 0.5, %v5118_v31  ;;  %v5061_v31 = vpack.c.bf16 %v3699_v39, %v3698_v19 }
 0xddc   :  { %5343 = vtanh.f32 %v3324_v62  ;;  %v3700_v62 = vld [vmem:[%s6598_s8 + $0x40] sm:$0xff] }
 0xddd   :  { %5345 = vtanh.f32 %v3325_v48  ;;  %v3701_v48 = vld [vmem:[%s6598_s8 + $0x48] sm:$0xff] }
 0xdde   :  { %5347 = vtanh.f32 %v5134_v22  ;;  %v5064_v22 = vpack.c.bf16 %v3701_v48, %v3700_v62 }
 0xddf   :  { %5349 = vtanh.f32 %v3326_v16  ;;  %v3703_v16 = vld [vmem:[%s6598_s8 + $0x58] sm:$0xff] }
 0xde6   :  { %v5344_v30 = vpop.eup %5343 }
 0xde7   :  { %v3330_v60 = vmul.f32 0.5, %v5344_v30  ;;  %v5346_v40 = vpop.eup %5345  ;;  %v5067_v30 = vpack.c.bf16 %v3703_v16, %v3702_v25 }
 0xde8   :  { %v3331_v5 = vmul.f32 0.5, %v5346_v40  ;;  %v5348_v53 = vpop.eup %5347  ;;  %v3705_v40 = vld [vmem:[%s6598_s8 + $0x68] sm:$0xff] }
 0xde9   :  { %v3333_v1 = vadd.f32 0.5, %v3330_v60  ;;  %v5350_v20 = vpop.eup %5349  ;;  %v3704_v60 = vld [vmem:[%s6598_s8 + $0x60] sm:$0xff] }
 0xdea   :  { %v3334_v57 = vadd.f32 0.5, %v3331_v5  ;;  %v3332_v24 = vmul.f32 0.5, %v5350_v20  ;;  %v3708_v5 = vld [vmem:[%s6591_s1] sm:$0xff] }
 0xdeb   :  { %v3338_v8 = vmul.f32 %v5348_v53, %v3333_v1  ;;  %v3709_v1 = vld [vmem:[%s6599_s9] sm:$0x3f]  ;;  %v5070_v53 = vpack.c.bf16 %v3705_v40, %v3704_v60 }
 0xdec   :  { %v3337_v10 = vmul.f32 %v3334_v57, %v6437_v37  ;;  %v3335_v63 = vadd.f32 0.5, %v3332_v24  ;;  %v3694_v37 = vld [vmem:[%s6598_s8 + $0x10] sm:$0xff] }
 0xded   :  { %v5055_v34 = vpack.c.bf16 %v3695_v2, %v3694_v37  ;;  %v3706_v57 = vld [vmem:[%s6598_s8 + $0x70] sm:$0xff] }
 0xdee   :  { %v6479_v6 = vadd.f32 %v3338_v8, %v3337_v10  ;;  %v3707_v8 = vld [vmem:[%s6598_s8 + $0x78] sm:$0xff] }
 0xdef   :  { %v5073_v10 = vpack.c.bf16 %v3707_v8, %v3706_v57 }
 0xdf0   :  { %5351 = vtanh.f32 %v6479_v6 }
 0xdfa   :  { %v5352_v59 = vpop.eup %5351 }
 0xdfb   :  { %v3341_v51 = vmul.f32 %v5352_v59, %v3335_v63 }
 0xdfd   :  { %3415 = vmatmul.mubr.f32.vlgmr.msra.gmra.mrb[28].mxu0 %v3341_v51  ;;  %3486 = vmatmul.mubr.f32.vlgmr.msra.gmra.mrb[28].mxu1 %v3341_v51 }
 0xdfe   :  { %4990 = vmatpush1.bf16.msra.mxu0 %v6109_v61  ;;  %5022 = vmatpush1.bf16.msra.mxu1 %v6112_v23 }
 0xdff   :  { %4992 = vmatprep.subr.bf16.mxu0 %v6117_v50  ;;  %5024 = vmatprep.subr.bf16.mxu1 %v6119_v33 }
 0xe00   :  { %3586 = vmatprep.mubr.f32.mxu0 %v5448_v0  ;;  %3657 = vmatprep.mubr.f32.mxu1 %v5448_v0 }
 0xe02   :  { %4994 = vmatpush1.bf16.msra.mxu0 %v6121_v28  ;;  %5026 = vmatpush1.bf16.msra.mxu1 %v6124_v47 }
 0xe03   :  { %4996 = vmatprep.subr.bf16.mxu0 %v6129_v52  ;;  %5028 = vmatprep.subr.bf16.mxu1 %v6131_v26 }
 0xe06   :  { %4998 = vmatpush1.bf16.msra.mxu0 %v6133_v29  ;;  %5030 = vmatpush1.bf16.msra.mxu1 %v6136_v41 }
 0xe07   :  { %5000 = vmatprep.subr.bf16.mxu0 %v6141_v54  ;;  %5032 = vmatprep.subr.bf16.mxu1 %v6143_v4 }
 0xe0a   :  { %5002 = vmatpush1.bf16.msra.mxu0 %v6145_v7  ;;  %5034 = vmatpush1.bf16.msra.mxu1 %v6148_v21 }
 0xe0b   :  { %5004 = vmatprep.subr.bf16.mxu0 %v6153_v38  ;;  %5036 = vmatprep.subr.bf16.mxu1 %v6155_v35 }
 0xe0e   :  { %5006 = vmatpush1.bf16.msra.mxu0 %v6157_v49  ;;  %5038 = vmatpush1.bf16.msra.mxu1 %v6160_v32 }
 0xe0f   :  { %5008 = vmatprep.subr.bf16.mxu0 %v6164_v9  ;;  %5040 = vmatprep.subr.bf16.mxu1 %v6166_v13 }
 0xe12   :  { %5010 = vmatpush1.bf16.msra.mxu0 %v6169_v18  ;;  %5042 = vmatpush1.bf16.msra.mxu1 %v6173_v14 }
 0xe13   :  { %5012 = vmatprep.subr.bf16.mxu0 %v6175_v17  ;;  %5044 = vmatprep.subr.bf16.mxu1 %v6177_v44 }
 0xe16   :  { %5014 = vmatpush1.bf16.msra.mxu0 %v6180_v58  ;;  %5046 = vmatpush1.bf16.msra.mxu1 %v6184_v3 }
 0xe17   :  { %5016 = vmatprep.subr.bf16.mxu0 %v6189_v27  ;;  %5048 = vmatprep.subr.bf16.mxu1 %v6191_v15  ;;  %v3692_v27 = vld [vmem:[%s6598_s8] sm:$0xff]  ;;  %v3693_v15 = vld [vmem:[%s6598_s8 + $0x8] sm:$0xff] }
 0xe1a   :  { %5018 = vmatpush1.bf16.msra.mxu0 %v6193_v42  ;;  %5050 = vmatpush1.bf16.msra.mxu1 %v6196_v55  ;;  %v5052_v42 = vpack.c.bf16 %v3693_v15, %v3692_v27  ;;  %v5449_v55 = vmov 0.0|0.0  }
 0xe1b   :  { %3923 = vmatprep.subr.mxu0 %v5448_v0  ;;  %5051 = vmatprep.subr.bf16.mxu1 %v5449_v55 }
 0xed0   :  { %v3416_v61 = vpop.f32.mrb[28].mxu0  ;;  %v3487_v23 = vpop.f32.mrb[28].mxu1 }
 0xed1   :  { %v5119_v50 = vadd.f32 %v3416_v61, %v6251_v56  ;;  %v3418_v33 = vpop.f32.mrb[29].mxu0  ;;  %v3489_v28 = vpop.f32.mrb[29].mxu1  ;;  %v5135_v41 = vadd.f32 %v3487_v23, %v6266_v45 }
 0xed2   :  { %v5120_v47 = vadd.f32 %v3418_v33, %v6255_v12  ;;  %v5136_v29 = vadd.f32 %v3489_v28, %v6260_v36 }
 0xed3   :  { %v3496_v52 = vmul.f32 0.5, %v5119_v50  ;;  %v3498_v54 = vmul.f32 0.5, %v5135_v41 }
 0xed4   :  { %v3497_v26 = vmul.f32 0.5, %v5120_v47 }
 0xed5   :  { %5353 = vtanh.f32 %v3496_v52 }
 0xed6   :  { %5355 = vtanh.f32 %v3497_v26 }
 0xed7   :  { %5357 = vtanh.f32 %v5136_v29 }
 0xed8   :  { %5359 = vtanh.f32 %v3498_v54 }
 0xedf   :  { %v5354_v4 = vpop.eup %5353 }
 0xee0   :  { %v3502_v7 = vmul.f32 0.5, %v5354_v4  ;;  %v5356_v21 = vpop.eup %5355 }
 0xee1   :  { %v3503_v35 = vmul.f32 0.5, %v5356_v21  ;;  %v5358_v49 = vpop.eup %5357 }
 0xee2   :  { %v3505_v38 = vadd.f32 0.5, %v3502_v7  ;;  %v5360_v14 = vpop.eup %5359 }
 0xee3   :  { %v3506_v32 = vadd.f32 0.5, %v3503_v35  ;;  %v3504_v17 = vmul.f32 0.5, %v5360_v14 }
 0xee4   :  { %v3510_v9 = vmul.f32 %v5358_v49, %v3505_v38 }
 0xee5   :  { %v3509_v13 = vmul.f32 %v3506_v32, %v6479_v6  ;;  %v3507_v44 = vadd.f32 0.5, %v3504_v17 }
 0xee7   :  { %v6520_v18 = vadd.f32 %v3510_v9, %v3509_v13  ;;  %v3903_v9 = vld [vmem:[%s6600_s10] ss:$0 sm:$0xff] }
 0xee9   :  { %5361 = vtanh.f32 %v6520_v18 }
 0xef3   :  { %v5362_v58 = vpop.eup %5361 }
 0xef4   :  { %v3513_v3 = vmul.f32 %v5362_v58, %v3507_v44 }
 0xef6   :  { %3587 = vmatmul.mubr.f32.vlgmr.msra.gmra.mrb[30].mxu0 %v3513_v3  ;;  %3658 = vmatmul.mubr.f32.vlgmr.msra.gmra.mrb[30].mxu1 %v3513_v3 }
 0xef7   :  { %5053 = vmatpush3.bf16.msra.mxu1 %v5052_v42  ;;  %3924 = vmatpush3.msk.msra.mxu0 %vm3714_vm2, %v3709_v1 }
 0xef8   :  { %5054 = vmatprep.subr.bf16.mxu1 %v5449_v55  ;;  %3925 = vmatprep.mubr.msk.f32.mxu0 %vm5450_vm3, %v5448_v0 }
 0xef9   :  { %3960 = vmatprep.mubr.msk.f32.mxu1 %vm5450_vm3, %v5448_v0 }
 0xefa   :  { %3926 = vmatmul.mubr.msk.f32.vlgmr.msra.gmra.mrb[32].mxu0 %vm3710_vm4, %v3708_v5 }
 0xefb   :  { %5056 = vmatpush3.bf16.msra.mxu1 %v5055_v34 }
 0xefc   :  { %5057 = vmatprep.subr.bf16.mxu1 %v5449_v55 }
 0xeff   :  { %5059 = vmatpush3.bf16.msra.mxu1 %v5058_v46 }
 0xf00   :  { %5060 = vmatprep.subr.bf16.mxu1 %v5449_v55 }
 0xf03   :  { %5062 = vmatpush3.bf16.msra.mxu1 %v5061_v31 }
 0xf04   :  { %5063 = vmatprep.subr.bf16.mxu1 %v5449_v55 }
 0xf07   :  { %5065 = vmatpush3.bf16.msra.mxu1 %v5064_v22 }
 0xf08   :  { %5066 = vmatprep.subr.bf16.mxu1 %v5449_v55 }
 0xf0b   :  { %5068 = vmatpush3.bf16.msra.mxu1 %v5067_v30 }
 0xf0c   :  { %5069 = vmatprep.subr.bf16.mxu1 %v5449_v55 }
 0xf0f   :  { %5071 = vmatpush3.bf16.msra.mxu1 %v5070_v53 }
 0xf10   :  { %5072 = vmatprep.subr.bf16.mxu1 %v5449_v55 }
 0xf13   :  { %5074 = vmatpush3.bf16.msra.mxu1 %v5073_v10 }
 0xfc9   :  { %v3588_v6 = vpop.f32.mrb[30].mxu0  ;;  %v3659_v20 = vpop.f32.mrb[30].mxu1 }
 0xfca   :  { %v5121_v24 = vadd.f32 %v3588_v6, %v6251_v56  ;;  %v3590_v63 = vpop.f32.mrb[31].mxu0  ;;  %v3661_v0 = vpop.f32.mrb[31].mxu1  ;;  %v5137_v50 = vadd.f32 %v3659_v20, %v6266_v45 }
 0xfcb   :  { %v5122_v59 = vadd.f32 %v3590_v63, %v6255_v12  ;;  %v5138_v23 = vadd.f32 %v3661_v0, %v6260_v36 }
 0xfcc   :  { %v3668_v51 = vmul.f32 0.5, %v5121_v24  ;;  %v3670_v33 = vmul.f32 0.5, %v5137_v50 }
 0xfcd   :  { %v3669_v61 = vmul.f32 0.5, %v5122_v59  ;;  %v3784_v45 = vpop.f32.mrb[32].mxu0 }
 0xfce   :  { %5363 = vtanh.f32 %v3668_v51  ;;  %v3927_v49 = vpop.f32.mrb[33].mxu0 }
 0xfcf   :  { %5365 = vtanh.f32 %v3669_v61 }
 0xfd0   :  { %5367 = vtanh.f32 %v5138_v23 }
 0xfd1   :  { %5369 = vtanh.f32 %v3670_v33 }
 0xfd8   :  { %v5364_v28 = vpop.eup %5363 }
 0xfd9   :  { %v3674_v47 = vmul.f32 0.5, %v5364_v28  ;;  %v5366_v52 = vpop.eup %5365 }
 0xfda   :  { %v3675_v56 = vmul.f32 0.5, %v5366_v52  ;;  %v5368_v29 = vpop.eup %5367 }
 0xfdb   :  { %v3677_v26 = vadd.f32 0.5, %v3674_v47  ;;  %v5370_v7 = vpop.eup %5369 }
 0xfdc   :  { %v3678_v41 = vadd.f32 0.5, %v3675_v56  ;;  %v3676_v36 = vmul.f32 0.5, %v5370_v7 }
 0xfdd   :  { %v3682_v54 = vmul.f32 %v5368_v29, %v3677_v26 }
 0xfde   :  { %v3681_v12 = vmul.f32 %v3678_v41, %v6520_v18  ;;  %v3679_v21 = vadd.f32 0.5, %v3676_v36 }
 0xfe0   :  { %v3683_v4 = vadd.f32 %v3682_v54, %v3681_v12 }
 0xfe2   :  { %5371 = vtanh.f32 %v3683_v4 }
 0xfec   :  { %v5372_v38 = vpop.eup %5371 }
 0xfed   :  { %v3685_v35 = vmul.f32 %v5372_v38, %v3679_v21 }
 0xfef   :  { %3961 = vmatmul.mubr.f32.vlgmr.msra.gmra.mrb[32].mxu1 %v3685_v35 }
0x10c2   :  { %v3854_v32 = vpop.f32.mrb[32].mxu1 }
0x10c3   :  { %v3855_v13 = vadd.f32 %v3854_v32, %v3784_v45  ;;  %v3962_v14 = vpop.f32.mrb[33].mxu1 }
0x10c5   :  { %v3865_v17 = vadd.f32 %v3903_v9, %v3855_v13 }
0x10c7   :  { %3867 = vst.msk [vmem:[%s6601_s11] sm:$0xff] %vm3866_vm5, %v3865_v17 }
0x10c8   :  { %3872 = vsyncpa [#allocation7], 1 }
0x10c9   :  { %3873 = vsyncpa [#allocation9], 1 }

</bundles_post_ra>
